<compile_context>
chip_gen: v5e
topology: v5e:2x2
jax: 0.10.0
libtpu: 0.0.40
codegen_flags: <defaults>
</compile_context>

<pallas_src>
import functools

import jax
import jax.numpy as jnp
from jax import lax
from jax.experimental import pallas as pl
from jax.experimental.pallas import tpu as pltpu

# --------------------------------------------------------------------------
# Synthetic config (stands in for cfg / agent attributes of the torch module)
# --------------------------------------------------------------------------
CFG = dict(
    gcn_node_dim=32,
    num_gcn_layers=2,
    num_edge_fc_layers=2,          # kernel below hard-codes 2 fc layers / GCN layer
    max_num_nodes=16,
    max_num_edges=32,
    state_encoder_hidden_size=[32, 32],
)
NODE_DIM = 4                        # agent.node_dim
NUMERICAL_SHAPE = (4, 4)            # agent numerical features (flattened -> 16)
EPSILON = 1e-6


# --------------------------------------------------------------------------
# Pallas kernel: tb_outer sub-blocks of TB graphs per grid step,
# activations carried feature-dim-on-sublanes (D rows, graphs*nodes on lanes)
# --------------------------------------------------------------------------
def _ngnn_kernel(hn0_ref, hep_ref, eidx_row_ref, eidx_col_ref,
                 w0a_ref, w0b_ref, b0_ref, w1_ref, b1_ref,
                 policy_ref, means_ref,
                 *, num_gcn_layers, tb, tb_outer, n_nodes, n_edges):
    f32 = jnp.float32
    bf16 = jnp.bfloat16
    TN = tb * n_nodes                 # packed node columns per sub-block (128)
    TE = tb * n_edges                 # packed edge columns per sub-block (256)
    D = w1_ref.shape[-1]
    mean_pad = 128 - 2 * D            # lane padding of the means row block

    # ---- per-graph averaging matrices (constant across sub-blocks/layers) ----
    rn = lax.broadcasted_iota(jnp.int32, (TN, tb), 0)
    cn = lax.broadcasted_iota(jnp.int32, (TN, tb), 1)
    avg_n = ((rn >= cn * n_nodes) &
             (rn < (cn + 1) * n_nodes)).astype(bf16) * (1.0 / n_nodes)   # (TN, tb)
    re_ = lax.broadcasted_iota(jnp.int32, (TE, tb), 0)
    ce_ = lax.broadcasted_iota(jnp.int32, (TE, tb), 1)
    avg_e = ((re_ >= ce_ * n_edges) &
             (re_ < (ce_ + 1) * n_edges)).astype(bf16) * (1.0 / n_edges)  # (TE, tb)

    for s in range(tb_outer):                    # static unrolled sub-block loop
        n0 = s * TN
        e0 = s * TE

        h_nodes = hn0_ref[:, n0:n0 + TN]                       # (D, TN) f32 residual acc
        h_ep_bf = hep_ref[:, e0:e0 + TE].astype(bf16)          # (8, TE) bf16 matmul operand

        # gather one-hot (TN, 2TE): columns ordered [idx0 | idx1]
        idx0_r = eidx_row_ref[0:1, e0:e0 + TE]                 # (1, TE) int32
        idx1_r = eidx_row_ref[1:2, e0:e0 + TE]
        idx_g = jnp.concatenate([idx0_r, idx1_r], axis=1)      # (1, 2TE)
        onehot_g = (lax.broadcasted_iota(jnp.int32, (TN, 2 * TE), 0)
                    == idx_g).astype(bf16)                     # (TN, 2TE), exact in bf16

        # scatter one-hot (2TE, TN): rows ordered [idx1 ; idx0] so the edge-FC
        # output x = [h12 | h21] is used unswapped (h12 -> idx1, h21 -> idx0).
        idx0_c = eidx_col_ref[e0:e0 + TE, 0:1]                 # (TE, 1) int32
        idx1_c = eidx_col_ref[e0:e0 + TE, 1:2]
        idx_s = jnp.concatenate([idx1_c, idx0_c], axis=0)      # (2TE, 1)
        onehot_s = (lax.broadcasted_iota(jnp.int32, (2 * TE, TN), 1)
                    == idx_s).astype(bf16)                     # (2TE, TN)

        # loop-invariant incident-edge counts; scale the small scatter result,
        # not the big one-hot.
        counts = jnp.sum(onehot_s.astype(f32), axis=0, keepdims=True)   # (1, TN)
        inv_c = 1.0 / (counts + EPSILON)

        h_edges = jnp.zeros((D, TE), f32)
        for l in range(num_gcn_layers):
            # gather both directions in one lane-dense MXU pass: (D,TN)@(TN,2TE)
            gathered = jnp.dot(h_nodes.astype(bf16), onehot_g,
                               preferred_element_type=f32)              # (D, 2TE)

            # edge-part term computed once at TE columns, added to both halves
            ep_term = (jnp.dot(w0b_ref[l], h_ep_bf,
                               preferred_element_type=f32)
                       + b0_ref[l])                                     # (D, TE)

            pre = (jnp.dot(w0a_ref[l], gathered.astype(bf16),
                           preferred_element_type=f32)
                   + jnp.concatenate([ep_term, ep_term], axis=1))       # (D, 2TE)
            x = jnp.tanh(pre)                                           # f32 tanh
            x = jnp.tanh(jnp.dot(w1_ref[l], x.astype(bf16),
                                 preferred_element_type=f32)
                         + b1_ref[l])                                   # (D, 2TE)

            h_edges = (x[:, :TE] + x[:, TE:]) * 0.5                     # (D, TE)

            # scatter to nodes: (D,2TE)@(2TE,TN), normalisation on the result
            scat = jnp.dot(x.astype(bf16), onehot_s,
                           preferred_element_type=f32)                  # (D, TN)
            h_nodes = h_nodes + scat * inv_c

        # ---- lane-dense policy store: h_edges already (D, TE) ----
        policy_ref[:, e0:e0 + TE] = h_edges

        # ---- per-graph means, stored as a lane-dense (tb, 128) row block ----
        nmean_t = jnp.dot(h_nodes.astype(bf16), avg_n,
                          preferred_element_type=f32)                   # (D, tb)
        emean_t = jnp.dot(h_edges.astype(bf16), avg_e,
                          preferred_element_type=f32)                   # (D, tb)
        means_row = jnp.transpose(
            jnp.concatenate([nmean_t, emean_t], axis=0))                # (tb, 2D)
        if mean_pad > 0:
            means_row = jnp.concatenate(
                [means_row, jnp.zeros((tb, mean_pad), f32)], axis=1)    # (tb, 128)
        means_ref[s * tb:(s + 1) * tb, :] = means_row


# --------------------------------------------------------------------------
# Wrapper (glue: batching, index packing, hoisted encoders, final concat)
# --------------------------------------------------------------------------
def ngnn_state_encoder(params, numerical, node_feature, edge_part_feature,
                       edge_index, edge_mask, stage, *, tb=8, tb_outer=None):
    B, N, _ = node_feature.shape
    E = edge_index.shape[1]
    D = CFG['gcn_node_dim']
    L = CFG['num_gcn_layers']
    f32 = jnp.float32
    bf16 = jnp.bfloat16
    assert 2 * D <= 128, "means row block assumes 2*D fits in 128 lanes"

    # ---- numerical feature encoder hoisted to XLA (no graph dependence) ----
    num = numerical.reshape(B, -1).astype(f32)
    h_num = jnp.tanh(num @ params['wnum0'] + params['bnum0'])
    h_num = jnp.tanh(h_num @ params['wnum1'] + params['bnum1'])

    # ---- choose sub-block count so the grid keeps >= 2 blocks (v7x megacore) ----
    if tb_outer is None:
        tb_outer = max(1, min(4, pl.cdiv(B, tb) // 2))
    G = pl.cdiv(B, tb * tb_outer)
    B_pad = G * tb_outer * tb
    pad = B_pad - B

    def padb(x):
        if pad == 0:
            return x
        return jnp.pad(x, ((0, pad),) + ((0, 0),) * (x.ndim - 1))

    BLK_N = tb_outer * tb * N
    BLK_E = tb_outer * tb * E

    # ---- node / edge-part encoders hoisted out of the kernel ----
    h_nodes0 = padb(node_feature.astype(f32)) @ params['wn'] + params['bn']    # (B_pad,N,D)
    h_ep = padb(edge_part_feature.astype(f32)) @ params['wep'] + params['bep']  # (B_pad,E,8)

    # feature-on-sublanes layouts for the kernel
    hn0_t = h_nodes0.reshape(G, BLK_N, D).transpose(2, 0, 1).reshape(D, G * BLK_N)
    hep_t = h_ep.reshape(G, BLK_E, 8).transpose(2, 0, 1).reshape(8, G * BLK_E)

    # fold the within-sub-block graph offset into the node indices; provide
    # both orientations so both one-hots are built with a single compare.
    offs = (jnp.arange(B_pad, dtype=jnp.int32) % tb) * N
    idx_off = padb(edge_index.astype(jnp.int32)) + offs[:, None, None]         # (B_pad,E,2)
    eidx_col = idx_off.reshape(B_pad * E, 2)                                   # (G*BLK_E, 2)
    eidx_row = eidx_col.T                                                      # (2, G*BLK_E)

    # pre-transposed weights (W^T for the D-on-sublanes layout), bf16 matmul operands
    w0a_t = jnp.transpose(params['w0_full'][:, :D, :], (0, 2, 1)).astype(bf16)  # (L,D,D)
    w0b_t = jnp.transpose(params['w0_full'][:, D:, :], (0, 2, 1)).astype(bf16)  # (L,D,8)
    b0_t = jnp.transpose(params['b0'], (0, 2, 1)).astype(f32)                   # (L,D,1)
    w1_t = jnp.transpose(params['w1'], (0, 2, 1)).astype(bf16)                  # (L,D,D)
    b1_t = jnp.transpose(params['b1'], (0, 2, 1)).astype(f32)                   # (L,D,1)

    data_inputs = [hn0_t, hep_t, eidx_row, eidx_col]
    data_specs = [
        pl.BlockSpec((D, BLK_N), lambda g: (0, g)),
        pl.BlockSpec((8, BLK_E), lambda g: (0, g)),
        pl.BlockSpec((2, BLK_E), lambda g: (0, g)),
        pl.BlockSpec((BLK_E, 2), lambda g: (g, 0)),
    ]
    weights = [w0a_t, w0b_t, b0_t, w1_t, b1_t]
    weight_specs = [pl.BlockSpec(w.shape, lambda g, _n=w.ndim: (0,) * _n)
                    for w in weights]

    out_shape = (
        jax.ShapeDtypeStruct((D, G * BLK_E), f32),   # policy, feature-on-sublanes
        jax.ShapeDtypeStruct((B_pad, 128), f32),     # [node mean | edge mean | 0-pad]
    )
    out_specs = (
        pl.BlockSpec((D, BLK_E), lambda g: (0, g)),
        pl.BlockSpec((tb_outer * tb, 128), lambda g: (g, 0)),
    )

    kernel = functools.partial(_ngnn_kernel, num_gcn_layers=L, tb=tb,
                               tb_outer=tb_outer, n_nodes=N, n_edges=E)

    pol_t, means = pl.pallas_call(
        kernel,
        out_shape=out_shape,
        grid_spec=pltpu.PrefetchScalarGridSpec(
            num_scalar_prefetch=0,
            grid=(G,),
            in_specs=data_specs + weight_specs,
            out_specs=out_specs),
        compiler_params=pltpu.CompilerParams(
            dimension_semantics=("parallel",)),      # v7x: shard batch blocks on 2 TCs
    )(*data_inputs, *weights)

    # undo the feature-on-sublanes layout and the packing (pure XLA layout glue)
    policy = pol_t.T.reshape(B_pad, E, D)[:B]
    nmean = means[:B, :D]
    emean = means[:B, D:2 * D]

    state_value = jnp.concatenate(
        [h_num, nmean, emean, stage.astype(f32)], axis=-1)
    return policy, state_value, edge_mask, stage


# --------------------------------------------------------------------------
# Deterministic parameter init (matching torch nn.Linear init conventions)
# --------------------------------------------------------------------------
def init_params(seed=0):
    key = jax.random.PRNGKey(seed)
    D = CFG['gcn_node_dim']
    H0, H1 = CFG['state_encoder_hidden_size']
    L = CFG['num_gcn_layers']
    F = NUMERICAL_SHAPE[0] * NUMERICAL_SHAPE[1]

    def linear(k, fan_in, fan_out):
        kw, kb = jax.random.split(k)
        bound = 1.0 / (fan_in ** 0.5)
        w = jax.random.uniform(kw, (fan_in, fan_out), jnp.float32, -bound, bound)
        b = jax.random.uniform(kb, (1, fan_out), jnp.float32, -bound, bound)
        return w, b

    keys = jax.random.split(key, 4 + 2 * L)
    p = {}
    p['wn'], p['bn'] = linear(keys[0], NODE_DIM, D)           # road_node_encoder
    p['wep'], p['bep'] = linear(keys[1], 5, 8)                # edge_part_encoder
    p['wnum0'], p['bnum0'] = linear(keys[2], F, H0)           # numerical encoder
    p['wnum1'], p['bnum1'] = linear(keys[3], H0, H1)

    w0s, b0s, w1s, b1s = [], [], [], []
    for l in range(L):                                        # road_edge_fc_layers2
        w0, b0 = linear(keys[4 + 2 * l], D + 8, D)
        w1, b1 = linear(keys[5 + 2 * l], D, D)
        w0s.append(w0); b0s.append(b0); w1s.append(w1); b1s.append(b1)
    p['w0_full'] = jnp.stack(w0s)          # (L, D+8, D)
    p['b0'] = jnp.stack(b0s)               # (L, 1, D)
    p['w1'] = jnp.stack(w1s)               # (L, D, D)
    p['b1'] = jnp.stack(b1s)               # (L, 1, D)
    return p


# --------------------------------------------------------------------------
# Pure-JAX reference (mirrors the torch forward; uses real gather/scatter_add)
# --------------------------------------------------------------------------
def reference_forward(params, numerical, node_feature, edge_part_feature,
                      edge_index, stage):
    B, N, _ = node_feature.shape
    E = edge_index.shape[1]
    D = CFG['gcn_node_dim']
    L = CFG['num_gcn_layers']

    num = numerical.reshape(B, -1).astype(jnp.float32)
    h_num = jnp.tanh(num @ params['wnum0'] + params['bnum0'])
    h_num = jnp.tanh(h_num @ params['wnum1'] + params['bnum1'])

    h_nodes = node_feature.astype(jnp.float32) @ params['wn'] + params['bn']
    h_ep = edge_part_feature.astype(jnp.float32) @ params['wep'] + params['bep']

    def scatter_count(h_e, idx):
        def one(he, ix):
            z = jnp.zeros((N, he.shape[-1]), he.dtype)
            return z.at[ix].add(he), z.at[ix].add(jnp.ones_like(he))
        return jax.vmap(one)(h_e, idx)

    def edge_fc(x, l):
        x = jnp.tanh(x @ params['w0_full'][l] + params['b0'][l])
        x = jnp.tanh(x @ params['w1'][l] + params['b1'][l])
        return x

    h_edges = None
    for l in range(L):
        idx0 = edge_index[:, :, 0]
        idx1 = edge_index[:, :, 1]
        g12 = jnp.take_along_axis(
            h_nodes, jnp.broadcast_to(idx0[..., None], (B, E, D)), axis=1)
        h12 = edge_fc(jnp.concatenate([g12, h_ep], axis=-1), l)
        g21 = jnp.take_along_axis(
            h_nodes, jnp.broadcast_to(idx1[..., None], (B, E, D)), axis=1)
        h21 = edge_fc(jnp.concatenate([g21, h_ep], axis=-1), l)
        h_edges = (h12 + h21) / 2
        s1, c1 = scatter_count(h21, idx0)
        s2, c2 = scatter_count(h12, idx1)
        h_nodes = h_nodes + (s1 + s2) / (c1 + c2 + EPSILON)

    state_value = jnp.concatenate(
        [h_num, h_nodes.mean(axis=1), h_edges.mean(axis=1),
         stage.astype(jnp.float32)], axis=-1)
    return h_edges, state_value


# --------------------------------------------------------------------------
if __name__ == "__main__":
    B = 16                               # batch (2 grid steps of TB=8 graphs)
    N = CFG['max_num_nodes']
    E = CFG['max_num_edges']
    D = CFG['gcn_node_dim']
    H1 = CFG['state_encoder_hidden_size'][-1]

    key = jax.random.PRNGKey(0)
    k1, k2, k3, k4, k5, k6 = jax.random.split(key, 6)
    numerical = jax.random.normal(k1, (B,) + NUMERICAL_SHAPE, jnp.float32)
    node_feature = jax.random.normal(k2, (B, N, NODE_DIM), jnp.float32)
    edge_part_feature = jax.random.normal(k3, (B, E, 5), jnp.float32)
    edge_index = jax.random.randint(k4, (B, E, 2), 0, N, jnp.int32)
    edge_mask = jax.random.bernoulli(k5, 0.8, (B, E))
    stage = jax.nn.one_hot(jax.random.randint(k6, (B,), 0, 3), 3,
                           dtype=jnp.float32)

    params = init_params(0)

    # TODO(synk): edge_mask is accepted but unused, matching the torch forward
    # (mean_features is called with mask=None); padded edges contribute.
    policy, state_value, out_mask, out_stage = ngnn_state_encoder(
        params, numerical, node_feature, edge_part_feature, edge_index,
        edge_mask, stage, tb=8)
    jax.block_until_ready((policy, state_value, out_mask, out_stage))

    assert policy.shape == (B, E, D)
    assert state_value.shape == (B, H1 + 2 * D + 3)

    ref_policy, ref_value = reference_forward(
        params, numerical, node_feature, edge_part_feature, edge_index, stage)
    # tolerance covers bf16 MXU operands (f32 accumulation) in the kernel
    assert float(jnp.max(jnp.abs(policy - ref_policy))) < 3e-2
    assert float(jnp.max(jnp.abs(state_value - ref_value))) < 3e-2

    print("KERNEL_OK")
</pallas_src>

<mosaic_0001>
module attributes {stable_mosaic.version = 11 : i64} {
  func.func @_ngnn_kernel(%arg0: i32, %arg1: memref<32x128xf32, #tpu.memory_space<vmem>>, %arg2: memref<8x256xf32, #tpu.memory_space<vmem>>, %arg3: memref<2x256xi32, #tpu.memory_space<vmem>>, %arg4: memref<256x2xi32, #tpu.memory_space<vmem>>, %arg5: memref<2x32x32xbf16, #tpu.memory_space<vmem>>, %arg6: memref<2x32x8xbf16, #tpu.memory_space<vmem>>, %arg7: memref<2x32x1xf32, #tpu.memory_space<vmem>>, %arg8: memref<2x32x32xbf16, #tpu.memory_space<vmem>>, %arg9: memref<2x32x1xf32, #tpu.memory_space<vmem>>, %arg10: memref<32x256xf32, #tpu.memory_space<vmem>>, %arg11: memref<8x128xf32, #tpu.memory_space<vmem>>) attributes {dimension_semantics = [#tpu.dimension_semantics<parallel>], iteration_bounds = array<i64: 2>, scalar_prefetch = 0 : i64, scratch_operands = 0 : i64, tpu.core_type = #tpu.core_type<tc>, window_params = [{transform_indices = @transform_0, window_bounds = array<i64: 32, 128>}, {transform_indices = @transform_1, window_bounds = array<i64: 8, 256>}, {transform_indices = @transform_2, window_bounds = array<i64: 2, 256>}, {transform_indices = @transform_3, window_bounds = array<i64: 256, 2>}, {pipeline_mode = #tpu.pipeline_mode<synchronous>, transform_indices = @transform_4, window_bounds = array<i64: 2, 32, 32>}, {pipeline_mode = #tpu.pipeline_mode<synchronous>, transform_indices = @transform_5, window_bounds = array<i64: 2, 32, 8>}, {pipeline_mode = #tpu.pipeline_mode<synchronous>, transform_indices = @transform_6, window_bounds = array<i64: 2, 32, 1>}, {pipeline_mode = #tpu.pipeline_mode<synchronous>, transform_indices = @transform_7, window_bounds = array<i64: 2, 32, 32>}, {pipeline_mode = #tpu.pipeline_mode<synchronous>, transform_indices = @transform_8, window_bounds = array<i64: 2, 32, 1>}, {transform_indices = @transform_9, window_bounds = array<i64: 32, 256>}, {transform_indices = @transform_10, window_bounds = array<i64: 8, 128>}]} {
    %0 = tpu.iota {dimensions = array<i32: 0>} : vector<128x8xi32>
    %1 = tpu.iota {dimensions = array<i32: 1>} : vector<128x8xi32>
    %c16_i32 = arith.constant 16 : i32
    %2 = vector.broadcast %c16_i32 : i32 to vector<128x8xi32>
    %3 = arith.muli %1, %2 : vector<128x8xi32>
    %4 = arith.cmpi sge, %0, %3 : vector<128x8xi32>
    %c1_i32 = arith.constant 1 : i32
    %5 = vector.broadcast %c1_i32 : i32 to vector<128x8xi32>
    %6 = arith.addi %1, %5 : vector<128x8xi32>
    %c16_i32_0 = arith.constant 16 : i32
    %7 = vector.broadcast %c16_i32_0 : i32 to vector<128x8xi32>
    %8 = arith.muli %6, %7 : vector<128x8xi32>
    %9 = arith.cmpi slt, %0, %8 : vector<128x8xi32>
    %10 = arith.andi %4, %9 : vector<128x8xi1>
    %11 = arith.extui %10 : vector<128x8xi1> to vector<128x8xi32>
    %12 = arith.sitofp %11 : vector<128x8xi32> to vector<128x8xf32>
    %13 = arith.truncf %12 : vector<128x8xf32> to vector<128x8xbf16>
    %cst = arith.constant 6.250000e-02 : bf16
    %14 = vector.broadcast %cst : bf16 to vector<128x8xbf16>
    %15 = arith.mulf %13, %14 : vector<128x8xbf16>
    %16 = tpu.iota {dimensions = array<i32: 0>} : vector<256x8xi32>
    %17 = tpu.iota {dimensions = array<i32: 1>} : vector<256x8xi32>
    %c32_i32 = arith.constant 32 : i32
    %18 = vector.broadcast %c32_i32 : i32 to vector<256x8xi32>
    %19 = arith.muli %17, %18 : vector<256x8xi32>
    %20 = arith.cmpi sge, %16, %19 : vector<256x8xi32>
    %c1_i32_1 = arith.constant 1 : i32
    %21 = vector.broadcast %c1_i32_1 : i32 to vector<256x8xi32>
    %22 = arith.addi %17, %21 : vector<256x8xi32>
    %c32_i32_2 = arith.constant 32 : i32
    %23 = vector.broadcast %c32_i32_2 : i32 to vector<256x8xi32>
    %24 = arith.muli %22, %23 : vector<256x8xi32>
    %25 = arith.cmpi slt, %16, %24 : vector<256x8xi32>
    %26 = arith.andi %20, %25 : vector<256x8xi1>
    %27 = arith.extui %26 : vector<256x8xi1> to vector<256x8xi32>
    %28 = arith.sitofp %27 : vector<256x8xi32> to vector<256x8xf32>
    %29 = arith.truncf %28 : vector<256x8xf32> to vector<256x8xbf16>
    %cst_3 = arith.constant 3.125000e-02 : bf16
    %30 = vector.broadcast %cst_3 : bf16 to vector<256x8xbf16>
    %31 = arith.mulf %29, %30 : vector<256x8xbf16>
    %c0 = arith.constant 0 : index
    %c0_4 = arith.constant 0 : index
    %32 = vector.load %arg1[%c0, %c0_4] : memref<32x128xf32, #tpu.memory_space<vmem>>, vector<32x128xf32>
    %c0_5 = arith.constant 0 : index
    %c0_6 = arith.constant 0 : index
    %33 = vector.load %arg2[%c0_5, %c0_6] : memref<8x256xf32, #tpu.memory_space<vmem>>, vector<8x256xf32>
    %34 = arith.truncf %33 : vector<8x256xf32> to vector<8x256xbf16>
    %c0_7 = arith.constant 0 : index
    %c0_8 = arith.constant 0 : index
    %35 = vector.load %arg3[%c0_7, %c0_8] : memref<2x256xi32, #tpu.memory_space<vmem>>, vector<1x256xi32>
    %c1 = arith.constant 1 : index
    %c0_9 = arith.constant 0 : index
    %36 = vector.load %arg3[%c1, %c0_9] : memref<2x256xi32, #tpu.memory_space<vmem>>, vector<1x256xi32>
    %37 = tpu.concatenate %35, %36 in 1 : vector<1x256xi32>, vector<1x256xi32> -> vector<1x512xi32>
    %38 = tpu.iota {dimensions = array<i32: 0>} : vector<128x512xi32>
    %39 = vector.broadcast %37 : vector<1x512xi32> to vector<128x512xi32>
    %40 = arith.cmpi eq, %38, %39 : vector<128x512xi32>
    %41 = arith.extui %40 : vector<128x512xi1> to vector<128x512xi32>
    %42 = arith.sitofp %41 : vector<128x512xi32> to vector<128x512xf32>
    %43 = arith.truncf %42 : vector<128x512xf32> to vector<128x512xbf16>
    %c0_10 = arith.constant 0 : index
    %c0_11 = arith.constant 0 : index
    %44 = vector.load %arg4[%c0_10, %c0_11] : memref<256x2xi32, #tpu.memory_space<vmem>>, vector<256x1xi32>
    %c0_12 = arith.constant 0 : index
    %c1_13 = arith.constant 1 : index
    %45 = vector.load %arg4[%c0_12, %c1_13] : memref<256x2xi32, #tpu.memory_space<vmem>>, vector<256x1xi32>
    %46 = tpu.concatenate %45, %44 in 0 : vector<256x1xi32>, vector<256x1xi32> -> vector<512x1xi32>
    %47 = tpu.iota {dimensions = array<i32: 1>} : vector<512x128xi32>
    %48 = vector.broadcast %46 : vector<512x1xi32> to vector<512x128xi32>
    %49 = arith.cmpi eq, %47, %48 : vector<512x128xi32>
    %50 = arith.extui %49 : vector<512x128xi1> to vector<512x128xi32>
    %51 = arith.sitofp %50 : vector<512x128xi32> to vector<512x128xf32>
    %52 = arith.truncf %51 : vector<512x128xf32> to vector<512x128xbf16>
    %53 = arith.extf %52 : vector<512x128xbf16> to vector<512x128xf32>
    %cst_14 = arith.constant dense<0.000000e+00> : vector<128xf32>
    %54 = vector.multi_reduction <add>, %53, %cst_14 [0] : vector<512x128xf32> to vector<128xf32>
    %55 = vector.shape_cast %54 : vector<128xf32> to vector<1x128xf32>
    %cst_15 = arith.constant 9.99999997E-7 : f32
    %56 = vector.broadcast %cst_15 : f32 to vector<1x128xf32>
    %57 = arith.addf %55, %56 : vector<1x128xf32>
    %cst_16 = arith.constant 1.000000e+00 : f32
    %58 = vector.broadcast %cst_16 : f32 to vector<1x128xf32>
    %59 = arith.divf %58, %57 : vector<1x128xf32>
    %60 = arith.truncf %32 : vector<32x128xf32> to vector<32x128xbf16>
    %cst_17 = arith.constant dense<0.000000e+00> : vector<32x512xf32>
    %61 = tpu.matmul %60, %43, %cst_17 {dimension_numbers = #tpu.dot_dimension_numbers<[1], [0], [0], [1], [0, 0, 1, 1], [], []>} : vector<32x128xbf16>, vector<128x512xbf16>, vector<32x512xf32> -> vector<32x512xf32>
    %c0_18 = arith.constant 0 : index
    %c0_19 = arith.constant 0 : index
    %c0_20 = arith.constant 0 : index
    %62 = vector.load %arg6[%c0_18, %c0_19, %c0_20] : memref<2x32x8xbf16, #tpu.memory_space<vmem>>, vector<1x32x8xbf16>
    %63 = vector.shape_cast %62 : vector<1x32x8xbf16> to vector<32x8xbf16>
    %cst_21 = arith.constant dense<0.000000e+00> : vector<32x256xf32>
    %64 = tpu.matmul %63, %34, %cst_21 {dimension_numbers = #tpu.dot_dimension_numbers<[1], [0], [0], [1], [0, 0, 1, 1], [], []>} : vector<32x8xbf16>, vector<8x256xbf16>, vector<32x256xf32> -> vector<32x256xf32>
    %c0_22 = arith.constant 0 : index
    %c0_23 = arith.constant 0 : index
    %c0_24 = arith.constant 0 : index
    %65 = vector.load %arg7[%c0_22, %c0_23, %c0_24] : memref<2x32x1xf32, #tpu.memory_space<vmem>>, vector<1x32x1xf32>
    %66 = vector.shape_cast %65 : vector<1x32x1xf32> to vector<32x1xf32>
    %67 = vector.broadcast %66 : vector<32x1xf32> to vector<32x256xf32>
    %68 = arith.addf %64, %67 : vector<32x256xf32>
    %c0_25 = arith.constant 0 : index
    %c0_26 = arith.constant 0 : index
    %c0_27 = arith.constant 0 : index
    %69 = vector.load %arg5[%c0_25, %c0_26, %c0_27] : memref<2x32x32xbf16, #tpu.memory_space<vmem>>, vector<1x32x32xbf16>
    %70 = vector.shape_cast %69 : vector<1x32x32xbf16> to vector<32x32xbf16>
    %71 = arith.truncf %61 : vector<32x512xf32> to vector<32x512xbf16>
    %cst_28 = arith.constant dense<0.000000e+00> : vector<32x512xf32>
    %72 = tpu.matmul %70, %71, %cst_28 {dimension_numbers = #tpu.dot_dimension_numbers<[1], [0], [0], [1], [0, 0, 1, 1], [], []>} : vector<32x32xbf16>, vector<32x512xbf16>, vector<32x512xf32> -> vector<32x512xf32>
    %73 = tpu.concatenate %68, %68 in 1 : vector<32x256xf32>, vector<32x256xf32> -> vector<32x512xf32>
    %74 = arith.addf %72, %73 : vector<32x512xf32>
    %75 = math.tanh %74 : vector<32x512xf32>
    %c0_29 = arith.constant 0 : index
    %c0_30 = arith.constant 0 : index
    %c0_31 = arith.constant 0 : index
    %76 = vector.load %arg8[%c0_29, %c0_30, %c0_31] : memref<2x32x32xbf16, #tpu.memory_space<vmem>>, vector<1x32x32xbf16>
    %77 = vector.shape_cast %76 : vector<1x32x32xbf16> to vector<32x32xbf16>
    %78 = arith.truncf %75 : vector<32x512xf32> to vector<32x512xbf16>
    %cst_32 = arith.constant dense<0.000000e+00> : vector<32x512xf32>
    %79 = tpu.matmul %77, %78, %cst_32 {dimension_numbers = #tpu.dot_dimension_numbers<[1], [0], [0], [1], [0, 0, 1, 1], [], []>} : vector<32x32xbf16>, vector<32x512xbf16>, vector<32x512xf32> -> vector<32x512xf32>
    %c0_33 = arith.constant 0 : index
    %c0_34 = arith.constant 0 : index
    %c0_35 = arith.constant 0 : index
    %80 = vector.load %arg9[%c0_33, %c0_34, %c0_35] : memref<2x32x1xf32, #tpu.memory_space<vmem>>, vector<1x32x1xf32>
    %81 = vector.shape_cast %80 : vector<1x32x1xf32> to vector<32x1xf32>
    %82 = vector.broadcast %81 : vector<32x1xf32> to vector<32x512xf32>
    %83 = arith.addf %79, %82 : vector<32x512xf32>
    %84 = math.tanh %83 : vector<32x512xf32>
    %85 = arith.truncf %84 : vector<32x512xf32> to vector<32x512xbf16>
    %cst_36 = arith.constant dense<0.000000e+00> : vector<32x128xf32>
    %86 = tpu.matmul %85, %52, %cst_36 {dimension_numbers = #tpu.dot_dimension_numbers<[1], [0], [0], [1], [0, 0, 1, 1], [], []>} : vector<32x512xbf16>, vector<512x128xbf16>, vector<32x128xf32> -> vector<32x128xf32>
    %87 = vector.broadcast %59 : vector<1x128xf32> to vector<32x128xf32>
    %88 = arith.mulf %86, %87 : vector<32x128xf32>
    %89 = arith.addf %32, %88 : vector<32x128xf32>
    %90 = arith.truncf %89 : vector<32x128xf32> to vector<32x128xbf16>
    %cst_37 = arith.constant dense<0.000000e+00> : vector<32x512xf32>
    %91 = tpu.matmul %90, %43, %cst_37 {dimension_numbers = #tpu.dot_dimension_numbers<[1], [0], [0], [1], [0, 0, 1, 1], [], []>} : vector<32x128xbf16>, vector<128x512xbf16>, vector<32x512xf32> -> vector<32x512xf32>
    %c1_38 = arith.constant 1 : index
    %c0_39 = arith.constant 0 : index
    %c0_40 = arith.constant 0 : index
    %92 = vector.load %arg6[%c1_38, %c0_39, %c0_40] : memref<2x32x8xbf16, #tpu.memory_space<vmem>>, vector<1x32x8xbf16>
    %93 = vector.shape_cast %92 : vector<1x32x8xbf16> to vector<32x8xbf16>
    %cst_41 = arith.constant dense<0.000000e+00> : vector<32x256xf32>
    %94 = tpu.matmul %93, %34, %cst_41 {dimension_numbers = #tpu.dot_dimension_numbers<[1], [0], [0], [1], [0, 0, 1, 1], [], []>} : vector<32x8xbf16>, vector<8x256xbf16>, vector<32x256xf32> -> vector<32x256xf32>
    %c1_42 = arith.constant 1 : index
    %c0_43 = arith.constant 0 : index
    %c0_44 = arith.constant 0 : index
    %95 = vector.load %arg7[%c1_42, %c0_43, %c0_44] : memref<2x32x1xf32, #tpu.memory_space<vmem>>, vector<1x32x1xf32>
    %96 = vector.shape_cast %95 : vector<1x32x1xf32> to vector<32x1xf32>
    %97 = vector.broadcast %96 : vector<32x1xf32> to vector<32x256xf32>
    %98 = arith.addf %94, %97 : vector<32x256xf32>
    %c1_45 = arith.constant 1 : index
    %c0_46 = arith.constant 0 : index
    %c0_47 = arith.constant 0 : index
    %99 = vector.load %arg5[%c1_45, %c0_46, %c0_47] : memref<2x32x32xbf16, #tpu.memory_space<vmem>>, vector<1x32x32xbf16>
    %100 = vector.shape_cast %99 : vector<1x32x32xbf16> to vector<32x32xbf16>
    %101 = arith.truncf %91 : vector<32x512xf32> to vector<32x512xbf16>
    %cst_48 = arith.constant dense<0.000000e+00> : vector<32x512xf32>
    %102 = tpu.matmul %100, %101, %cst_48 {dimension_numbers = #tpu.dot_dimension_numbers<[1], [0], [0], [1], [0, 0, 1, 1], [], []>} : vector<32x32xbf16>, vector<32x512xbf16>, vector<32x512xf32> -> vector<32x512xf32>
    %103 = tpu.concatenate %98, %98 in 1 : vector<32x256xf32>, vector<32x256xf32> -> vector<32x512xf32>
    %104 = arith.addf %102, %103 : vector<32x512xf32>
    %105 = math.tanh %104 : vector<32x512xf32>
    %c1_49 = arith.constant 1 : index
    %c0_50 = arith.constant 0 : index
    %c0_51 = arith.constant 0 : index
    %106 = vector.load %arg8[%c1_49, %c0_50, %c0_51] : memref<2x32x32xbf16, #tpu.memory_space<vmem>>, vector<1x32x32xbf16>
    %107 = vector.shape_cast %106 : vector<1x32x32xbf16> to vector<32x32xbf16>
    %108 = arith.truncf %105 : vector<32x512xf32> to vector<32x512xbf16>
    %cst_52 = arith.constant dense<0.000000e+00> : vector<32x512xf32>
    %109 = tpu.matmul %107, %108, %cst_52 {dimension_numbers = #tpu.dot_dimension_numbers<[1], [0], [0], [1], [0, 0, 1, 1], [], []>} : vector<32x32xbf16>, vector<32x512xbf16>, vector<32x512xf32> -> vector<32x512xf32>
    %c1_53 = arith.constant 1 : index
    %c0_54 = arith.constant 0 : index
    %c0_55 = arith.constant 0 : index
    %110 = vector.load %arg9[%c1_53, %c0_54, %c0_55] : memref<2x32x1xf32, #tpu.memory_space<vmem>>, vector<1x32x1xf32>
    %111 = vector.shape_cast %110 : vector<1x32x1xf32> to vector<32x1xf32>
    %112 = vector.broadcast %111 : vector<32x1xf32> to vector<32x512xf32>
    %113 = arith.addf %109, %112 : vector<32x512xf32>
    %114 = math.tanh %113 : vector<32x512xf32>
    %115 = vector.extract_strided_slice %114 {offsets = [0, 0], sizes = [32, 256], strides = [1, 1]} : vector<32x512xf32> to vector<32x256xf32>
    %116 = vector.extract_strided_slice %114 {offsets = [0, 256], sizes = [32, 256], strides = [1, 1]} : vector<32x512xf32> to vector<32x256xf32>
    %117 = arith.addf %115, %116 : vector<32x256xf32>
    %cst_56 = arith.constant 5.000000e-01 : f32
    %118 = vector.broadcast %cst_56 : f32 to vector<32x256xf32>
    %119 = arith.mulf %117, %118 : vector<32x256xf32>
    %120 = arith.truncf %114 : vector<32x512xf32> to vector<32x512xbf16>
    %cst_57 = arith.constant dense<0.000000e+00> : vector<32x128xf32>
    %121 = tpu.matmul %120, %52, %cst_57 {dimension_numbers = #tpu.dot_dimension_numbers<[1], [0], [0], [1], [0, 0, 1, 1], [], []>} : vector<32x512xbf16>, vector<512x128xbf16>, vector<32x128xf32> -> vector<32x128xf32>
    %122 = vector.broadcast %59 : vector<1x128xf32> to vector<32x128xf32>
    %123 = arith.mulf %121, %122 : vector<32x128xf32>
    %124 = arith.addf %89, %123 : vector<32x128xf32>
    %c0_58 = arith.constant 0 : index
    %c0_59 = arith.constant 0 : index
    %125 = vector.load %arg10[%c0_58, %c0_59] : memref<32x256xf32, #tpu.memory_space<vmem>>, vector<32x256xf32>
    tpu.vector_store %arg10[%c0_58, %c0_59], %119 {strides = array<i32>} : memref<32x256xf32, #tpu.memory_space<vmem>>, vector<32x256xf32>,
    %126 = arith.truncf %124 : vector<32x128xf32> to vector<32x128xbf16>
    %cst_60 = arith.constant dense<0.000000e+00> : vector<32x8xf32>
    %127 = tpu.matmul %126, %15, %cst_60 {dimension_numbers = #tpu.dot_dimension_numbers<[1], [0], [0], [1], [0, 0, 1, 1], [], []>} : vector<32x128xbf16>, vector<128x8xbf16>, vector<32x8xf32> -> vector<32x8xf32>
    %128 = arith.truncf %119 : vector<32x256xf32> to vector<32x256xbf16>
    %cst_61 = arith.constant dense<0.000000e+00> : vector<32x8xf32>
    %129 = tpu.matmul %128, %31, %cst_61 {dimension_numbers = #tpu.dot_dimension_numbers<[1], [0], [0], [1], [0, 0, 1, 1], [], []>} : vector<32x256xbf16>, vector<256x8xbf16>, vector<32x8xf32> -> vector<32x8xf32>
    %130 = tpu.concatenate %127, %129 in 0 : vector<32x8xf32>, vector<32x8xf32> -> vector<64x8xf32>
    %131 = tpu.transpose %130, [1, 0] : vector<64x8xf32> -> vector<8x64xf32>
    %cst_62 = arith.constant 0.000000e+00 : f32
    %132 = vector.broadcast %cst_62 : f32 to vector<8x64xf32>
    %133 = tpu.concatenate %131, %132 in 1 : vector<8x64xf32>, vector<8x64xf32> -> vector<8x128xf32>
    %c0_63 = arith.constant 0 : index
    %c0_64 = arith.constant 0 : index
    %134 = vector.load %arg11[%c0_63, %c0_64] : memref<8x128xf32, #tpu.memory_space<vmem>>, vector<8x128xf32>
    tpu.vector_store %arg11[%c0_63, %c0_64], %133 {strides = array<i32>} : memref<8x128xf32, #tpu.memory_space<vmem>>, vector<8x128xf32>,
    return
  }
  func.func @transform_0(%arg0: i32) -> (i32, i32) {
    %c0_i32 = arith.constant 0 : i32
    %c0_i32_0 = arith.constant 0 : i32
    return %c0_i32, %arg0 : i32, i32
  }
  func.func @transform_1(%arg0: i32) -> (i32, i32) {
    %c0_i32 = arith.constant 0 : i32
    %c0_i32_0 = arith.constant 0 : i32
    return %c0_i32, %arg0 : i32, i32
  }
  func.func @transform_2(%arg0: i32) -> (i32, i32) {
    %c0_i32 = arith.constant 0 : i32
    %c0_i32_0 = arith.constant 0 : i32
    return %c0_i32, %arg0 : i32, i32
  }
  func.func @transform_3(%arg0: i32) -> (i32, i32) {
    %c0_i32 = arith.constant 0 : i32
    %c0_i32_0 = arith.constant 0 : i32
    return %arg0, %c0_i32 : i32, i32
  }
  func.func @transform_4(%arg0: i32) -> (i32, i32, i32) {
    %c0_i32 = arith.constant 0 : i32
    %c0_i32_0 = arith.constant 0 : i32
    %c0_i32_1 = arith.constant 0 : i32
    %c0_i32_2 = arith.constant 0 : i32
    return %c0_i32, %c0_i32_0, %c0_i32_1 : i32, i32, i32
  }
  func.func @transform_5(%arg0: i32) -> (i32, i32, i32) {
    %c0_i32 = arith.constant 0 : i32
    %c0_i32_0 = arith.constant 0 : i32
    %c0_i32_1 = arith.constant 0 : i32
    %c0_i32_2 = arith.constant 0 : i32
    return %c0_i32, %c0_i32_0, %c0_i32_1 : i32, i32, i32
  }
  func.func @transform_6(%arg0: i32) -> (i32, i32, i32) {
    %c0_i32 = arith.constant 0 : i32
    %c0_i32_0 = arith.constant 0 : i32
    %c0_i32_1 = arith.constant 0 : i32
    %c0_i32_2 = arith.constant 0 : i32
    return %c0_i32, %c0_i32_0, %c0_i32_1 : i32, i32, i32
  }
  func.func @transform_7(%arg0: i32) -> (i32, i32, i32) {
    %c0_i32 = arith.constant 0 : i32
    %c0_i32_0 = arith.constant 0 : i32
    %c0_i32_1 = arith.constant 0 : i32
    %c0_i32_2 = arith.constant 0 : i32
    return %c0_i32, %c0_i32_0, %c0_i32_1 : i32, i32, i32
  }
  func.func @transform_8(%arg0: i32) -> (i32, i32, i32) {
    %c0_i32 = arith.constant 0 : i32
    %c0_i32_0 = arith.constant 0 : i32
    %c0_i32_1 = arith.constant 0 : i32
    %c0_i32_2 = arith.constant 0 : i32
    return %c0_i32, %c0_i32_0, %c0_i32_1 : i32, i32, i32
  }
  func.func @transform_9(%arg0: i32) -> (i32, i32) {
    %c0_i32 = arith.constant 0 : i32
    %c0_i32_0 = arith.constant 0 : i32
    return %c0_i32, %arg0 : i32, i32
  }
  func.func @transform_10(%arg0: i32) -> (i32, i32) {
    %c0_i32 = arith.constant 0 : i32
    %c0_i32_0 = arith.constant 0 : i32
    return %arg0, %c0_i32 : i32, i32
  }
}

</mosaic_0001>

<bundles_post_ra>
// kernel: tpu_custom_call.1
= control target key start
LH: loop header
LB: loop body
LE: loop exit
PB: predicated region body
PF: predicated region fallthrough
CT: control target
= control target key end

     0   :  { %s6674_s0 = inlined_call_operand.vmem [shape: f32[32,256], index: 0, kind: input, shape index: {}]   ;;  %s6675_s1 = inlined_call_operand.vmem [shape: f32[8,512], index: 1, kind: input, shape index: {}]   ;;  %s6676_s2 = inlined_call_operand.vmem [shape: s32[2,512], index: 2, kind: input, shape index: {}]   ;;  %s6677_s3 = inlined_call_operand.vmem [shape: s32[512,2], index: 3, kind: input, shape index: {}]   ;;  %s6678_s4 = inlined_call_operand.vmem [shape: bf16[2,32,32], index: 4, kind: input, shape index: {}]   ;;  %s6679_s5 = inlined_call_operand.vmem [shape: bf16[2,32,8], index: 5, kind: input, shape index: {}]   ;;  %s6680_s6 = inlined_call_operand.vmem [shape: f32[2,32,1], index: 6, kind: input, shape index: {}]   ;;  %s6681_s7 = inlined_call_operand.vmem [shape: bf16[2,32,32], index: 7, kind: input, shape index: {}]   ;;  %s6682_s8 = inlined_call_operand.vmem [shape: f32[2,32,1], index: 8, kind: input, shape index: {}]   ;;  %s6683_s9 = inlined_call_operand.hbm [shape: f32[32,512], index: 9, kind: output, shape index: {0}]   ;;  %s6684_s10 = inlined_call_operand.hbm [shape: f32[16,128], index: 10, kind: output, shape index: {1}]  }
   0x1   :  { %6920 = sst [smem:[#allocation93_spill]] %s6674_s0 }
   0x2   :  { %6921 = sst [smem:[#allocation94_spill]] %s6675_s1 }
   0x3   :  { %6922 = sst [smem:[#allocation95_spill]] %s6676_s2 }
   0x4   :  { %6923 = sst [smem:[#allocation96_spill]] %s6677_s3 }
   0x5   :  { %16 = vsyncpa [#allocation4], 0 }
   0x6   :  { %18 = vsyncpa [#allocation4 + $0x1], 0 }
   0x7   :  { %19 = vsyncpa [#allocation6], 0 }
   0x8   :  { %21 = vsyncpa [#allocation6 + $0x1], 0  ;;  %s4108_s13 = smov 0   ;;  %s4110_s14 = smov 0  }
   0x9   :  { %s4112_s15 = smov 0   ;;  %s4114_s16 = smov 0  }
   0xa LB: > { %s4129_s17 = sadd.s32 4294967295, %s4043_s16   ;;  %s3176_s18 = sadd.s32 4294967294, %s4043_s16   ;;  %s4043_s16 = sphi %s4114_s16, %s7435_s16   ;;  %s4039_s15 = sphi %s4112_s15, %s7434_s15   ;;  %s4035_s14 = sphi %s4110_s14, %s7433_s14   ;;  %s4031_s13 = sphi %s4108_s13, %s7432_s13  }
   0xb   : > { %s4133_s19 = sadd.s32 1, %s4043_s16   ;;  %s34_s20 = sadd.s32 1, %s4039_s15 }
   0xc   : > { %s31_s21 = ssub.s32 %s4043_s16, %s4133_s19  ;;  %p41_p0 = scmp.ne.s32.totalorder %s4039_s15, %s4035_s14 }
   0xd   : > { %p32_p1 = scmp.eq.s32.totalorder %s31_s21, 0  ;;  %p42_p2 = scmp.eq.s32.totalorder %s4043_s16, 0 }
   0xe   : > { %p254_p3 = scmp.eq.s32.totalorder %s4129_s17, 1  ;;  %p259_p4 = scmp.ne.s32.totalorder %s4035_s14, %s4031_s13 }
   0xf   : > { %s4145_s22 = scalar_select %p32_p1, %s4039_s15, %s34_s20  }
  0x10   : > { %p43_p5 = por %p42_p2, %p41_p0  ;;  %p4147_p6 = por %p254_p3, %p41_p0 }
  0x11   : > { %p260_p7 = scmp.eq.s32.totalorder %s3176_s18, 1  ;;  %p3178_p9 = scmp.ge.s32.totalorder %s4043_s16, 2 }
  0x13   : > { %p4151_p8 = por %p260_p7, %p259_p4  ;;  %317 = sbr.rel (%p3178_p9) target bundleno = 38 (0x26), region = 36 }
  0x18   : > { %320 = sbr.rel (!%p43_p5) target bundleno = 38 (0x26), region = 40  ;;  %s322_s25 = sand.u32 (%p43_p5), 1, %s4039_s15  }
  0x19   : > { %s3180_s26 = sshll.u32 (%p43_p5), %s4043_s16, 3  ;;  %s3179_s27 = sshll.u32 (%p43_p5), %s322_s25, 5 }
  0x1a   : > { %s6926_s0 = sld [smem:[#allocation93_spill]] (%p43_p5)  ;;  %s324_s11 = scalar_lea.vmem (%p43_p5), [#allocation2], %s3179_s27 }
  0x20   : > { %s326_s30 = scalar_lea.vmem %s6926_s0, %s3180_s26 }
  0x21   : > { %v361_v0 = vld [vmem:[%s326_s30] sm:$0xff]  ;;  %v363_v1 = vld [vmem:[%s326_s30 + $0x10] sm:$0xff] }
  0x22   : > { %v365_v2 = vld [vmem:[%s326_s30 + $0x20] sm:$0xff]  ;;  %362 = vst [vmem:[%s324_s11] sm:$0xff] %v361_v0  ;;  %v367_v3 = vld [vmem:[%s326_s30 + $0x30] sm:$0xff] }
  0x23   : > { %364 = vst [vmem:[%s324_s11 + $0x8] sm:$0xff] %v363_v1 }
  0x24   : > { %366 = vst [vmem:[%s324_s11 + $0x10] sm:$0xff] %v365_v2 }
  0x25   : > { %368 = vst [vmem:[%s324_s11 + $0x18] sm:$0xff] %v367_v3 }
  0x26 PF: > { %p3181_p10 = scmp.ge.s32.totalorder %s4043_s16, 1  ;;  %p400_p11 = scmp.lt.s32.totalorder %s4043_s16, 3 }
  0x28   : > { %p401_p12 = pnand %p3181_p10, %p400_p11 }
  0x2a   : > { %404 = sbr.rel (%p401_p12) target bundleno = 1655 (0x677), region = 90 }
  0x2f   : > { %v1918_v4 = vld [vmem:[%s6680_s6] sm:$0xff]  ;;  %s3185_s20 = sshll.u32 %s4129_s17, 1  ;;  %v6709_v5 = vlaneseq  ;;  %v6707_v6 = vmov 0   ;;  %v1920_v7 = vld [vmem:[%s6680_s6 + $0x10] sm:$0xff]  ;;  %s3189_s26 = sshll.u32 %s4129_s17, 5  ;;  %v1919_v9 = vld [vmem:[%s6680_s6 + $0x8] sm:$0xff] }
  0x30   : > { %3806 = vset.pattern.permute.xlu1 %v6707_v6  ;;  %3805 = vset.pattern.permute.xlu0 %v6707_v6  ;;  %p465_p13 = scmp.lt.s32.totalorder %s3185_s20, 3  ;;  %p477_p0 = scmp.lt.s32.totalorder %s3189_s26, 63  ;;  %v1921_v12 = vld [vmem:[%s6680_s6 + $0x18] sm:$0xff]  ;;  %v6934_v26 = vmov 0  ;;  %v6712_v27 = vmov 1.0|1.0  }
  0x31   : > { %1924 = vperm.xlu1 %3806, %v1918_v4   ;;  %v4176_v8 = vshrl.u32 %v6709_v5, 7  ;;  %1934 = vperm.xlu0 %3805, %v1920_v7   ;;  %s6928_s2 = sld [smem:[#allocation95_spill]]  ;;  %v6937_v28 = vmov 0  ;;  %v6942_v31 = vmov 0  ;;  %v6945_v33 = vmov 0  ;;  %s4497_s0 = sand.u32 1, %s4035_s14  }
  0x32   : > { %s7437_s20 = smov (!%p465_p13, %s3185_s20), 3  ;;  %s7439_s26 = smov (!%p477_p0, %s3189_s26), 63  ;;  %v6948_v34 = vmov 0  ;;  %v6951_v35 = vmov 0  ;;  %v6956_v38 = vmov 0  ;;  %v6959_v40 = vmov 0 }
  0x33   : > { %6927 = vst [vmem:[#allocation9_spill] sm:$0xff] %v4176_v8  ;;  %s3188_s27 = sshll.u32 %s7437_s20, 1  ;;  %v4188_v10 = vadd.s32 112, %v4176_v8  ;;  %v4191_v11 = vadd.s32 120, %v4176_v8  ;;  %s3190_s18 = sshll.u32 %s7439_s26, 3  ;;  %v4205_v20 = vadd.s32 96, %v4176_v8 }
  0x34   : > { %s6931_s3 = sld [smem:[#allocation96_spill]]  ;;  %v4208_v21 = vadd.s32 104, %v4176_v8  ;;  %s4046_s26 = smov 1   ;;  %v4252_v29 = vadd.s32 80, %v4176_v8  ;;  %v4255_v30 = vadd.s32 88, %v4176_v8  ;;  %v4310_v36 = vadd.s32 64, %v4176_v8 }
  0x35   : > { %6929 = vst [vmem:[#allocation10_spill] sm:$0xff] %v4188_v10  ;;  %v4313_v37 = vadd.s32 72, %v4176_v8  ;;  %v6962_v42 = vmov 0  ;;  %v6965_v43 = vmov 0  ;;  %v4372_v44 = vadd.s32 48, %v4176_v8  ;;  %s3186_s11 = sshll.u32 %s7437_s20, 3 }
  0x36   : > { %6930 = vst [vmem:[#allocation11_spill] sm:$0xff] %v4191_v11  ;;  %v4375_v45 = vadd.s32 56, %v4176_v8  ;;  %v6971_v46 = vmov 0  ;;  %v6974_v48 = vmov 0  ;;  %v6979_v49 = vmov 0  ;;  %s7053_s1 = sld [smem:[#allocation94_spill]] }
  0x37   : > { %s474_s12 = scalar_lea.vmem %s6928_s2, %s3188_s27  ;;  %6932 = vst [vmem:[#allocation12_spill] sm:$0xff] %v4205_v20  ;;  %v6982_v50 = vmov 0  ;;  %v4446_v51 = vadd.s32 32, %v4176_v8  ;;  %v4449_v52 = vadd.s32 40, %v4176_v8  ;;  %v6987_v53 = vmov 0  ;;  %s3182_s27 = sshll.u32 %s4497_s0, 5 }
  0x38   : > { %v940_v13 = vld [vmem:[%s474_s12] ss:$2 sm:$0x3]  ;;  %v3239_v14 = vld [vmem:[%s474_s12 + $0x1] ss:$2 sm:$0x3] }
  0x39   : > { %v943_v15 = vperm.slane %v940_v13, 0  ;;  %v944_v16 = vperm.slane %v940_v13, 1  ;;  %v945_v17 = vperm.slane %v3239_v14, 0  ;;  %v946_v18 = vperm.slane %v3239_v14, 1  ;;  %6933 = vst [vmem:[#allocation13_spill] sm:$0xff] %v4208_v21  ;;  %1929 = vperm.xlu1 %3806, %v1919_v9   ;;  %1939 = vperm.xlu0 %3805, %v1921_v12   ;;  %s4641_s30 = scalar_lea.vmem [#allocation2], %s3182_s27 }
  0x3a   : > { %s4199_s29 = scalar_lea.vmem %s6931_s3, %s3190_s18  ;;  %6940 = vst [vmem:[#allocation16_spill] sm:$0xff] %v4252_v29  ;;  %v6990_v55 = vmov 0  ;;  %v6994_v57 = vmov 0  ;;  %v6997_v58 = vmov 0  ;;  %v4511_v59 = vadd.s32 16, %v4176_v8  ;;  %v932_v14 = vld [vmem:[%s4641_s30] sm:$0xff] }
  0x3b   : > { %v4202_v19 = vld [vmem:[%s4199_s29 + $0x70] sm:$0xff]  ;;  %v4212_v22 = vperm.slane %v943_v15, 0  ;;  %v4214_v23 = vperm.slane %v944_v16, 0  ;;  %v4216_v24 = vperm.slane %v945_v17, 0  ;;  %v4218_v25 = vperm.slane %v946_v18, 0  ;;  %6941 = vst [vmem:[#allocation17_spill] sm:$0xff] %v4255_v30 }
  0x3c   : > { %1235 = vrot.lane.b32.xlu2 %v4202_v19, %s4046_s26  ;;  %v4265_v32 = vld [vmem:[%s4199_s29 + $0xf8] sm:$0xff]  ;;  %6954 = vst [vmem:[#allocation22_spill] sm:$0xff] %v4310_v36  ;;  %v4327_v39 = vld [vmem:[%s4199_s29 + $0xf0] sm:$0xff]  ;;  %v4390_v47 = vld [vmem:[%s4199_s29 + $0xe0] sm:$0xff]  ;;  %v4514_v60 = vadd.s32 24, %v4176_v8  ;;  %v7004_v61 = vmov 0  ;;  %s468_s21 = scalar_lea.vmem %s7053_s1, %s3186_s11 }
  0x3d   : > { %vm1007_vm0 = vcmp.eq.s32.totalorder %v4188_v10, %v4212_v22  ;;  %vm1011_vm1 = vcmp.eq.s32.totalorder %v4191_v11, %v4212_v22  ;;  %vm1008_vm2 = vcmp.eq.s32.totalorder %v4188_v10, %v4214_v23  ;;  %vm1012_vm3 = vcmp.eq.s32.totalorder %v4191_v11, %v4214_v23  ;;  %6955 = vst [vmem:[#allocation23_spill] sm:$0xff] %v4313_v37  ;;  %v4344_v41 = vld [vmem:[%s4199_s29 + $0x78] sm:$0xff]  ;;  %v4463_v54 = vld [vmem:[%s4199_s29 + $0x68] sm:$0xff]  ;;  %v4480_v56 = vld [vmem:[%s4199_s29 + $0x60] sm:$0xff]  ;;  %s3969_s1 = scalar_lea.hbm %s6683_s9, 128 }
  0x3e   : > { %vm4228_vm4 = vmpackc.low %vm1011_vm1, %vm1007_vm0  ;;  %vm1009_vm5 = vcmp.eq.s32.totalorder %v4188_v10, %v4216_v24  ;;  %vm1013_vm6 = vcmp.eq.s32.totalorder %v4191_v11, %v4216_v24  ;;  %vm1010_vm7 = vcmp.eq.s32.totalorder %v4188_v10, %v4218_v25  ;;  %vm1014_vm8 = vcmp.eq.s32.totalorder %v4191_v11, %v4218_v25  ;;  %6968 = vst [vmem:[#allocation28_spill] sm:$0xff] %v4372_v44  ;;  %v4532_v62 = vld [vmem:[%s4199_s29 + $0x58] sm:$0xff]  ;;  %v4603_v4 = vld [vmem:[%s4199_s29 + $0x50] sm:$0xff] }
  0x3f   : > { %v6935_v26 = vsel %vm4228_vm4, 4294967295, %v6934_v26  ;;  %3369 = vmatpush.bf16.msk.msra.mxu0 %vm4228_vm4, %v6712_v27  ;;  %vm4243_vm9 = vmpackc.low %vm1012_vm3, %vm1008_vm2  ;;  %vm999_vm10 = vcmp.eq.s32.totalorder %v4205_v20, %v4212_v22  ;;  %vm1003_vm11 = vcmp.eq.s32.totalorder %v4208_v21, %v4212_v22  ;;  %vm1000_vm13 = vcmp.eq.s32.totalorder %v4205_v20, %v4214_v23  ;;  %6969 = vst [vmem:[#allocation29_spill] sm:$0xff] %v4375_v45  ;;  %v4617_v9 = vld [vmem:[%s4199_s29 + $0xe8] sm:$0xff]  ;;  %v4661_v17 = vld [vmem:[%s4199_s29 + $0x40] sm:$0xff] }
  0x40   : > { %6936 = vst [vmem:[#allocation14_spill] sm:$0xff] %v6935_v26  ;;  %v6938_v28 = vsel %vm4243_vm9, 4294967295, %v6937_v28  ;;  %3385 = vmatpush.bf16.msk.msra.mxu1 %vm4243_vm9, %v6712_v27  ;;  %vm4260_vm12 = vmpackc.low %vm1013_vm6, %vm1009_vm5  ;;  %vm1004_vm14 = vcmp.eq.s32.totalorder %v4208_v21, %v4214_v23  ;;  %vm1001_vm0 = vcmp.eq.s32.totalorder %v4205_v20, %v4216_v24  ;;  %vm1005_vm1 = vcmp.eq.s32.totalorder %v4208_v21, %v4216_v24  ;;  %v933_v15 = vld [vmem:[%s4641_s30 + $0x8] sm:$0xff]  ;;  %v4730_v6 = vld [vmem:[%s4199_s29 + $0xd0] sm:$0xff] }
  0x41   : > { %6939 = vst [vmem:[#allocation15_spill] sm:$0xff] %v6938_v28  ;;  %v6943_v31 = vsel %vm4260_vm12, 4294967295, %v6942_v31  ;;  %3401 = vmatpush.bf16.msk.msra.mxu2 %vm4260_vm12, %v6712_v27  ;;  %vm4277_vm15 = vmpackc.low %vm1014_vm8, %vm1010_vm7  ;;  %vm1002_vm3 = vcmp.eq.s32.totalorder %v4205_v20, %v4218_v25  ;;  %vm1006_vm5 = vcmp.eq.s32.totalorder %v4208_v21, %v4218_v25  ;;  %1269 = vrot.lane.b32.xlu1 %v4265_v32, %s4046_s26  ;;  %v7008_v63 = vmov 0  ;;  %v4738_v5 = vld [vmem:[%s4199_s29 + $0xc8] sm:$0xff]  ;;  %v4810_v21 = vld [vmem:[%s4199_s29 + $0x98] sm:$0xff] }
  0x42   : > { %6944 = vst [vmem:[#allocation18_spill] sm:$0xff] %v6943_v31  ;;  %v6946_v33 = vsel %vm4277_vm15, 4294967295, %v6945_v33  ;;  %3417 = vmatpush.bf16.msk.msra.mxu3 %vm4277_vm15, %v6712_v27  ;;  %vm4288_vm2 = vmpackc.low %vm1003_vm11, %vm999_vm10  ;;  %vm991_vm7 = vcmp.eq.s32.totalorder %v4252_v29, %v4212_v22  ;;  %vm995_vm8 = vcmp.eq.s32.totalorder %v4255_v30, %v4212_v22  ;;  %vm992_vm11 = vcmp.eq.s32.totalorder %v4252_v29, %v4214_v23  ;;  %v936_v20 = vld [vmem:[%s468_s21] sm:$0xff] }
  0x43   : > { %6947 = vst [vmem:[#allocation19_spill] sm:$0xff] %v6946_v33  ;;  %v6949_v34 = vsel %vm4288_vm2, 4294967295, %v6948_v34  ;;  %3371 = vmatpush.bf16.msk.msra.mxu0 %vm4288_vm2, %v6712_v27  ;;  %vm4301_vm6 = vmpackc.low %vm1004_vm14, %vm1000_vm13  ;;  %vm996_vm13 = vcmp.eq.s32.totalorder %v4255_v30, %v4214_v23  ;;  %1267 = vrot.lane.b32.xlu0 %v4327_v39, %s4046_s26  ;;  %v7013_v0 = vmov 0  ;;  %v7016_v1 = vmov 0  ;;  %v3739_v10 = vld [vmem:[%s6679_s5] sm:$0xff] }
  0x44   : > { %6950 = vst [vmem:[#allocation20_spill] sm:$0xff] %v6949_v34  ;;  %v6952_v35 = vsel %vm4301_vm6, 4294967295, %v6951_v35  ;;  %3387 = vmatpush.bf16.msk.msra.mxu1 %vm4301_vm6, %v6712_v27  ;;  %vm4318_vm10 = vmpackc.low %vm1005_vm1, %vm1001_vm0  ;;  %vm997_vm1 = vcmp.eq.s32.totalorder %v4255_v30, %v4216_v24  ;;  %vm998_vm0 = vcmp.eq.s32.totalorder %v4255_v30, %v4218_v25  ;;  %1237 = vrot.lane.b32.xlu2 %v4344_v41, %s4046_s26  ;;  %v4589_v2 = vadd.s32 8, %v4176_v8 }
  0x45   : > { %6953 = vst [vmem:[#allocation21_spill] sm:$0xff] %v6952_v35  ;;  %v6957_v38 = vsel %vm4318_vm10, 4294967295, %v6956_v38  ;;  %3403 = vmatpush.bf16.msk.msra.mxu2 %vm4318_vm10, %v6712_v27  ;;  %vm4335_vm14 = vmpackc.low %vm1006_vm5, %vm1002_vm3  ;;  %vm994_vm5 = vcmp.eq.s32.totalorder %v4252_v29, %v4218_v25  ;;  %v7020_v3 = vmov 0  ;;  %v7023_v7 = vmov 0 }
  0x46   : > { %6958 = vst [vmem:[#allocation24_spill] sm:$0xff] %v6957_v38  ;;  %v6960_v40 = vsel %vm4335_vm14, 4294967295, %v6959_v40  ;;  %3419 = vmatpush.bf16.msk.msra.mxu3 %vm4335_vm14, %v6712_v27  ;;  %vm4352_vm3 = vmpackc.low %vm995_vm8, %vm991_vm7  ;;  %vm984_vm8 = vcmp.eq.s32.totalorder %v4310_v36, %v4214_v23  ;;  %vm988_vm7 = vcmp.eq.s32.totalorder %v4313_v37, %v4214_v23  ;;  %vm990_vm14 = vcmp.eq.s32.totalorder %v4313_v37, %v4218_v25 }
  0x47   : > { %6961 = vst [vmem:[#allocation25_spill] sm:$0xff] %v6960_v40  ;;  %v6963_v42 = vsel %vm4352_vm3, 4294967295, %v6962_v42  ;;  %3373 = vmatpush.bf16.msk.msra.mxu0 %vm4352_vm3, %v6712_v27  ;;  %vm4363_vm10 = vmpackc.low %vm996_vm13, %vm992_vm11  ;;  %vm6970_vm11 = vcmp.eq.s32.totalorder %v4252_v29, %v4216_v24  ;;  %vm986_vm3 = vcmp.eq.s32.totalorder %v4310_v36, %v4218_v25  ;;  %v7026_v12 = vmov 0  ;;  %v4801_v29 = vld [vmem:[%s4199_s29 + $0xa0] sm:$0xff] }
  0x48   : > { %6964 = vst [vmem:[#allocation26_spill] sm:$0xff] %v6963_v42  ;;  %v6966_v43 = vsel %vm4363_vm10, 4294967295, %v6965_v43  ;;  %3389 = vmatpush.bf16.msk.msra.mxu1 %vm4363_vm10, %v6712_v27  ;;  %vm4385_vm13 = vmpackc.low %vm997_vm1, %vm6970_vm11  ;;  %vm985_vm11 = vcmp.eq.s32.totalorder %v4310_v36, %v4216_v24  ;;  %vm989_vm10 = vcmp.eq.s32.totalorder %v4313_v37, %v4216_v24  ;;  %v7029_v13 = vmov 0 }
  0x49   : > { %6967 = vst [vmem:[#allocation27_spill] sm:$0xff] %v6966_v43  ;;  %v6972_v46 = vsel %vm4385_vm13, 4294967295, %v6971_v46  ;;  %3405 = vmatpush.bf16.msk.msra.mxu2 %vm4385_vm13, %v6712_v27  ;;  %vm4407_vm1 = vmpackc.low %vm998_vm0, %vm994_vm5  ;;  %vm6977_vm13 = vcmp.eq.s32.totalorder %v4310_v36, %v4212_v22  ;;  %vm6978_vm0 = vcmp.eq.s32.totalorder %v4313_v37, %v4212_v22  ;;  %1263 = vrot.lane.b32.xlu1 %v4390_v47, %s4046_s26  ;;  %v7033_v16 = vmov 0  ;;  %v4788_v37 = vld [vmem:[%s4199_s29 + $0x10] sm:$0xff]  ;;  %v4798_v36 = vld [vmem:[%s4199_s29 + $0xa8] sm:$0xff] }
  0x4a   : > { %6973 = vst [vmem:[#allocation30_spill] sm:$0xff] %v6972_v46  ;;  %v6975_v48 = vsel %vm4407_vm1, 4294967295, %v6974_v48  ;;  %3421 = vmatpush.bf16.msk.msra.mxu3 %vm4407_vm1, %v6712_v27  ;;  %vm4424_vm5 = vmpackc.low %vm6978_vm0, %vm6977_vm13  ;;  %vm979_vm0 = vcmp.eq.s32.totalorder %v4375_v45, %v4212_v22  ;;  %vm980_vm13 = vcmp.eq.s32.totalorder %v4375_v45, %v4214_v23  ;;  %v7036_v18 = vmov 0 }
  0x4b   : > { %6976 = vst [vmem:[#allocation31_spill] sm:$0xff] %v6975_v48  ;;  %v6980_v49 = vsel %vm4424_vm5, 4294967295, %v6979_v49  ;;  %3375 = vmatpush.bf16.msk.msra.mxu0 %vm4424_vm5, %v6712_v27  ;;  %vm4437_vm1 = vmpackc.low %vm988_vm7, %vm984_vm8  ;;  %vm976_vm8 = vcmp.eq.s32.totalorder %v4372_v44, %v4214_v23  ;;  %1233 = vrot.lane.b32.xlu0 %v4463_v54, %s4046_s26  ;;  %vm974_vm5 = vcmp.eq.s32.totalorder %v4449_v52, %v4218_v25  ;;  %v7113_v42 = vmov 0 }
  0x4c   : > { %6981 = vst [vmem:[#allocation32_spill] sm:$0xff] %v6980_v49  ;;  %v6983_v50 = vsel %vm4437_vm1, 4294967295, %v6982_v50  ;;  %3391 = vmatpush.bf16.msk.msra.mxu1 %vm4437_vm1, %v6712_v27  ;;  %vm4454_vm7 = vmpackc.low %vm989_vm10, %vm985_vm11  ;;  %vm972_vm11 = vcmp.eq.s32.totalorder %v4449_v52, %v4214_v23  ;;  %1231 = vrot.lane.b32.xlu2 %v4480_v56, %s4046_s26  ;;  %v938_v11 = vpack.c.bf16 %v936_v20, %v936_v20  ;;  %v4842_v20 = vld [vmem:[%s4199_s29 + $0x8] sm:$0xff] }
  0x4d   : > { %6984 = vst [vmem:[#allocation33_spill] sm:$0xff] %v6983_v50  ;;  %v6988_v53 = vsel %vm4454_vm7, 4294967295, %v6987_v53  ;;  %3407 = vmatpush.bf16.msk.msra.mxu2 %vm4454_vm7, %v6712_v27  ;;  %vm4471_vm1 = vmpackc.low %vm990_vm14, %vm986_vm3  ;;  %vm6993_vm7 = vcmp.eq.s32.totalorder %v4372_v44, %v4212_v22  ;;  %vm978_vm3 = vcmp.eq.s32.totalorder %v4372_v44, %v4218_v25 }
  0x4e   : > { %6985 = vst [vmem:[#allocation34_spill] sm:$0xff] %v4446_v51  ;;  %v6991_v55 = vsel %vm4471_vm1, 4294967295, %v6990_v55  ;;  %3423 = vmatpush.bf16.msk.msra.mxu3 %vm4471_vm1, %v6712_v27  ;;  %vm4488_vm14 = vmpackc.low %vm979_vm0, %vm6993_vm7  ;;  %vm968_vm0 = vcmp.eq.s32.totalorder %v4446_v51, %v4214_v23  ;;  %vm970_vm1 = vcmp.eq.s32.totalorder %v4446_v51, %v4218_v25 }
  0x4f   : > { %6986 = vst [vmem:[#allocation35_spill] sm:$0xff] %v4449_v52  ;;  %v6995_v57 = vsel %vm4488_vm14, 4294967295, %v6994_v57  ;;  %3377 = vmatpush.bf16.msk.msra.mxu0 %vm4488_vm14, %v6712_v27  ;;  %vm4502_vm10 = vmpackc.low %vm980_vm13, %vm976_vm8  ;;  %vm7002_vm13 = vcmp.eq.s32.totalorder %v4372_v44, %v4216_v24  ;;  %vm7003_vm8 = vcmp.eq.s32.totalorder %v4375_v45, %v4216_v24  ;;  %vm973_vm14 = vcmp.eq.s32.totalorder %v4449_v52, %v4216_v24  ;;  %v4767_v44 = vld [vmem:[%s4199_s29 + $0x30] sm:$0xff] }
  0x50   : > { %6989 = vst [vmem:[#allocation36_spill] sm:$0xff] %v6988_v53  ;;  %v6998_v58 = vsel %vm4502_vm10, 4294967295, %v6997_v58  ;;  %3393 = vmatpush.bf16.msk.msra.mxu1 %vm4502_vm10, %v6712_v27  ;;  %vm4527_vm7 = vmpackc.low %vm7003_vm8, %vm7002_vm13  ;;  %vm7007_vm13 = vcmp.eq.s32.totalorder %v4375_v45, %v4218_v25  ;;  %vm969_vm10 = vcmp.eq.s32.totalorder %v4446_v51, %v4216_v24  ;;  %v6726_v45 = vmov 1  }
  0x51   : > { %6992 = vst [vmem:[#allocation37_spill] sm:$0xff] %v6991_v55  ;;  %v7005_v61 = vsel %vm4527_vm7, 4294967295, %v7004_v61  ;;  %3409 = vmatpush.bf16.msk.msra.mxu2 %vm4527_vm7, %v6712_v27  ;;  %vm4549_vm8 = vmpackc.low %vm7007_vm13, %vm978_vm3  ;;  %vm7011_vm7 = vcmp.eq.s32.totalorder %v4446_v51, %v4212_v22  ;;  %vm7012_vm3 = vcmp.eq.s32.totalorder %v4449_v52, %v4212_v22  ;;  %1229 = vrot.lane.b32.xlu1 %v4532_v62, %s4046_s26  ;;  %v4755_v52 = vld [vmem:[%s4199_s29 + $0xb0] sm:$0xff]  ;;  %v4762_v51 = vld [vmem:[%s4199_s29 + $0x38] sm:$0xff] }
  0x52   : > { %6996 = vst [vmem:[#allocation38_spill] sm:$0xff] %v6995_v57  ;;  %v7009_v63 = vsel %vm4549_vm8, 4294967295, %v7008_v63  ;;  %3425 = vmatpush.bf16.msk.msra.mxu3 %vm4549_vm8, %v6712_v27  ;;  %vm4567_vm13 = vmpackc.low %vm7012_vm3, %vm7011_vm7  ;;  %vm959_vm7 = vcmp.eq.s32.totalorder %v4511_v59, %v4212_v22  ;;  %vm963_vm3 = vcmp.eq.s32.totalorder %v4514_v60, %v4212_v22  ;;  %3807 = vset.pattern.permute.xlu1 %v6726_v45 }
  0x53   : > { %6999 = vst [vmem:[#allocation39_spill] sm:$0xff] %v6998_v58  ;;  %v7014_v0 = vsel %vm4567_vm13, 4294967295, %v7013_v0  ;;  %3379 = vmatpush.bf16.msk.msra.mxu0 %vm4567_vm13, %v6712_v27  ;;  %vm4580_vm8 = vmpackc.low %vm972_vm11, %vm968_vm0  ;;  %vm960_vm11 = vcmp.eq.s32.totalorder %v4511_v59, %v4214_v23  ;;  %vm964_vm0 = vcmp.eq.s32.totalorder %v4514_v60, %v4214_v23  ;;  %1227 = vrot.lane.b32.xlu0 %v4603_v4, %s4046_s26 }
  0x54   : > { %7000 = vst [vmem:[#allocation40_spill] sm:$0xff] %v4511_v59  ;;  %v7017_v1 = vsel %vm4580_vm8, 4294967295, %v7016_v1  ;;  %3395 = vmatpush.bf16.msk.msra.mxu1 %vm4580_vm8, %v6712_v27  ;;  %vm4594_vm6 = vmpackc.low %vm973_vm14, %vm969_vm10  ;;  %vm961_vm10 = vcmp.eq.s32.totalorder %v4511_v59, %v4216_v24  ;;  %1265 = vrot.lane.b32.xlu2 %v4617_v9, %s4046_s26 }
  0x55   : > { %7001 = vst [vmem:[#allocation41_spill] sm:$0xff] %v4514_v60  ;;  %v7021_v3 = vsel %vm4594_vm6, 4294967295, %v7020_v3  ;;  %3411 = vmatpush.bf16.msk.msra.mxu2 %vm4594_vm6, %v6712_v27  ;;  %vm4608_vm13 = vmpackc.low %vm974_vm5, %vm970_vm1  ;;  %vm962_vm1 = vcmp.eq.s32.totalorder %v4511_v59, %v4218_v25  ;;  %vm966_vm5 = vcmp.eq.s32.totalorder %v4514_v60, %v4218_v25  ;;  %v935_v59 = vld [vmem:[%s4641_s30 + $0x18] sm:$0xff]  ;;  %3808 = vset.pattern.permute.xlu2 %v6726_v45 }
  0x56   : > { %7006 = vst [vmem:[#allocation42_spill] sm:$0xff] %v7005_v61  ;;  %v7024_v7 = vsel %vm4608_vm13, 4294967295, %v7023_v7  ;;  %3427 = vmatpush.bf16.msk.msra.mxu3 %vm4608_vm13, %v6712_v27  ;;  %vm4622_vm8 = vmpackc.low %vm963_vm3, %vm959_vm7  ;;  %vm952_vm3 = vcmp.eq.s32.totalorder %v4176_v8, %v4214_v23  ;;  %vm956_vm7 = vcmp.eq.s32.totalorder %v4589_v2, %v4214_v23  ;;  %v7041_v23 = vmov 0  ;;  %v4782_v45 = vld [vmem:[%s4199_s29 + $0xb8] sm:$0xff] }
  0x57   : > { %7010 = vst [vmem:[#allocation43_spill] sm:$0xff] %v7009_v63  ;;  %v7027_v12 = vsel %vm4622_vm8, 4294967295, %v7026_v12  ;;  %3381 = vmatpush.bf16.msk.msra.mxu0 %vm4622_vm8, %v6712_v27  ;;  %vm4633_vm14 = vmpackc.low %vm964_vm0, %vm960_vm11  ;;  %vm7032_vm11 = vcmp.eq.s32.totalorder %v4514_v60, %v4216_v24  ;;  %vm954_vm8 = vcmp.eq.s32.totalorder %v4176_v8, %v4218_v25  ;;  %vm958_vm13 = vcmp.eq.s32.totalorder %v4589_v2, %v4218_v25  ;;  %v934_v60 = vld [vmem:[%s4641_s30 + $0x10] sm:$0xff] }
  0x58   : > { %7015 = vst [vmem:[#allocation44_spill] sm:$0xff] %v7014_v0  ;;  %v7030_v13 = vsel %vm4633_vm14, 4294967295, %v7029_v13  ;;  %3397 = vmatpush.bf16.msk.msra.mxu1 %vm4633_vm14, %v6712_v27  ;;  %vm4656_vm0 = vmpackc.low %vm7032_vm11, %vm961_vm10  ;;  %vm953_vm11 = vcmp.eq.s32.totalorder %v4176_v8, %v4216_v24  ;;  %vm957_vm14 = vcmp.eq.s32.totalorder %v4589_v2, %v4216_v24  ;;  %v1836_v24 = vpack.c.bf16 %v933_v15, %v932_v14  ;;  %v4720_v14 = vld [vmem:[%s4199_s29 + $0xd8] sm:$0xff] }
  0x59   : > { %7018 = vst [vmem:[#allocation45_spill] sm:$0xff] %v7017_v1  ;;  %v7034_v16 = vsel %vm4656_vm0, 4294967295, %v7033_v16  ;;  %3413 = vmatpush.bf16.msk.msra.mxu2 %vm4656_vm0, %v6712_v27  ;;  %vm4678_vm10 = vmpackc.low %vm966_vm5, %vm962_vm1  ;;  %vm7039_vm0 = vcmp.eq.s32.totalorder %v4176_v8, %v4212_v22  ;;  %vm7040_vm1 = vcmp.eq.s32.totalorder %v4589_v2, %v4212_v22  ;;  %1223 = vrot.lane.b32.xlu1 %v4661_v17, %s4046_s26  ;;  %v7044_v22 = vmov 0 }
  0x5a   : > { %7019 = vst [vmem:[#allocation46_spill] sm:$0xff] %v4589_v2  ;;  %v7037_v18 = vsel %vm4678_vm10, 4294967295, %v7036_v18  ;;  %3429 = vmatpush.bf16.msk.msra.mxu3 %vm4678_vm10, %v6712_v27  ;;  %vm4695_vm5 = vmpackc.low %vm7040_vm1, %vm7039_vm0  ;;  %v7047_v25 = vmov 0  ;;  %v7050_v15 = vmov 0  ;;  %v4745_v2 = vld [vmem:[%s4199_s29 + $0xc0] sm:$0xff] }
  0x5b   : > { %7022 = vst [vmem:[#allocation47_spill] sm:$0xff] %v7021_v3  ;;  %v7042_v23 = vsel %vm4695_vm5, 4294967295, %v7041_v23  ;;  %3383 = vmatpush.bf16.msk.msra.mxu0 %vm4695_vm5, %v6712_v27  ;;  %vm4708_vm10 = vmpackc.low %vm956_vm7, %vm952_vm3  ;;  %1261 = vrot.lane.b32.xlu0 %v4720_v14, %s4046_s26 }
  0x5c   : > { %7025 = vst [vmem:[#allocation48_spill] sm:$0xff] %v7024_v7  ;;  %v7045_v22 = vsel %vm4708_vm10, 4294967295, %v7044_v22  ;;  %3399 = vmatpush.bf16.msk.msra.mxu1 %vm4708_vm10, %v6712_v27  ;;  %vm4715_vm0 = vmpackc.low %vm957_vm14, %vm953_vm11  ;;  %1259 = vrot.lane.b32.xlu2 %v4730_v6, %s4046_s26  ;;  %vm6772_vm14 = vcmask 261120  }
  0x5d   : > { %7028 = vst [vmem:[#allocation49_spill] sm:$0xff] %v7027_v12  ;;  %v7048_v25 = vsel %vm4715_vm0, 4294967295, %v7047_v25  ;;  %3415 = vmatpush.bf16.msk.msra.mxu2 %vm4715_vm0, %v6712_v27  ;;  %vm4725_vm7 = vmpackc.low %vm958_vm13, %vm954_vm8  ;;  %vm1959_vm8 = vcmask 1043456   ;;  %vm6767_vm13 = vcmask 64512  }
  0x5e   : > { %7031 = vst [vmem:[#allocation50_spill] sm:$0xff] %v7030_v13  ;;  %v7051_v15 = vsel %vm4725_vm7, 4294967295, %v7050_v15  ;;  %3431 = vmatpush.bf16.msk.msra.mxu3 %vm4725_vm7, %v6712_v27  ;;  %1846 = vmatmul.bf16.vlgmr.msra.gmra.mxu0 %v1836_v24  ;;  %v4748_v27 = vld [vmem:[%s4199_s29 + $0x48] sm:$0xff] }
  0x5f   : > { %7035 = vst [vmem:[#allocation51_spill] sm:$0xff] %v7034_v16  ;;  %1865 = vmatmul.bf16.vlgmr.msra.gmra.mxu1 %v1836_v24 }
  0x60   : > { %7038 = vst [vmem:[#allocation52_spill] sm:$0xff] %v7037_v18  ;;  %1884 = vmatmul.bf16.vlgmr.msra.gmra.mxu2 %v1836_v24 }
  0x61   : > { %7043 = vst [vmem:[#allocation53_spill] sm:$0xff] %v7042_v23  ;;  %1903 = vmatmul.bf16.vlgmr.msra.gmra.mxu3 %v1836_v24  ;;  %1257 = vrot.lane.b32.xlu1 %v4738_v5, %s4046_s26  ;;  %v1837_v24 = vpack.c.bf16 %v935_v59, %v934_v60  ;;  %v4772_v59 = vld [vmem:[%s4199_s29 + $0x28] sm:$0xff]  ;;  %v4779_v60 = vld [vmem:[%s4199_s29 + $0x20] sm:$0xff]  ;;  %v7056_v23 = vmov 1  }
  0x62   : > { %7046 = vst [vmem:[#allocation54_spill] sm:$0xff] %v7045_v22 }
  0x63   : > { %7049 = vst [vmem:[#allocation55_spill] sm:$0xff] %v7048_v25  ;;  %1255 = vrot.lane.b32.xlu0 %v4745_v2, %s4046_s26  ;;  %v3740_v25 = vld [vmem:[%s6679_s5 + $0x8] sm:$0xff] }
  0x64   : > { %7052 = vst [vmem:[#allocation56_spill] sm:$0xff] %v7051_v15  ;;  %1225 = vrot.lane.b32.xlu2 %v4748_v27, %s4046_s26  ;;  %v4832_v15 = vld [vmem:[%s4199_s29 + $0x80] sm:$0xff] }
  0x69   : > { %1251 = vrot.lane.b32.xlu1 %v4755_v52, %s4046_s26 }
  0x6b   : > { %1221 = vrot.lane.b32.xlu0 %v4762_v51, %s4046_s26 }
  0x6c   : > { %1219 = vrot.lane.b32.xlu2 %v4767_v44, %s4046_s26 }
  0x6e   : > { %1851 = vmatmul.bf16.gmra.mxu0 %v1837_v24 }
  0x6f   : > { %1870 = vmatmul.bf16.gmra.mxu1 %v1837_v24 }
  0x70   : > { %1889 = vmatmul.bf16.gmra.mxu2 %v1837_v24 }
  0x71   : > { %1908 = vmatmul.bf16.gmra.mxu3 %v1837_v24  ;;  %1217 = vrot.lane.b32.xlu1 %v4772_v59, %s4046_s26  ;;  %v937_v24 = vld [vmem:[%s468_s21 + $0x8] sm:$0xff]  ;;  %s3751_s21 = sshll.u32 %s4129_s17, 4 }
  0x72   : > { %v939_v30 = vpack.c.bf16 %v937_v24, %v937_v24  ;;  %v4817_v24 = vld [vmem:[%s4199_s29 + $0x90] sm:$0xff]  ;;  %s3021_s28 = scalar_lea.hbm %s6683_s9, %s3751_s21 }
  0x73   : > { %1215 = vrot.lane.b32.xlu0 %v4779_v60, %s4046_s26  ;;  %s3024_s27 = sshll.u32 %s3021_s28, 4  ;;  %s3025_s27 = int_to_ptr.hbm [resolvable:$true] %s3024_s27 }
  0x74   : > { %1253 = vrot.lane.b32.xlu2 %v4782_v45, %s4046_s26  ;;  %v4804_v8 = vsel %vm1959_vm8, %v939_v30, 0  ;;  %v4820_v30 = vld [vmem:[%s4199_s29 + $0x18] sm:$0xff]  ;;  %s3963_s11 = sshra.s32 %s3025_s27, 4  ;;  %s3964_s11 = int_to_ptr.hbm [resolvable:$true] %s3963_s11 }
  0x75   : > { %7054 = vst [vmem:[#allocation57_spill] sm:$0xff] %v4804_v8  ;;  %1992 = vmatpush.bf16.msrb.mxu1 %v4804_v8  ;;  %v4828_v8 = vsel %vm1959_vm8, %v938_v11, 0  ;;  %v4845_v11 = vld [vmem:[%s4199_s29] sm:$0xff]  ;;  %s3965_s12 = scalar_lea.hbm %s3964_s11, 64  ;;  %p3970_p4 = scmp.lt.s32.totalorder %s3964_s11, %s6683_s9 }
  0x76   : > { %7055 = vst [vmem:[#allocation58_spill] sm:$0xff] %v4828_v8  ;;  %1973 = vmatpush.bf16.msrb.mxu0 %v4828_v8  ;;  %3752 = vmatpush.bf16.msrb.mxu3 %v4828_v8  ;;  %v4860_v8 = vld [vmem:[%s4199_s29 + $0x88] sm:$0xff]  ;;  %s3183_s29 = sshll.u32 %s4497_s0, 6  ;;  %p3966_p1 = scmp.ne.s32.totalorder %s3964_s11, %s3965_s12 }
  0x77   : > { %p3971_p5 = scmp.lt.s32.totalorder %s3969_s1, %s3965_s12 }
  0x78   : > { %p3967_p2 = pnand %p3966_p1, %p4147_p6 }
  0x79   : > { %1211 = vrot.lane.b32.xlu1 %v4788_v37, %s4046_s26  ;;  %p3972_p7 = por %p3971_p5, %p3970_p4 }
  0x7a   : > { %p3968_p3 = pneg %p3967_p2 }
  0x7b   : > { %1249 = vrot.lane.b32.xlu0 %v4798_v36, %s4046_s26 }
  0x7c   : > { %1247 = vrot.lane.b32.xlu2 %v4801_v29, %s4046_s26  ;;  %p3973_p10 = pnand %p3972_p7, %p3968_p3 }
  0x7e   : > { %3440 = vmatmul.msk.bf16.vlgmr.msrb.gmra.mxu0 %vm6767_vm13, %v3739_v10 }
  0x7f   : > { %3442 = vmatmul.msk.bf16.vlgmr.msrb.gmra.mxu1 %vm6767_vm13, %v3739_v10  ;;  %v2138_v10 = vld [vmem:[%s6682_s8 + $0x8] sm:$0xff] }
  0x81   : > { %1245 = vrot.lane.b32.xlu1 %v4810_v21, %s4046_s26  ;;  %3441 = vmatmul.msk.bf16.vlgmr.msrb.gmra.mxu3 %vm6767_vm13, %v3740_v25 }
  0x83   : > { %1243 = vrot.lane.b32.xlu0 %v4817_v24, %s4046_s26 }
  0x84   : > { %1213 = vrot.lane.b32.xlu2 %v4820_v30, %s4046_s26 }
  0x89   : > { %1239 = vrot.lane.b32.xlu1 %v4832_v15, %s4046_s26 }
  0x8b   : > { %1209 = vrot.lane.b32.xlu0 %v4842_v20, %s4046_s26 }
  0x8c   : > { %1207 = vrot.lane.b32.xlu2 %v4845_v11, %s4046_s26 }
  0x8f   : > { %3443 = vmatmul.msk.bf16.gmra.mxu1 %vm6767_vm13, %v3740_v25 }
  0x91   : > { %1317 = vperm.xlu1 %3807, %v4344_v41  }
  0x93   : > { %2148 = vperm.xlu0 %3805, %v2138_v10  }
  0x94   : > { %1241 = vrot.lane.b32.xlu2 %v4860_v8, %s4046_s26  ;;  %s6429_s26 = scalar_lea.vmem [#allocation3], %s3183_s29 }
  0x95   : > { %s3022_s18 = sshll.u32 %s6429_s26, 4  ;;  %s3023_s18 = int_to_ptr.vmem [resolvable:$true] %s3022_s18 }
  0x96   : > { %v1236_v22 = vpop.permute.xlu2 %1235 }
  0x99   : > { %1365 = vperm.xlu1 %3807, %v4265_v32  }
  0x9b   : > { %3810 = vset.pattern.permute.xlu0 %v7056_v23 }
  0x9c   : > { %1362 = vperm.xlu2 %3808, %v4327_v39   ;;  %1314 = vperm.xlu0 %3810, %v4202_v19  }
  0x9e   : > { %v1238_v41 = vpop.permute.xlu2 %1237 }
  0xa1   : > { %1356 = vperm.xlu1 %3807, %v4390_v47  }
  0xa3   : > { %v4870_v18 = vpop.permute.xlu1 %1924  ;;  %v4872_v10 = vpop.permute.xlu0 %1934 }
  0xa4   : > { %1308 = vperm.xlu2 %3808, %v4480_v56   ;;  %1311 = vperm.xlu0 %3810, %v4463_v54  }
  0xa6   : > { %v1232_v25 = vpop.permute.xlu2 %1231 }
  0xa9   : > { %1305 = vperm.xlu1 %3807, %v4532_v62  }
  0xab   : > { %v4877_v32 = vpop.permute.xlu1 %1929  ;;  %v4879_v16 = vpop.permute.xlu0 %1939 }
  0xac   : > { %1359 = vperm.xlu2 %3808, %v4617_v9   ;;  %1302 = vperm.xlu0 %3810, %v4603_v4  }
  0xae   : > { %v1266_v19 = vpop.permute.xlu2 %1265 }
  0xb1   : > { %1410 = vperm.xlu1 %3807, %v1236_v22  }
  0xb3   : > { %v1270_v39 = vpop.permute.xlu1 %1269 }
  0xb4   : > { %1350 = vperm.xlu2 %3808, %v4730_v6   ;;  %1353 = vperm.xlu0 %3810, %v4720_v14  }
  0xb5   : > { %v1268_v47 = vpop.permute.xlu0 %1267 }
  0xb6   : > { %v1260_v54 = vpop.permute.xlu2 %1259 }
  0xb9   : > { %1461 = vperm.xlu1 %3807, %v1270_v39  }
  0xbb   : > { %v1264_v56 = vpop.permute.xlu1 %1263 }
  0xbc   : > { %1413 = vperm.xlu2 %3808, %v1238_v41   ;;  %1458 = vperm.xlu0 %3810, %v1268_v47  }
  0xbd   : > { %v1234_v62 = vpop.permute.xlu0 %1233 }
  0xbe   : > { %v4885_v13 = vpop.permute.xlu2 %1225 }
  0xc1   : > { %1344 = vperm.xlu1 %3807, %v4745_v2  }
  0xc3   : > { %v1230_v9 = vpop.permute.xlu1 %1229 }
  0xc4   : > { %1296 = vperm.xlu2 %3808, %v4661_v17   ;;  %1299 = vperm.xlu0 %3810, %v4748_v27  }
  0xc5   : > { %v1228_v4 = vpop.permute.xlu0 %1227 }
  0xc6   : > { %v4890_v6 = vpop.permute.xlu2 %1219 }
  0xc9   : > { %1407 = vperm.xlu1 %3807, %v1234_v62  }
  0xcb   : > { %v4892_v22 = vpop.permute.xlu1 %1223 }
  0xcc   : > { %1347 = vperm.xlu2 %3808, %v4738_v5   ;;  %1404 = vperm.xlu0 %3810, %v1232_v25  }
  0xcd   : > { %v1262_v14 = vpop.permute.xlu0 %1261 }
  0xce   : > { %v4895_v41 = vpop.permute.xlu2 %1253 }
  0xd1   : > { %1290 = vperm.xlu1 %3807, %v4767_v44  }
  0xd3   : > { %v4898_v2 = vpop.permute.xlu1 %1257 }
  0xd4   : > { %1452 = vperm.xlu2 %3808, %v1264_v56   ;;  %1455 = vperm.xlu0 %3810, %v1266_v19  }
  0xd5   : > { %v4900_v17 = vpop.permute.xlu0 %1255 }
  0xd6   : > { %v4902_v27 = vpop.permute.xlu2 %1247 }
  0xd9   : > { %1341 = vperm.xlu1 %3807, %v4782_v45  }
  0xdb   : > { %v1847_v39 = vpop.f32.mrf.mxu0  ;;  %v4905_v62 = vpop.permute.xlu1 %1251 }
  0xdc   : > { %v1866_v47 = vpop.f32.mrf.mxu1  ;;  %1293 = vperm.xlu2 %3808, %v4762_v51   ;;  %1338 = vperm.xlu0 %3810, %v4755_v52  }
  0xdd   : > { %v4909_v5 = vpop.permute.xlu0 %1221 }
  0xde   : > { %v4911_v44 = vpop.permute.xlu2 %1213 }
  0xe1   : > { %1446 = vperm.xlu1 %3807, %v1260_v54  }
  0xe3   : > { %v1885_v25 = vpop.f32.mrf.mxu2  ;;  %v1849_v19 = vpop.f32.mrf.mxu0 }
  0xe4   : > { %v1904_v56 = vpop.f32.mrf.mxu3  ;;  %v1868_v12 = vpop.f32.mrf.mxu1  ;;  %1398 = vperm.xlu2 %3808, %v1228_v4   ;;  %1401 = vperm.xlu0 %3810, %v1230_v9   ;;  %v2008_v50 = vpack.c.bf16 %v1849_v19, %v1847_v39 }
  0xe5   : > { %v4913_v7 = vpop.permute.xlu1 %1217  ;;  %v4915_v45 = vpop.permute.xlu0 %1215 }
  0xe6   : > { %v4917_v3 = vpop.permute.xlu2 %1207 }
  0xe9   : > { %1275 = vperm.xlu1 %3807, %v4842_v20  }
  0xeb   : > { %v1887_v51 = vpop.f32.mrf.mxu2  ;;  %v1852_v52 = vpop.f32.mrf.mxu0 }
  0xec   : > { %v1906_v1 = vpop.f32.mrf.mxu3  ;;  %v1871_v0 = vpop.f32.mrf.mxu1  ;;  %1449 = vperm.xlu2 %3808, %v1262_v14   ;;  %1272 = vperm.xlu0 %3810, %v4845_v11   ;;  %v2009_v11 = vpack.c.bf16 %v1868_v12, %v1866_v47  ;;  %v3741_v14 = vld [vmem:[%s6678_s4] sm:$0xff]  ;;  %v2010_v12 = vpack.c.bf16 %v1887_v51, %v1885_v25 }
  0xed   : > { %v4920_v63 = vpop.permute.xlu1 %1211  ;;  %v4923_v54 = vpop.permute.xlu0 %1249 }
  0xee   : > { %v4925_v61 = vpop.permute.xlu2 %1241 }
  0xf1   : > { %1332 = vperm.xlu1 %3807, %v4801_v29  }
  0xf3   : > { %v1890_v9 = vpop.f32.mrf.mxu2  ;;  %v1854_v4 = vpop.f32.mrf.mxu0 }
  0xf4   : > { %v1909_v58 = vpop.f32.mrf.mxu3  ;;  %v1873_v57 = vpop.f32.mrf.mxu1  ;;  %v2012_v55 = vpack.c.bf16 %v1854_v4, %v1852_v52  ;;  %1284 = vperm.xlu2 %3808, %v4779_v60   ;;  %1287 = vperm.xlu0 %3810, %v4772_v59  }
  0xf5   : > { %v2013_v20 = vpack.c.bf16 %v1873_v57, %v1871_v0  ;;  %v4928_v53 = vpop.permute.xlu1 %1245  ;;  %v4935_v29 = vpop.permute.xlu0 %1243 }
  0xf6   : > { %2039 = vmatpush.bf16.msrb.mxu2 %v2012_v55  ;;  %v4937_v52 = vpop.permute.xlu2 %1362 }
  0xf7   : > { %2058 = vmatpush.bf16.msra.mxu3 %v2013_v20  ;;  %7057 = vst [vmem:[#allocation59_spill] sm:$0xff] %v4937_v52 }
  0xf9   : > { %1395 = vperm.xlu1 %3807, %v4885_v13  }
  0xfa   : > { %2040 = vmatpush.bf16.msrb.mxu2 %v2008_v50  ;;  %v2011_v50 = vpack.c.bf16 %v1906_v1, %v1904_v56 }
  0xfb   : > { %v1892_v57 = vpop.f32.mrf.mxu2  ;;  %2059 = vmatpush.bf16.msra.mxu3 %v2009_v11  ;;  %v1975_v35 = vpop.f32.mrf.mxu0 }
  0xfc   : > { %v2014_v55 = vpack.c.bf16 %v1892_v57, %v1890_v9  ;;  %v1911_v0 = vpop.f32.mrf.mxu3  ;;  %1335 = vperm.xlu2 %3808, %v4798_v36   ;;  %1392 = vperm.xlu0 %3810, %v4892_v22   ;;  %v3742_v36 = vld [vmem:[%s6678_s4 + $0x8] sm:$0xff]  ;;  %v7059_v22 = vlaneseq }
  0xfd   : > { %v2015_v60 = vpack.c.bf16 %v1911_v0, %v1909_v58  ;;  %v4940_v39 = vpop.permute.xlu1 %1239  ;;  %3452 = vmatmul.msk.bf16.vlgmr.msrb.gmra.mxu2 %vm6772_vm14, %v3741_v14  ;;  %v4946_v59 = vpop.permute.xlu0 %1209 }
  0xfe   : > { %2077 = vmatpush.bf16.msra.mxu0 %v2014_v55  ;;  %3454 = vmatmul.msk.bf16.vlgmr.msra.gmra.mxu3 %vm6772_vm14, %v3741_v14  ;;  %v4948_v13 = vpop.permute.xlu2 %1308  ;;  %v4963_v47 = vand.u32 127, %v7059_v22 }
  0xff   : > { %2096 = vmatpush.bf16.msra.mxu1 %v2015_v60 }
 0x100   : > { %7060 = vst [vmem:[#allocation61_spill] sm:$0xff] %v4963_v47  ;;  %vm6769_vm3 = vcmp.eq.s32.totalorder %v4963_v47, %v4937_v52 }
 0x101   : > { %1443 = vperm.xlu1 %3807, %v4898_v2  }
 0x102   : > { %2078 = vmatpush.bf16.msra.mxu0 %v2010_v12 }
 0x103   : > { %2097 = vmatpush.bf16.msra.mxu1 %v2011_v50 }
 0x104   : > { %1278 = vperm.xlu2 %3808, %v4788_v37   ;;  %1440 = vperm.xlu0 %3810, %v4900_v17   ;;  %v2137_v37 = vld [vmem:[%s6682_s8] sm:$0xff]  ;;  %v7064_v17 = vmov 0  }
 0x105   : > { %3456 = vmatmul.msk.bf16.vlgmr.msra.gmra.mxu0 %vm6772_vm14, %v3741_v14  ;;  %v4952_v58 = vpop.permute.xlu1 %1317  ;;  %v4960_v1 = vpop.permute.xlu0 %2148 }
 0x106   : > { %3458 = vmatmul.msk.bf16.vlgmr.msra.gmra.mxu1 %vm6772_vm14, %v3741_v14  ;;  %7058 = vst [vmem:[#allocation60_spill] sm:$0xff] %v4960_v1  ;;  %v4965_v2 = vpop.permute.xlu2 %1359  ;;  %vm6775_vm8 = vcmp.eq.s32.totalorder %v4963_v47, %v4952_v58  ;;  %v7077_v14 = vmov 0 }
 0x109   : > { %1281 = vperm.xlu1 %3807, %v4820_v30   ;;  %v3750_v30 = vld [vmem:[%s6681_s7 + $0x18] sm:$0xff] }
 0x10c   : > { %3809 = vset.pattern.permute.xlu2 %v7064_v17  ;;  %1389 = vperm.xlu0 %3810, %v4909_v5  }
 0x10d   : > { %v4970_v25 = vpop.permute.xlu1 %1365  ;;  %3453 = vmatmul.msk.bf16.gmra.mxu2 %vm6772_vm14, %v3742_v36  ;;  %2143 = vperm.xlu2 %3809, %v2137_v37  }
 0x10e   : > { %7061 = vst [vmem:[#allocation62_spill] sm:$0xff] %v4970_v25  ;;  %vm6768_vm11 = vcmp.eq.s32.totalorder %v4963_v47, %v4970_v25  ;;  %3455 = vmatmul.msk.bf16.gmra.mxu3 %vm6772_vm14, %v3742_v36  ;;  %v4993_v19 = vpop.permute.xlu0 %1314  ;;  %v4995_v56 = vpop.permute.xlu2 %1350 }
 0x10f   : > { %vm4985_vm1 = vmpackc.low %vm6768_vm11, %vm6769_vm3  ;;  %vm6776_vm13 = vcmp.eq.s32.totalorder %v4963_v47, %v4993_v19  ;;  %vm6773_vm11 = vcmp.eq.s32.totalorder %v4963_v47, %v4965_v2 }
 0x110   : > { %vm5008_vm3 = vmpackc.low %vm6775_vm8, %vm6776_vm13 }
 0x111   : > { %1329 = vperm.xlu1 %3807, %v4810_v21  }
 0x114   : > { %1380 = vperm.xlu0 %3810, %v4915_v45  }
 0x115   : > { %3457 = vmatmul.msk.bf16.gmra.mxu0 %vm6772_vm14, %v3742_v36  ;;  %v5013_v51 = vpop.permute.xlu1 %1356  ;;  %3811 = vset.pattern.permute.xlu2 %v7056_v23 }
 0x116   : > { %3459 = vmatmul.msk.bf16.gmra.mxu1 %vm6772_vm14, %v3742_v36  ;;  %vm6774_vm7 = vcmp.eq.s32.totalorder %v4963_v47, %v5013_v51  ;;  %1326 = vperm.xlu2 %3811, %v4817_v24   ;;  %v5031_v9 = vpop.permute.xlu0 %1311  ;;  %v5033_v4 = vpop.permute.xlu2 %1413  ;;  %vm6778_vm14 = vcmp.eq.s32.totalorder %v4963_v47, %v4948_v13 }
 0x117   : > { %vm5024_vm0 = vmpackc.low %vm6773_vm11, %vm6774_vm7  ;;  %7069 = vst [vmem:[#allocation63_spill] sm:$0xff] %v5033_v4  ;;  %vm6777_vm11 = vcmp.eq.s32.totalorder %v4963_v47, %v5031_v9 }
 0x118   : > { %vm5046_vm7 = vmpackc.low %vm6777_vm11, %vm6778_vm14  ;;  %vm6783_vm11 = vcmp.eq.s32.totalorder %v4963_v47, %v5033_v4  ;;  %v5270_v4 = vpop.f32.mrf.mxu1 }
 0x119   : > { %1434 = vperm.xlu1 %3807, %v4905_v62  }
 0x11c   : > { %1431 = vperm.xlu0 %3810, %v4923_v54  }
 0x11d   : > { %v5050_v24 = vpop.permute.xlu1 %1305 }
 0x11e   : > { %vm6781_vm8 = vcmp.eq.s32.totalorder %v4963_v47, %v5050_v24  ;;  %1386 = vperm.xlu2 %3811, %v4890_v6   ;;  %v5056_v62 = vpop.permute.xlu0 %1302  ;;  %v5058_v45 = vpop.permute.xlu2 %1296 }
 0x11f   : > { %vm6782_vm13 = vcmp.eq.s32.totalorder %v4963_v47, %v5056_v62 }
 0x120   : > { %vm5071_vm14 = vmpackc.low %vm6781_vm8, %vm6782_vm13  ;;  %vm6786_vm8 = vcmp.eq.s32.totalorder %v4963_v47, %v4995_v56 }
 0x121   : > { %1320 = vperm.xlu1 %3807, %v4832_v15   ;;  %v7075_v15 = vmov 0 }
 0x124   : > { %1422 = vperm.xlu0 %3810, %v4935_v29  }
 0x125   : > { %v5075_v54 = vpop.permute.xlu1 %1410 }
 0x126   : > { %7074 = vst [vmem:[#allocation64_spill] sm:$0xff] %v5075_v54  ;;  %vm6784_vm10 = vcmp.eq.s32.totalorder %v4963_v47, %v5075_v54  ;;  %1437 = vperm.xlu2 %3811, %v4895_v41   ;;  %v5093_v20 = vpop.permute.xlu0 %1353  ;;  %v5095_v11 = vpop.permute.xlu2 %1347 }
 0x127   : > { %vm5085_vm5 = vmpackc.low %vm6783_vm11, %vm6784_vm10  ;;  %vm6785_vm13 = vcmp.eq.s32.totalorder %v4963_v47, %v5093_v20 }
 0x128   : > { %v7076_v15 = vsel %vm5085_vm5, 4294967295, %v7075_v15  ;;  %vm5106_vm11 = vmpackc.low %vm6785_vm13, %vm6786_vm8  ;;  %vm6792_vm8 = vcmp.eq.s32.totalorder %v4963_v47, %v5095_v11 }
 0x129   : > { %1383 = vperm.xlu1 %3807, %v4913_v7   ;;  %v7078_v14 = vsel %vm5106_vm11, 4294967295, %v7077_v14 }
 0x12a   : > { %7079 = vst [vmem:[#allocation65_spill] sm:$0xff] %v7078_v14 }
 0x12c   : > { %1371 = vperm.xlu0 %3810, %v4946_v59  }
 0x12d   : > { %v5110_v41 = vpop.permute.xlu1 %1461 }
 0x12e   : > { %7080 = vst [vmem:[#allocation66_spill] sm:$0xff] %v5110_v41  ;;  %vm6790_vm10 = vcmp.eq.s32.totalorder %v4963_v47, %v5110_v41  ;;  %1323 = vperm.xlu2 %3811, %v4860_v8   ;;  %v5116_v7 = vpop.permute.xlu0 %1458  ;;  %v5118_v29 = vpop.permute.xlu2 %1452  ;;  %v7083_v8 = vmov 0  ;;  %v7103_v41 = vmov 0 }
 0x12f   : > { %7081 = vst [vmem:[#allocation67_spill] sm:$0xff] %v5116_v7  ;;  %vm6791_vm13 = vcmp.eq.s32.totalorder %v4963_v47, %v5116_v7  ;;  %v7107_v7 = vmov 0 }
 0x130   : > { %7082 = vst [vmem:[#allocation68_spill] sm:$0xff] %v5118_v29  ;;  %vm5131_vm6 = vmpackc.low %vm6790_vm10, %vm6791_vm13  ;;  %vm6796_vm10 = vcmp.eq.s32.totalorder %v4963_v47, %v5058_v45 }
 0x131   : > { %1374 = vperm.xlu1 %3807, %v4920_v63   ;;  %v7084_v8 = vsel %vm5131_vm6, 4294967295, %v7083_v8  ;;  %v7085_v63 = vmov 0 }
 0x134   : > { %3812 = vset.pattern.permute.xlu0 %v7064_v17 }
 0x135   : > { %v5135_v57 = vpop.permute.xlu1 %1344 }
 0x136   : > { %vm6793_vm2 = vcmp.eq.s32.totalorder %v4963_v47, %v5135_v57  ;;  %1428 = vperm.xlu2 %3811, %v4902_v27   ;;  %v5151_v55 = vpop.permute.xlu0 %1299  ;;  %v5153_v0 = vpop.permute.xlu2 %1293  ;;  %v7088_v27 = vmov 0 }
 0x137   : > { %vm5145_vm15 = vmpackc.low %vm6792_vm8, %vm6793_vm2  ;;  %vm6795_vm13 = vcmp.eq.s32.totalorder %v4963_v47, %v5151_v55  ;;  %vm6801_vm9 = vcmp.eq.s32.totalorder %v4963_v47, %v5153_v0 }
 0x138   : > { %v7086_v63 = vsel %vm5145_vm15, 4294967295, %v7085_v63  ;;  %vm5166_vm8 = vmpackc.low %vm6795_vm13, %vm6796_vm10 }
 0x139   : > { %7087 = vst [vmem:[#allocation69_spill] sm:$0xff] %v7086_v63  ;;  %1425 = vperm.xlu1 %3807, %v4928_v53   ;;  %v7089_v27 = vsel %vm5166_vm8, 4294967295, %v7088_v27 }
 0x13a   : > { %7090 = vst [vmem:[#allocation70_spill] sm:$0xff] %v7089_v27 }
 0x13d   : > { %v5170_v60 = vpop.permute.xlu1 %1407 }
 0x13e   : > { %7091 = vst [vmem:[#allocation71_spill] sm:$0xff] %v5170_v60  ;;  %vm6799_vm2 = vcmp.eq.s32.totalorder %v4963_v47, %v5170_v60  ;;  %1377 = vperm.xlu2 %3811, %v4911_v44   ;;  %v5175_v53 = vpop.permute.xlu0 %1404  ;;  %v5177_v12 = vpop.permute.xlu2 %1398 }
 0x13f   : > { %7092 = vst [vmem:[#allocation72_spill] sm:$0xff] %v5175_v53  ;;  %vm6800_vm12 = vcmp.eq.s32.totalorder %v4963_v47, %v5175_v53  ;;  %v1996_v53 = vpop.f32.mrf.mxu1 }
 0x140   : > { %vm5188_vm13 = vmpackc.low %vm6799_vm2, %vm6800_vm12  ;;  %vm6806_vm2 = vcmp.eq.s32.totalorder %v4963_v47, %v5118_v29 }
 0x141   : > { %1416 = vperm.xlu1 %3807, %v4940_v39   ;;  %v7095_v39 = vmov 0 }
 0x145   : > { %v5192_v44 = vpop.permute.xlu1 %1290 }
 0x146   : > { %vm6802_vm10 = vcmp.eq.s32.totalorder %v4963_v47, %v5192_v44  ;;  %1368 = vperm.xlu2 %3811, %v4917_v3   ;;  %v5211_v59 = vpop.permute.xlu0 %1455  ;;  %v5213_v36 = vpop.permute.xlu2 %1449 }
 0x147   : > { %vm5204_vm4 = vmpackc.low %vm6801_vm9, %vm6802_vm10  ;;  %7098 = vst [vmem:[#allocation74_spill] sm:$0xff] %v5211_v59  ;;  %vm6805_vm12 = vcmp.eq.s32.totalorder %v4963_v47, %v5211_v59  ;;  %v1999_v34 = vpop.f32.mrf.mxu1 }
 0x148   : > { %v7096_v39 = vsel %vm5204_vm4, 4294967295, %v7095_v39  ;;  %7099 = vst [vmem:[#allocation75_spill] sm:$0xff] %v5213_v36  ;;  %vm5224_vm9 = vmpackc.low %vm6805_vm12, %vm6806_vm2  ;;  %vm6820_vm12 = vcmp.eq.s32.totalorder %v4963_v47, %v5213_v36 }
 0x149   : > { %7097 = vst [vmem:[#allocation73_spill] sm:$0xff] %v7096_v39  ;;  %3813 = vset.pattern.permute.xlu1 %v7064_v17 }
 0x14d   : > { %v5228_v3 = vpop.permute.xlu1 %1341 }
 0x14e   : > { %vm6815_vm10 = vcmp.eq.s32.totalorder %v4963_v47, %v5228_v3  ;;  %1419 = vperm.xlu2 %3811, %v4925_v61   ;;  %v5233_v37 = vpop.permute.xlu0 %1338  ;;  %v5235_v1 = vpop.permute.xlu2 %1284 }
 0x14f   : > { %7102 = vst [vmem:[#allocation76_spill] sm:$0xff] %v5235_v1  ;;  %vm6822_vm4 = vcmp.eq.s32.totalorder %v4963_v47, %v5233_v37 }
 0x150   : > { %vm5247_vm2 = vmpackc.low %vm6815_vm10, %vm6822_vm4 }
 0x151   : > { %v7104_v41 = vsel %vm5247_vm2, 4294967295, %v7103_v41 }
 0x152   : > { %7105 = vst [vmem:[#allocation77_spill] sm:$0xff] %v7104_v41 }
 0x155   : > { %v5251_v61 = vpop.permute.xlu1 %1446 }
 0x156   : > { %7106 = vst [vmem:[#allocation78_spill] sm:$0xff] %v5251_v61  ;;  %vm6821_vm15 = vcmp.eq.s32.totalorder %v4963_v47, %v5251_v61  ;;  %v5265_v59 = vpop.permute.xlu0 %1401  ;;  %v5267_v29 = vpop.permute.xlu2 %1335  ;;  %3814 = vset.pattern.permute.xlu2 %v7064_v17  ;;  %v6832_v61 = vmov 0.0  }
 0x157   : > { %vm5261_vm8 = vmpackc.low %vm6820_vm12, %vm6821_vm15  ;;  %vm6844_vm4 = vcmp.eq.s32.totalorder %v4963_v47, %v5267_v29 }
 0x158   : > { %v7108_v7 = vsel %vm5261_vm8, 4294967295, %v7107_v7 }
 0x159   : > { %7109 = vst [vmem:[#allocation79_spill] sm:$0xff] %v7108_v7 }
 0x15d   : > { %v5272_v54 = vpop.permute.xlu1 %1275 }
 0x15e   : > { %7110 = vst [vmem:[#allocation80_spill] sm:$0xff] %v5272_v54  ;;  %vm6826_vm10 = vcmp.eq.s32.totalorder %v4963_v47, %v5272_v54  ;;  %v5280_v49 = vpop.permute.xlu0 %1272  ;;  %v5282_v60 = vpop.permute.xlu2 %1278 }
 0x15f   : > { %v3305_v36 = vsel %vm6826_vm10, 1.0, %v6832_v61  ;;  %7111 = vst [vmem:[#allocation81_spill] sm:$0xff] %v5280_v49  ;;  %vm6842_vm12 = vcmp.eq.s32.totalorder %v4963_v47, %v5280_v49  ;;  %vm6843_vm15 = vcmp.eq.s32.totalorder %v4963_v47, %v5282_v60  ;;  %v1977_v54 = vpop.f32.mrf.mxu0  ;;  %v5326_v49 = vpop.f32.mrf.mxu1 }
 0x160   : > { %7112 = vst [vmem:[#allocation82_spill] sm:$0xff] %v5282_v60  ;;  %v3304_v17 = vsel %vm6842_vm12, 1.0, %v6832_v61  ;;  %v3306_v48 = vsel %vm6843_vm15, 1.0, %v6832_v61  ;;  %vm6859_vm12 = vcmp.eq.s32.totalorder %v4963_v47, %v5235_v1 }
 0x161   : > { %v1751_v43 = vadd.f32 %v3305_v36, %v3304_v17  ;;  %v1980_v36 = vpop.f32.mrf.mxu3 }
 0x163   : > { %v1752_v40 = vadd.f32 %v3306_v48, %v1751_v43  ;;  %v7120_v48 = vmov 0.0  }
 0x165   : > { %v5298_v46 = vpop.permute.xlu1 %1332 }
 0x166   : > { %vm6875_vm10 = vcmp.eq.s32.totalorder %v4963_v47, %v5298_v46  ;;  %v5316_v17 = vpop.permute.xlu0 %1287 }
 0x167   : > { %vm5308_vm2 = vmpackc.low %vm6844_vm4, %vm6875_vm10  ;;  %v5314_v61 = vpop.permute.xlu2 %2143  ;;  %7117 = vst [vmem:[#allocation85_spill] sm:$0xff] %v5316_v17  ;;  %vm6866_vm15 = vcmp.eq.s32.totalorder %v4963_v47, %v5316_v17 }
 0x168   : > { %v7114_v42 = vsel %vm5308_vm2, 4294967295, %v7113_v42  ;;  %7116 = vst [vmem:[#allocation84_spill] sm:$0xff] %v5314_v61  ;;  %v3308_v61 = vsel %vm6859_vm12, 1.0, %v7120_v48  ;;  %v3309_v39 = vsel %vm6866_vm15, 1.0, %v7120_v48  ;;  %vm7122_vm12 = vcmp.eq.s32.totalorder %v4963_v47, %v5192_v44 }
 0x169   : > { %7115 = vst [vmem:[#allocation83_spill] sm:$0xff] %v7114_v42  ;;  %v5322_v28 = vpop.f32.mrf.mxu3  ;;  %v3310_v1 = vsel %vm7122_vm12, 1.0, %v7120_v48  ;;  %vm7125_vm15 = vcmp.eq.s32.totalorder %v4963_v47, %v5058_v45  ;;  %vm7126_vm12 = vcmp.eq.s32.totalorder %v4963_v47, %v5151_v55 }
 0x16d   : > { %v5312_v38 = vpop.permute.xlu1 %1395 }
 0x16e   : > { %v5324_v26 = vpop.permute.xlu0 %1392 }
 0x170   : > { %v5320_v31 = vpop.permute.xlu2 %1326 }
 0x175   : > { %v5318_v33 = vpop.permute.xlu1 %1443 }
 0x176   : > { %7118 = vst [vmem:[#allocation86_spill] sm:$0xff] %v5318_v33 }
 0x178   : > { %v5348_v27 = vpop.permute.xlu2 %1386 }
 0x179   : > { %7121 = vst [vmem:[#allocation88_spill] sm:$0xff] %v5348_v27 }
 0x17d   : > { %v5330_v43 = vpop.permute.xlu1 %1281 }
 0x17e   : > { %7119 = vst [vmem:[#allocation87_spill] sm:$0xff] %v5330_v43  ;;  %vm6862_vm4 = vcmp.eq.s32.totalorder %v4963_v47, %v5330_v43 }
 0x17f   : > { %v3307_v60 = vsel %vm6862_vm4, 1.0, %v7120_v48  ;;  %vm7124_vm4 = vcmp.eq.s32.totalorder %v4963_v47, %v5153_v0 }
 0x180   : > { %v1753_v42 = vadd.f32 %v3307_v60, %v1752_v40  ;;  %v2042_v41 = vpop.f32.mrf.mxu2  ;;  %v5358_v40 = vpop.permute.xlu0 %1440  ;;  %v3311_v17 = vsel %vm7124_vm4, 1.0, %v7120_v48  ;;  %vm7127_vm4 = vcmp.eq.s32.totalorder %v4963_v47, %v5056_v62  ;;  %v5397_v62 = vadd.f32 %v5270_v4, %v4870_v18 }
 0x181   : > { %v2061_v63 = vpop.f32.mrf.mxu3  ;;  %7123 = vst [vmem:[#allocation89_spill] sm:$0xff] %v5358_v40  ;;  %v5382_v45 = vpop.permute.xlu2 %1437  ;;  %v1981_v4 = vadd.f32 %v1980_v36, %v4872_v10 }
 0x182   : > { %v1754_v25 = vadd.f32 %v3308_v61, %v1753_v42  ;;  %v5350_v52 = vpop.f32.mrf.mxu0  ;;  %v3312_v61 = vsel %vm7125_vm15, 1.0, %v7120_v48  ;;  %7128 = vst [vmem:[#allocation90_spill] sm:$0xff] %v5382_v45  ;;  %vm7129_vm15 = vcmp.eq.s32.totalorder %v4963_v47, %v5050_v24  ;;  %v1978_v24 = vadd.f32 %v1977_v54, %v4877_v32 }
 0x183   : > { %v5356_v43 = vpop.f32.mrf.mxu1  ;;  %v3315_v55 = vsel %vm7129_vm15, 1.0, %v7120_v48  ;;  %vm7134_vm15 = vcmp.eq.s32.totalorder %v4963_v47, %v4993_v19 }
 0x184   : > { %v1755_v60 = vadd.f32 %v3309_v39, %v1754_v25  ;;  %v3313_v25 = vsel %vm7126_vm12, 1.0, %v7120_v48  ;;  %vm7132_vm12 = vcmp.eq.s32.totalorder %v4963_v47, %v4948_v13 }
 0x185   : > { %v5364_v7 = vpop.permute.xlu1 %1329 }
 0x186   : > { %v1756_v42 = vadd.f32 %v3310_v1, %v1755_v60  ;;  %v3314_v1 = vsel %vm7127_vm4, 1.0, %v7120_v48  ;;  %v5389_v60 = vadd.f32 %v1975_v35, %v4870_v18  ;;  %v1997_v35 = vadd.f32 %v1996_v53, %v4877_v32 }
 0x187   : > { %vm7133_vm4 = vcmp.eq.s32.totalorder %v4963_v47, %v5031_v9  ;;  %v3318_v32 = vsel %vm7134_vm15, 1.0, %v7120_v48  ;;  %vm6879_vm15 = vcmp.eq.s32.totalorder %v4963_v47, %v5320_v31 }
 0x188   : > { %v1757_v44 = vadd.f32 %v3311_v17, %v1756_v42  ;;  %v2044_v27 = vpop.f32.mrf.mxu2  ;;  %v3317_v18 = vsel %vm7133_vm4, 1.0, %v7120_v48  ;;  %vm7135_vm4 = vcmp.eq.s32.totalorder %v4963_v47, %v4952_v58 }
 0x189   : > { %v2063_v39 = vpop.f32.mrf.mxu3  ;;  %v3319_v19 = vsel %vm7135_vm4, 1.0, %v7120_v48  ;;  %vm6878_vm4 = vcmp.eq.s32.totalorder %v4963_v47, %v5364_v7 }
 0x18a   : > { %v1758_v40 = vadd.f32 %v3312_v61, %v1757_v44  ;;  %v5374_v33 = vpop.f32.mrf.mxu0  ;;  %v5393_v61 = vpop.permute.xlu0 %1389  ;;  %v2064_v54 = vadd.f32 %v2063_v39, %v1997_v35  ;;  %v1983_v39 = vadd.f32 %v5322_v28, %v4879_v16 }
 0x18b   : > { %v5380_v0 = vpop.f32.mrf.mxu1  ;;  %7131 = vst [vmem:[#allocation92_spill] sm:$0xff] %v5393_v61 }
 0x18c   : > { %v1759_v17 = vadd.f32 %v3313_v25, %v1758_v40  ;;  %v3316_v40 = vsel %vm7132_vm12, 1.0, %v7120_v48  ;;  %v2043_v25 = vadd.f32 %v2042_v41, %v5389_v60 }
 0x18d   : > { %v5391_v42 = vpop.permute.xlu1 %1434 }
 0x18e   : > { %7130 = vst [vmem:[#allocation91_spill] sm:$0xff] %v5391_v42  ;;  %v1760_v44 = vadd.f32 %v3314_v1, %v1759_v17  ;;  %v2062_v42 = vadd.f32 %v2061_v63, %v5397_v62  ;;  %v2045_v1 = vadd.f32 %v2044_v27, %v1978_v24  ;;  %v2000_v17 = vadd.f32 %v1999_v34, %v4872_v10 }
 0x18f   : > { %3815 = vtanh.f32 %v2043_v25 }
 0x190   : > { %v2047_v45 = vpop.f32.mrf.mxu2  ;;  %v1761_v61 = vadd.f32 %v3315_v55, %v1760_v44  ;;  %3817 = vtanh.f32 %v2062_v42  ;;  %v5419_v44 = vpop.permute.xlu2 %1323 }
 0x191   : > { %v2066_v13 = vpop.f32.mrf.mxu3  ;;  %v2048_v63 = vadd.f32 %v2047_v45, %v1981_v4  ;;  %3819 = vtanh.f32 %v2045_v1  ;;  %vm6876_vm10 = vcmp.eq.s32.totalorder %v4963_v47, %v5419_v44 }
 0x192   : > { %v2085_v14 = vpop.f32.mrf.mxu0  ;;  %v1762_v41 = vadd.f32 %v3316_v40, %v1761_v61  ;;  %v2067_v9 = vadd.f32 %v2066_v13, %v2000_v17  ;;  %3821 = vtanh.f32 %v2064_v54  ;;  %v5431_v45 = vpop.permute.xlu0 %1380  ;;  %v2083_v54 = vadd.f32 %v5374_v33, %v1978_v24  ;;  %v2140_v33 = vld [vmem:[%s6682_s8 + $0x18] sm:$0xff] }
 0x193   : > { %v2104_v53 = vpop.f32.mrf.mxu1  ;;  %v2086_v36 = vadd.f32 %v2085_v14, %v1981_v4  ;;  %v2002_v14 = vadd.f32 %v5326_v49, %v4879_v16  ;;  %3823 = vtanh.f32 %v2048_v63  ;;  %v3321_v49 = vsel %vm6876_vm10, 1.0, %v7120_v48  ;;  %2158 = vperm.xlu1 %3813, %v2140_v33  }
 0x194   : > { %v1763_v55 = vadd.f32 %v3317_v18, %v1762_v41  ;;  %v2105_v34 = vadd.f32 %v2104_v53, %v2000_v17  ;;  %3825 = vtanh.f32 %v2067_v9  ;;  %v3322_v18 = vsel %vm6879_vm15, 1.0, %v7120_v48 }
 0x195   : > { %v5417_v27 = vpop.permute.xlu1 %1320  ;;  %v5437_v58 = vpop.eup %3815  ;;  %3827 = vtanh.f32 %v2086_v36  ;;  %v2102_v53 = vadd.f32 %v5380_v0, %v1997_v35  ;;  %v3323_v0 = vsel %vm6878_vm4, 1.0, %v7120_v48  ;;  %vm7136_vm10 = vcmp.eq.s32.totalorder %v4963_v47, %v5298_v46 }
 0x196   : > { %vm6877_vm12 = vcmp.eq.s32.totalorder %v4963_v47, %v5417_v27  ;;  %v1764_v10 = vadd.f32 %v3318_v32, %v1763_v55  ;;  %v5447_v25 = vpop.eup %3817  ;;  %3829 = vtanh.f32 %v2105_v34  ;;  %v2081_v34 = vadd.f32 %v5350_v52, %v5389_v60 }
 0x197   : > { %v3320_v28 = vsel %vm6877_vm12, 1.0, %v7120_v48  ;;  %v3820_v17 = vpop.eup %3819  ;;  %vm7137_vm12 = vcmp.eq.s32.totalorder %v4963_v47, %v5233_v37  ;;  %vm7138_vm4 = vcmp.eq.s32.totalorder %v4963_v47, %v5267_v29  ;;  %v3611_v29 = vld [vmem:[%s6680_s6 + $0x38] sm:$0xff] }
 0x198   : > { %v1765_v42 = vadd.f32 %v3319_v19, %v1764_v10  ;;  %v2049_v61 = vpop.f32.mrf.mxu2  ;;  %v3822_v63 = vpop.eup %3821  ;;  %v2100_v19 = vadd.f32 %v5356_v43, %v5397_v62  ;;  %v3324_v62 = vsel %vm7136_vm10, 1.0, %v7120_v48  ;;  %v2129_v37 = vpack.c.bf16 %v3820_v17, %v5437_v58 }
 0x199   : > { %v2050_v16 = vadd.f32 %v2049_v61, %v1983_v39  ;;  %v2068_v40 = vpop.f32.mrf.mxu3  ;;  %v3824_v36 = vpop.eup %3823  ;;  %vm7139_vm10 = vcmp.eq.s32.totalorder %v4963_v47, %v5228_v3 }
 0x19a   : > { %v1766_v4 = vadd.f32 %v3320_v28, %v1765_v42  ;;  %v2069_v1 = vadd.f32 %v2068_v40, %v2002_v14  ;;  %v2087_v13 = vpop.f32.mrf.mxu0  ;;  %v3826_v10 = vpop.eup %3825  ;;  %v3325_v40 = vsel %vm7138_vm4, 1.0, %v7120_v48  ;;  %vm7142_vm4 = vcmp.eq.s32.totalorder %v4963_v47, %v5095_v11 }
 0x19b   : > { %3831 = vtanh.f32 %v2050_v16  ;;  %v2088_v41 = vadd.f32 %v2087_v13, %v1983_v39  ;;  %v2106_v32 = vpop.f32.mrf.mxu1  ;;  %v3828_v24 = vpop.eup %3827  ;;  %v3326_v16 = vsel %vm7137_vm12, 1.0, %v7120_v48  ;;  %2466 = vperm.xlu1 %3813, %v3611_v29   ;;  %vm7140_vm12 = vcmp.eq.s32.totalorder %v4963_v47, %v5135_v57  ;;  %v7164_v29 = vld [vmem:[#allocation70_spill] sm:$0xff] }
 0x19c   : > { %v1767_v9 = vadd.f32 %v3321_v49, %v1766_v4  ;;  %3833 = vtanh.f32 %v2069_v1  ;;  %v2107_v55 = vadd.f32 %v2106_v32, %v2002_v14  ;;  %v5468_v35 = vpop.permute.xlu2 %1428  ;;  %v3830_v52 = vpop.eup %3829  ;;  %v3329_v57 = vsel %vm7142_vm4, 1.0, %v7120_v48 }
 0x19d   : > { %3835 = vtanh.f32 %v2088_v41  ;;  %v5474_v39 = vpop.permute.xlu0 %1431  ;;  %v5484_v46 = vpop.permute.xlu1 %1383  ;;  %vm7145_vm4 = vcmp.eq.s32.totalorder %v4963_v47, %v5093_v20  ;;  %v3609_v20 = vld [vmem:[%s6680_s6 + $0x28] sm:$0xff] }
 0x19e   : > { %v1768_v42 = vadd.f32 %v3322_v18, %v1767_v9  ;;  %3837 = vtanh.f32 %v2107_v55  ;;  %v2139_v9 = vld [vmem:[%s6682_s8 + $0x10] sm:$0xff] }
 0x19f   : > { %3839 = vtanh.f32 %v2083_v54  ;;  %2153 = vperm.xlu0 %3812, %v2139_v9   ;;  %v3651_v9 = vld [vmem:[%s6682_s8 + $0x38] sm:$0xff] }
 0x1a0   : > { %3841 = vtanh.f32 %v2102_v53  ;;  %v1769_v60 = vadd.f32 %v3323_v0, %v1768_v42  ;;  %v3328_v42 = vsel %vm7140_vm12, 1.0, %v7120_v48  ;;  %vm7144_vm12 = vcmp.eq.s32.totalorder %v4963_v47, %v4995_v56  ;;  %v3648_v56 = vld [vmem:[%s6682_s8 + $0x20] sm:$0xff] }
 0x1a1   : > { %v3832_v43 = vpop.eup %3831  ;;  %3843 = vtanh.f32 %v2081_v34  ;;  %v2130_v34 = vpack.c.bf16 %v3822_v63, %v5447_v25  ;;  %v7141_v25 = vmov 1.0|1.0   ;;  %v3330_v11 = vsel %vm7144_vm12, 1.0, %v7120_v48 }
 0x1a2   : > { %v3834_v14 = vpop.eup %3833  ;;  %3845 = vtanh.f32 %v2100_v19  ;;  %v1770_v61 = vadd.f32 %v3324_v62, %v1769_v60  ;;  %v2133_v28 = vpack.c.bf16 %v3832_v43, %v3824_v36  ;;  %v3327_v36 = vsel %vm7139_vm10, 1.0, %v7120_v48  ;;  %v3743_v19 = vld [vmem:[%s6681_s7] sm:$0xff] }
 0x1a3   : > { %v3836_v49 = vpop.eup %3835  ;;  %v2134_v18 = vpack.c.bf16 %v3834_v14, %v3826_v10  ;;  %vm7143_vm10 = vcmask 261120   ;;  %2664 = vperm.xlu1 %3813, %v3648_v56   ;;  %vm7152_vm12 = vcmp.eq.s32.totalorder %v4963_v47, %v4965_v2  ;;  %v7155_v2 = vld [vmem:[#allocation89_spill] sm:$0xff] }
 0x1a4   : > { %v3838_v4 = vpop.eup %3837  ;;  %v1771_v1 = vadd.f32 %v3325_v40, %v1770_v61  ;;  %2183 = vmatpush.bf16.msra.mxu2 %v2133_v28  ;;  %v2135_v13 = vpack.c.bf16 %v3836_v49, %v3828_v24  ;;  %v5505_v3 = vpop.permute.xlu2 %1377  ;;  %vm7146_vm15 = vmmov %vm7143_vm10  ;;  %v7150_v61 = vmov 0  ;;  %v7154_v40 = vld [vmem:[#allocation86_spill] sm:$0xff] }
 0x1a5   : > { %v3840_v54 = vpop.eup %3839  ;;  %2202 = vmatpush.bf16.msrb.mxu3 %v2134_v18  ;;  %v2136_v41 = vpack.c.bf16 %v3838_v4, %v3830_v52  ;;  %v5517_v24 = vpop.permute.xlu0 %1422  ;;  %v3331_v52 = vsel %vm7145_vm4, 1.0, %v7120_v48  ;;  %v7156_v4 = vld [vmem:[#allocation79_spill] sm:$0xff] }
 0x1a6   : > { %v3842_v32 = vpop.eup %3841  ;;  %v1772_v53 = vadd.f32 %v3326_v16, %v1771_v1  ;;  %2221 = vmatpush.bf16.msrb.mxu0 %v2135_v13  ;;  %v5534_v60 = vpop.permute.xlu1 %1374  ;;  %v7153_v16 = vld [vmem:[#allocation65_spill] sm:$0xff]  ;;  %v7157_v1 = vld [vmem:[#allocation59_spill] sm:$0xff] }
 0x1a7   : > { %v3844_v55 = vpop.eup %3843  ;;  %2240 = vmatpush.bf16.msrb.mxu1 %v2136_v41  ;;  %2456 = vperm.xlu0 %3812, %v3609_v20   ;;  %v7159_v41 = vld [vmem:[#allocation62_spill] sm:$0xff]  ;;  %v7186_v20 = vld [vmem:[#allocation77_spill] sm:$0xff] }
 0x1a8   : > { %v3846_v10 = vpop.eup %3845  ;;  %v1773_v58 = vadd.f32 %v3327_v36, %v1772_v53  ;;  %2184 = vmatpush.bf16.msra.mxu2 %v2129_v37  ;;  %v2131_v17 = vpack.c.bf16 %v3840_v54, %v3844_v55  ;;  %vm7160_vm4 = vcmp.eq.s32.totalorder %v4963_v47, %v7159_v41  ;;  %v7162_v53 = vmov 0  ;;  %v3650_v55 = vld [vmem:[%s6682_s8 + $0x30] sm:$0xff] }
 0x1a9   : > { %2203 = vmatpush.bf16.msrb.mxu3 %v2130_v34  ;;  %v2132_v33 = vpack.c.bf16 %v3842_v32, %v3846_v10  ;;  %v3335_v32 = vsel %vm7160_vm4, 1.0, %v7120_v48  ;;  %vm7167_vm4 = vcmp.eq.s32.totalorder %v4963_v47, %v7154_v40  ;;  %v7168_v36 = vmov 0  ;;  %v7170_v34 = vld [vmem:[#allocation88_spill] sm:$0xff] }
 0x1aa   : > { %v1774_v63 = vadd.f32 %v3328_v42, %v1773_v58  ;;  %2222 = vmatpush.bf16.msrb.mxu0 %v2131_v17  ;;  %v7171_v10 = vld [vmem:[#allocation92_spill] sm:$0xff]  ;;  %v7172_v58 = vld [vmem:[#allocation90_spill] sm:$0xff]  ;;  %v7174_v42 = vld [vmem:[#allocation69_spill] sm:$0xff] }
 0x1ab   : > { %2241 = vmatpush.bf16.msrb.mxu1 %v2132_v33  ;;  %3468 = vmatmul.msk.bf16.vlgmr.msra.gmra.mxu2 %vm7143_vm10, %v3743_v19  ;;  %v7176_v33 = vld [vmem:[#allocation91_spill] sm:$0xff] }
 0x1ac   : > { %3477 = vmatpush.bf16.msk.msrb.mxu2 %vm5008_vm3, %v7141_v25  ;;  %v1775_v0 = vadd.f32 %v3329_v57, %v1774_v63  ;;  %3470 = vmatmul.msk.bf16.vlgmr.msrb.gmra.mxu3 %vm7146_vm15, %v3743_v19  ;;  %vm6883_vm15 = vcmp.eq.s32.totalorder %v4963_v47, %v5177_v12  ;;  %v5586_v49 = vpop.permute.xlu2 %1368  ;;  %v3744_v57 = vld [vmem:[%s6681_s7 + $0x8] sm:$0xff] }
 0x1ad   : > { %3493 = vmatpush.bf16.msk.msra.mxu3 %vm4985_vm1, %v7141_v25  ;;  %v5605_v54 = vpop.permute.xlu0 %1371  ;;  %2679 = vperm.xlu1 %3813, %v3651_v9   ;;  %v7207_v9 = vld [vmem:[#allocation82_spill] sm:$0xff] }
 0x1ae   : > { %3509 = vmatpush.bf16.msk.msra.mxu0 %vm5085_vm5, %v7141_v25  ;;  %vm7147_vm5 = vmmov %vm7143_vm10  ;;  %v1776_v43 = vadd.f32 %v3330_v11, %v1775_v0  ;;  %v5648_v17 = vpop.permute.xlu1 %1425  ;;  %v7177_v0 = vmov 0 }
 0x1af   : > { %3525 = vmatpush.bf16.msk.msra.mxu1 %vm5131_vm6, %v7141_v25  ;;  %3472 = vmatmul.msk.bf16.vlgmr.msrb.gmra.mxu0 %vm7147_vm5, %v3743_v19  ;;  %vm7148_vm6 = vmmov %vm7147_vm5  ;;  %vm6882_vm5 = vcmp.eq.s32.totalorder %v4963_v47, %v5265_v59 }
 0x1b0   : > { %3474 = vmatmul.msk.bf16.vlgmr.msrb.gmra.mxu1 %vm7148_vm6, %v3743_v19  ;;  %3479 = vmatpush.bf16.msk.msrb.mxu2 %vm5046_vm7, %v7141_v25  ;;  %v1777_v62 = vadd.f32 %v3331_v52, %v1776_v43  ;;  %vm7149_vm6 = vcmp.eq.s32.totalorder %v4963_v47, %v5013_v51  ;;  %vm5571_vm10 = vmpackc.low %vm6882_vm5, %vm6883_vm15  ;;  %v3333_v51 = vsel %vm7152_vm12, 1.0, %v7120_v48  ;;  %vm7158_vm15 = vcmp.eq.s32.totalorder %v4963_v47, %v7157_v1  ;;  %v7179_v52 = vld [vmem:[#allocation73_spill] sm:$0xff] }
 0x1b1   : > { %3495 = vmatpush.bf16.msk.msra.mxu3 %vm5024_vm0, %v7141_v25  ;;  %v3332_v14 = vsel %vm7149_vm6, 1.0, %v7120_v48  ;;  %v7151_v61 = vsel %vm5571_vm10, 4294967295, %v7150_v61  ;;  %vm6885_vm6 = vcmp.eq.s32.totalorder %v4963_v47, %v5324_v26  ;;  %v3334_v13 = vsel %vm7158_vm15, 1.0, %v7120_v48  ;;  %2674 = vperm.xlu0 %3812, %v3650_v55   ;;  %v7209_v55 = vld [vmem:[#allocation87_spill] sm:$0xff] }
 0x1b2   : > { %3511 = vmatpush.bf16.msk.msra.mxu0 %vm5188_vm13, %v7141_v25  ;;  %v1778_v28 = vadd.f32 %v3332_v14, %v1777_v62  ;;  %vm7161_vm5 = vcmp.eq.s32.totalorder %v4963_v47, %v5312_v38  ;;  %vm6891_vm15 = vcmp.eq.s32.totalorder %v4963_v47, %v7170_v34  ;;  %v7183_v43 = vmov 0  ;;  %v7189_v14 = vld [vmem:[#allocation76_spill] sm:$0xff] }
 0x1b3   : > { %3527 = vmatpush.bf16.msk.msra.mxu1 %vm5224_vm9, %v7141_v25  ;;  %vm5617_vm12 = vmpackc.low %vm7161_vm5, %vm6885_vm6  ;;  %vm7166_vm5 = vcmp.eq.s32.totalorder %v4963_v47, %v7155_v2 }
 0x1b4   : > { %3481 = vmatpush.bf16.msk.msrb.mxu2 %vm5071_vm14, %v7141_v25  ;;  %v1779_v18 = vadd.f32 %v3333_v51, %v1778_v28  ;;  %v7163_v53 = vsel %vm5617_vm12, 4294967295, %v7162_v53  ;;  %vm5638_vm6 = vmpackc.low %vm7167_vm4, %vm7166_vm5  ;;  %vm7175_vm5 = vnez %v7174_v42  ;;  %vm7180_vm4 = vnez %v7179_v52  ;;  %v7191_v28 = vld [vmem:[#allocation85_spill] sm:$0xff] }
 0x1b5   : > { %3497 = vmatpush.bf16.msk.msra.mxu3 %vm5106_vm11, %v7141_v25  ;;  %v7169_v36 = vsel %vm5638_vm6, 4294967295, %v7168_v36  ;;  %vm7173_vm11 = vcmp.eq.s32.totalorder %v4963_v47, %v5586_v49  ;;  %v7193_v51 = vmov 0 }
 0x1b6   : > { %3513 = vmatpush.bf16.msk.msra.mxu0 %vm5571_vm10, %v7141_v25  ;;  %v1780_v37 = vadd.f32 %v3334_v13, %v1779_v18  ;;  %v3336_v19 = vsel %vm7173_vm11, 1.0, %v7120_v48  ;;  %vm7190_vm10 = vcmp.eq.s32.totalorder %v4963_v47, %v7189_v14  ;;  %v7199_v13 = vmov 0 }
 0x1b7   : > { %3529 = vmatpush.bf16.msk.msra.mxu1 %vm5261_vm8, %v7141_v25  ;;  %vm7165_vm8 = vnez %v7164_v29  ;;  %v7232_v14 = vmov 0 }
 0x1b8   : > { %3483 = vmatpush.bf16.msk.msrb.mxu2 %vm7165_vm8, %v7141_v25  ;;  %vm6890_vm8 = vcmp.eq.s32.totalorder %v4963_v47, %v7171_v10  ;;  %v1781_v63 = vadd.f32 %v3335_v32, %v1780_v37  ;;  %v7204_v32 = vmov 0  ;;  %v7206_v37 = vld [vmem:[#allocation83_spill] sm:$0xff] }
 0x1b9   : > { %3499 = vmatpush.bf16.msk.msra.mxu3 %vm7175_vm5, %v7141_v25  ;;  %vm5676_vm11 = vmpackc.low %vm6890_vm8, %vm6891_vm15  ;;  %vm6894_vm15 = vcmp.eq.s32.totalorder %v4963_v47, %v5505_v3  ;;  %vm7192_vm8 = vcmp.eq.s32.totalorder %v4963_v47, %v7191_v28 }
 0x1ba   : > { %3515 = vmatpush.bf16.msk.msra.mxu0 %vm5617_vm12, %v7141_v25  ;;  %v7178_v0 = vsel %vm5676_vm11, 4294967295, %v7177_v0  ;;  %v1782_v11 = vadd.f32 %v3336_v19, %v1781_v63  ;;  %vm7182_vm12 = vcmp.eq.s32.totalorder %v4963_v47, %v7172_v58  ;;  %v3339_v1 = vsel %vm6894_vm15, 1.0, %v7120_v48 }
 0x1bb   : > { %3531 = vmatpush.bf16.msk.msra.mxu1 %vm5638_vm6, %v7141_v25  ;;  %vm7181_vm6 = vcmp.eq.s32.totalorder %v4963_v47, %v7176_v33  ;;  %v7211_v19 = vmov 0 }
 0x1bc   : > { %3485 = vmatpush.bf16.msk.msrb.mxu2 %vm7180_vm4, %v7141_v25  ;;  %vm5691_vm5 = vmpackc.low %vm7182_vm12, %vm7181_vm6  ;;  %vm7185_vm4 = vcmp.eq.s32.totalorder %v4963_v47, %v5605_v54  ;;  %vm7187_vm6 = vnez %v7186_v20  ;;  %vm7195_vm12 = vcmp.eq.s32.totalorder %v4963_v47, %v5534_v60 }
 0x1bd   : > { %v7184_v43 = vsel %vm5691_vm5, 4294967295, %v7183_v43  ;;  %v3337_v56 = vsel %vm7185_vm4, 1.0, %v7120_v48  ;;  %3501 = vmatpush.bf16.msk.msra.mxu3 %vm7187_vm6, %v7141_v25  ;;  %vm7188_vm4 = vcmask 261120   ;;  %v3338_v18 = vsel %vm7195_vm12, 1.0, %v7120_v48 }
 0x1be   : > { %3517 = vmatpush.bf16.msk.msra.mxu0 %vm5676_vm11, %v7141_v25  ;;  %v1783_v62 = vadd.f32 %v3337_v56, %v1782_v11  ;;  %3469 = vmatmul.msk.bf16.gmra.mxu2 %vm7188_vm4, %v3744_v57  ;;  %vm5725_vm11 = vmpackc.low %vm7192_vm8, %vm7190_vm10  ;;  %vm7197_vm8 = vcmp.eq.s32.totalorder %v4963_v47, %v5431_v45  ;;  %vm7198_vm10 = vcmp.eq.s32.totalorder %v4963_v47, %v5484_v46  ;;  %v1417_v56 = vpop.permute.xlu1 %1416 }
 0x1bf   : > { %3533 = vmatpush.bf16.msk.msra.mxu1 %vm5691_vm5, %v7141_v25  ;;  %v7194_v51 = vsel %vm5725_vm11, 4294967295, %v7193_v51  ;;  %3471 = vmatmul.msk.bf16.gmra.mxu3 %vm7188_vm4, %v3744_v57  ;;  %vm7196_vm5 = vmmov %vm7188_vm4 }
 0x1c0   : > { %3473 = vmatmul.msk.bf16.gmra.mxu0 %vm7196_vm5, %v3744_v57  ;;  %vm5745_vm6 = vmpackc.low %vm7198_vm10, %vm7197_vm8  ;;  %v1784_v41 = vadd.f32 %v3338_v18, %v1783_v62  ;;  %3487 = vmatpush.bf16.msk.msrb.mxu2 %vm5725_vm11, %v7141_v25  ;;  %vm7202_vm5 = vcmp.eq.s32.totalorder %v4963_v47, %v5468_v35  ;;  %vm7208_vm8 = vcmp.eq.s32.totalorder %v4963_v47, %v7207_v9  ;;  %v1420_v62 = vpop.permute.xlu2 %1419  ;;  %v7255_v9 = vld [vmem:[#allocation15_spill] sm:$0xff] }
 0x1c1   : > { %v7200_v13 = vsel %vm5745_vm6, 4294967295, %v7199_v13  ;;  %vm7201_vm12 = vmmov %vm7188_vm4  ;;  %vm7203_vm4 = vcmp.eq.s32.totalorder %v4963_v47, %v5474_v39  ;;  %3503 = vmatpush.bf16.msk.msra.mxu3 %vm5308_vm2, %v7141_v25  ;;  %vm7210_vm10 = vcmp.eq.s32.totalorder %v4963_v47, %v7209_v55  ;;  %v7257_v55 = vld [vmem:[#allocation18_spill] sm:$0xff] }
 0x1c2   : > { %3475 = vmatmul.msk.bf16.gmra.mxu1 %vm7201_vm12, %v3744_v57  ;;  %vm5759_vm15 = vmpackc.low %vm7203_vm4, %vm7202_vm5  ;;  %3519 = vmatpush.bf16.msk.msra.mxu0 %vm5745_vm6, %v7141_v25  ;;  %v1785_v63 = vadd.f32 %v3339_v1, %v1784_v41  ;;  %vm7213_vm6 = vcmp.eq.s32.totalorder %v4963_v47, %v5320_v31  ;;  %v7215_v57 = vmov 0  ;;  %vm7217_vm5 = vcmp.eq.s32.totalorder %v4963_v47, %v5431_v45 }
 0x1c3   : > { %v7205_v32 = vsel %vm5759_vm15, 4294967295, %v7204_v32  ;;  %vm5775_vm12 = vmpackc.low %vm7210_vm10, %vm7208_vm8  ;;  %3535 = vmatpush.bf16.msk.msra.mxu1 %vm5759_vm15, %v7141_v25  ;;  %vm7214_vm8 = vcmp.eq.s32.totalorder %v4963_v47, %v5364_v7  ;;  %v3340_v11 = vsel %vm7217_vm5, 1.0, %v7120_v48  ;;  %vm7218_vm4 = vcmp.eq.s32.totalorder %v4963_v47, %v5534_v60  ;;  %v7230_v60 = vld [vmem:[#allocation80_spill] sm:$0xff] }
 0x1c4   : > { %v7212_v19 = vsel %vm5775_vm12, 4294967295, %v7211_v19  ;;  %vm5792_vm10 = vmpackc.low %vm7214_vm8, %vm7213_vm6  ;;  %vm7219_vm15 = vcmp.eq.s32.totalorder %v4963_v47, %v5505_v3  ;;  %v7220_v31 = vmov 0  ;;  %v1786_v7 = vadd.f32 %v3340_v11, %v1785_v63  ;;  %3489 = vmatpush.bf16.msk.msrb.mxu2 %vm5775_vm12, %v7141_v25  ;;  %v7259_v11 = vld [vmem:[#allocation19_spill] sm:$0xff] }
 0x1c5   : > { %v7216_v57 = vsel %vm5792_vm10, 4294967295, %v7215_v57  ;;  %vm5806_vm2 = vmpackc.low %vm7219_vm15, %vm7218_vm4  ;;  %vm7222_vm6 = vcmp.eq.s32.totalorder %v4963_v47, %v5484_v46  ;;  %vm7223_vm5 = vcmp.eq.s32.totalorder %v4963_v47, %v5517_v24  ;;  %vm7224_vm8 = vcmp.eq.s32.totalorder %v4963_v47, %v5648_v17  ;;  %3505 = vmatpush.bf16.msk.msra.mxu3 %vm5792_vm10, %v7141_v25  ;;  %v7228_v46 = vld [vmem:[#allocation81_spill] sm:$0xff] }
 0x1c6   : > { %v7221_v31 = vsel %vm5806_vm2, 4294967295, %v7220_v31  ;;  %v3341_v45 = vsel %vm7222_vm6, 1.0, %v7120_v48  ;;  %vm5823_vm15 = vmpackc.low %vm7224_vm8, %vm7223_vm5  ;;  %v7225_v3 = vmov 0  ;;  %3521 = vmatpush.bf16.msk.msra.mxu0 %vm5806_vm2, %v7141_v25  ;;  %vm7229_vm4 = vcmp.eq.s32.totalorder %v4963_v47, %v7228_v46 }
 0x1c7   : > { %v7226_v3 = vsel %vm5823_vm15, 4294967295, %v7225_v3  ;;  %vm7231_vm6 = vcmp.eq.s32.totalorder %v4963_v47, %v7230_v60  ;;  %v1787_v28 = vadd.f32 %v3341_v45, %v1786_v7  ;;  %3537 = vmatpush.bf16.msk.msra.mxu1 %vm5823_vm15, %v7141_v25  ;;  %vm7235_vm2 = vcmp.eq.s32.totalorder %v4963_v47, %v7170_v34  ;;  %v7262_v45 = vld [vmem:[#allocation20_spill] sm:$0xff]  ;;  %v7265_v60 = vld [vmem:[#allocation21_spill] sm:$0xff] }
 0x1c8   : > { %7227 = vst [vmem:[#allocation65_spill] sm:$0xff] %v7226_v3  ;;  %vm5839_vm12 = vmpackc.low %vm7231_vm6, %vm7229_vm4  ;;  %v3342_v18 = vsel %vm7235_vm2, 1.0, %v7120_v48  ;;  %vm7236_vm4 = vcmp.eq.s32.totalorder %v4963_v47, %v5417_v27  ;;  %vm7237_vm6 = vcmp.eq.s32.totalorder %v4963_v47, %v5419_v44  ;;  %v7238_v1 = vmov 0 }
 0x1c9   : > { %v7233_v14 = vsel %vm5839_vm12, 4294967295, %v7232_v14  ;;  %vm5858_vm10 = vmpackc.low %vm7237_vm6, %vm7236_vm4  ;;  %v1788_v41 = vadd.f32 %v3342_v18, %v1787_v28  ;;  %vm7241_vm8 = vcmp.eq.s32.totalorder %v4963_v47, %v5586_v49  ;;  %vm7242_vm5 = vcmp.eq.s32.totalorder %v4963_v47, %v5605_v54  ;;  %3491 = vmatpush.bf16.msk.msrb.mxu2 %vm5839_vm12, %v7141_v25  ;;  %v7252_v54 = vld [vmem:[#allocation14_spill] sm:$0xff]  ;;  %v7267_v28 = vld [vmem:[#allocation24_spill] sm:$0xff] }
 0x1ca   : > { %7234 = vst [vmem:[#allocation86_spill] sm:$0xff] %v7233_v14  ;;  %v7239_v1 = vsel %vm5858_vm10, 4294967295, %v7238_v1  ;;  %vm5868_vm15 = vmpackc.low %vm7242_vm5, %vm7241_vm8  ;;  %v7243_v34 = vmov 0  ;;  %vm7246_vm2 = vcmp.eq.s32.totalorder %v4963_v47, %v7171_v10  ;;  %vm7247_vm4 = vcmp.eq.s32.totalorder %v4963_v47, %v1417_v56  ;;  %3507 = vmatpush.bf16.msk.msra.mxu3 %vm5858_vm10, %v7141_v25  ;;  %v7269_v18 = vld [vmem:[#allocation25_spill] sm:$0xff] }
 0x1cb   : > { %7240 = vst [vmem:[#allocation89_spill] sm:$0xff] %v7239_v1  ;;  %v7244_v34 = vsel %vm5868_vm15, 4294967295, %v7243_v34  ;;  %v3343_v27 = vsel %vm7246_vm2, 1.0, %v7120_v48  ;;  %vm7248_vm6 = vcmp.eq.s32.totalorder %v4963_v47, %v1420_v62  ;;  %v7249_v44 = vmov 0  ;;  %3523 = vmatpush.bf16.msk.msra.mxu0 %vm5868_vm15, %v7141_v25 }
 0x1cc   : > { %7245 = vst [vmem:[#allocation79_spill] sm:$0xff] %v7244_v34  ;;  %vm5883_vm11 = vmpackc.low %vm7248_vm6, %vm7247_vm4  ;;  %v1789_v49 = vadd.f32 %v3343_v27, %v1788_v41  ;;  %vm7253_vm5 = vnez %v7252_v54  ;;  %vm7254_vm8 = vcmp.eq.s32.totalorder %v4963_v47, %v5324_v26  ;;  %vm7256_vm2 = vnez %v7255_v9  ;;  %v7272_v27 = vld [vmem:[#allocation26_spill] sm:$0xff] }
 0x1cd   : > { %v7250_v44 = vsel %vm5883_vm11, 4294967295, %v7249_v44  ;;  %3539 = vmatpush.bf16.msk.msra.mxu1 %vm5883_vm11, %v7141_v25  ;;  %3541 = vmatpush.bf16.msk.msra.mxu2 %vm7253_vm5, %v7141_v25  ;;  %v3344_v10 = vsel %vm7254_vm8, 1.0, %v7120_v48  ;;  %vm7258_vm4 = vnez %v7257_v55  ;;  %vm7260_vm6 = vnez %v7259_v11  ;;  %v7278_v9 = vld [vmem:[#allocation30_spill] sm:$0xff]  ;;  %v7280_v55 = vld [vmem:[#allocation31_spill] sm:$0xff] }
 0x1ce   : > { %7251 = vst [vmem:[#allocation59_spill] sm:$0xff] %v7250_v44  ;;  %3557 = vmatpush.bf16.msk.msrb.mxu3 %vm7256_vm2, %v7141_v25  ;;  %v1790_v63 = vadd.f32 %v3344_v10, %v1789_v49  ;;  %vm7261_vm5 = vcmp.eq.s32.totalorder %v4963_v47, %v5312_v38  ;;  %vm7263_vm8 = vnez %v7262_v45  ;;  %vm7264_vm2 = vcmp.eq.s32.totalorder %v4963_v47, %v5177_v12  ;;  %v7274_v49 = vld [vmem:[#allocation72_spill] sm:$0xff]  ;;  %v7276_v10 = vld [vmem:[#allocation27_spill] sm:$0xff] }
 0x1cf   : > { %3573 = vmatpush.bf16.msk.msrb.mxu0 %vm7258_vm4, %v7141_v25  ;;  %v3345_v7 = vsel %vm7261_vm5, 1.0, %v7120_v48  ;;  %v3346_v46 = vsel %vm7264_vm2, 1.0, %v7120_v48  ;;  %vm7266_vm4 = vnez %v7265_v60  ;;  %vm7270_vm5 = vnez %v7269_v18  ;;  %v7286_v45 = vld [vmem:[#allocation64_spill] sm:$0xff]  ;;  %v7288_v60 = vld [vmem:[#allocation33_spill] sm:$0xff] }
 0x1d0   : > { %v1791_v26 = vadd.f32 %v3345_v7, %v1790_v63  ;;  %vm7273_vm2 = vnez %v7272_v27  ;;  %v7282_v63 = vld [vmem:[#allocation71_spill] sm:$0xff]  ;;  %v7292_v18 = vld [vmem:[#allocation37_spill] sm:$0xff] }
 0x1d1   : > { %3589 = vmatpush.bf16.msk.msrb.mxu1 %vm7260_vm6, %v7141_v25  ;;  %3543 = vmatpush.bf16.msk.msra.mxu2 %vm7263_vm8, %v7141_v25  ;;  %vm7268_vm6 = vnez %v7267_v28  ;;  %vm7271_vm8 = vcmp.eq.s32.totalorder %v4963_v47, %v5265_v59  ;;  %v7290_v28 = vld [vmem:[#allocation36_spill] sm:$0xff]  ;;  %v7398_v5 = vld [vmem:[#allocation65_spill] sm:$0xff] }
 0x1d2   : > { %3559 = vmatpush.bf16.msk.msrb.mxu3 %vm7266_vm4, %v7141_v25  ;;  %v1792_v38 = vadd.f32 %v3346_v46, %v1791_v26  ;;  %v3347_v41 = vsel %vm7271_vm8, 1.0, %v7120_v48  ;;  %vm7275_vm4 = vcmp.eq.s32.totalorder %v4963_v47, %v7274_v49  ;;  %vm7281_vm8 = vnez %v7280_v55  ;;  %v7284_v26 = vld [vmem:[#allocation32_spill] sm:$0xff]  ;;  %v7296_v49 = vld [vmem:[#allocation38_spill] sm:$0xff]  ;;  %v7401_v23 = vld [vmem:[#allocation89_spill] sm:$0xff] }
 0x1d3   : > { %3575 = vmatpush.bf16.msk.msrb.mxu0 %vm7268_vm6, %v7141_v25  ;;  %v3348_v54 = vsel %vm7275_vm4, 1.0, %v7120_v48  ;;  %vm7277_vm6 = vnez %v7276_v10  ;;  %vm7285_vm4 = vnez %v7284_v26  ;;  %v7311_v26 = vld [vmem:[#allocation47_spill] sm:$0xff] }
 0x1d4   : > { %v1793_v12 = vadd.f32 %v3347_v41, %v1792_v38  ;;  %v7294_v41 = vld [vmem:[#allocation63_spill] sm:$0xff] }
 0x1d5   : > { %3591 = vmatpush.bf16.msk.msrb.mxu1 %vm7270_vm5, %v7141_v25  ;;  %3545 = vmatpush.bf16.msk.msra.mxu2 %vm7273_vm2, %v7141_v25  ;;  %vm7279_vm5 = vnez %v7278_v9  ;;  %vm7283_vm2 = vcmp.eq.s32.totalorder %v4963_v47, %v7282_v63  ;;  %v7300_v9 = vld [vmem:[#allocation39_spill] sm:$0xff] }
 0x1d6   : > { %3561 = vmatpush.bf16.msk.msrb.mxu3 %vm7277_vm6, %v7141_v25  ;;  %v1794_v59 = vadd.f32 %v3348_v54, %v1793_v12  ;;  %v3349_v11 = vsel %vm7283_vm2, 1.0, %v7120_v48  ;;  %vm7287_vm6 = vcmp.eq.s32.totalorder %v4963_v47, %v7286_v45  ;;  %vm7293_vm2 = vnez %v7292_v18  ;;  %v7304_v63 = vld [vmem:[#allocation43_spill] sm:$0xff]  ;;  %v7319_v18 = vld [vmem:[#allocation50_spill] sm:$0xff] }
 0x1d7   : > { %3577 = vmatpush.bf16.msk.msrb.mxu0 %vm7279_vm5, %v7141_v25  ;;  %v3350_v46 = vsel %vm7287_vm6, 1.0, %v7120_v48  ;;  %vm7289_vm5 = vnez %v7288_v60  ;;  %vm7297_vm6 = vnez %v7296_v49  ;;  %v7326_v49 = vld [vmem:[#allocation53_spill] sm:$0xff]  ;;  %v7403_v6 = vld [vmem:[#allocation79_spill] sm:$0xff] }
 0x1d8   : > { %v1795_v7 = vadd.f32 %v3349_v11, %v1794_v59  ;;  %v7302_v59 = vld [vmem:[#allocation42_spill] sm:$0xff] }
 0x1d9   : > { %3593 = vmatpush.bf16.msk.msrb.mxu1 %vm7281_vm8, %v7141_v25  ;;  %3547 = vmatpush.bf16.msk.msra.mxu2 %vm7285_vm4, %v7141_v25  ;;  %vm7291_vm8 = vnez %v7290_v28  ;;  %vm7295_vm4 = vcmp.eq.s32.totalorder %v4963_v47, %v7294_v41  ;;  %v7316_v28 = vld [vmem:[#allocation49_spill] sm:$0xff]  ;;  %v7321_v41 = vld [vmem:[#allocation51_spill] sm:$0xff] }
 0x1da   : > { %3563 = vmatpush.bf16.msk.msrb.mxu3 %vm7289_vm5, %v7141_v25  ;;  %v1796_v38 = vadd.f32 %v3350_v46, %v1795_v7  ;;  %v3351_v12 = vsel %vm7295_vm4, 1.0, %v7120_v48  ;;  %vm7298_vm5 = vcmp.eq.s32.totalorder %v4963_v47, %v1417_v56  ;;  %vm7303_vm4 = vnez %v7302_v59  ;;  %v7306_v56 = vld [vmem:[#allocation44_spill] sm:$0xff]  ;;  %v7309_v7 = vld [vmem:[#allocation45_spill] sm:$0xff] }
 0x1db   : > { %3579 = vmatpush.bf16.msk.msrb.mxu0 %vm7291_vm8, %v7141_v25  ;;  %v3352_v54 = vsel %vm7298_vm5, 1.0, %v7120_v48  ;;  %vm7299_vm8 = vcmp.eq.s32.totalorder %v4963_v47, %v1420_v62  ;;  %vm7307_vm5 = vnez %v7306_v56  ;;  %v7313_v46 = vld [vmem:[#allocation48_spill] sm:$0xff] }
 0x1dc   : > { %v1797_v27 = vadd.f32 %v3351_v12, %v1796_v38  ;;  %v3353_v10 = vsel %vm7299_vm8, 1.0, %v7120_v48  ;;  %vm7308_vm8 = vcmp.eq.s32.totalorder %v4963_v47, %v5517_v24  ;;  %v7323_v12 = vld [vmem:[#allocation52_spill] sm:$0xff] }
 0x1dd   : > { %3595 = vmatpush.bf16.msk.msrb.mxu1 %vm7293_vm2, %v7141_v25  ;;  %3549 = vmatpush.bf16.msk.msra.mxu2 %vm7297_vm6, %v7141_v25  ;;  %vm7301_vm2 = vnez %v7300_v9  ;;  %vm7305_vm6 = vnez %v7304_v63  ;;  %v3354_v62 = vsel %vm7308_vm8, 1.0, %v7120_v48  ;;  %vm7317_vm8 = vnez %v7316_v28  ;;  %v7331_v9 = vld [vmem:[#allocation55_spill] sm:$0xff]  ;;  %v7333_v59 = vld [vmem:[#allocation56_spill] sm:$0xff]  ;;  %v7344_v28 = vld [vmem:[#allocation74_spill] sm:$0xff] }
 0x1de   : > { %3565 = vmatpush.bf16.msk.msrb.mxu3 %vm7301_vm2, %v7141_v25  ;;  %v1798_v55 = vadd.f32 %v3352_v54, %v1797_v27  ;;  %vm7310_vm2 = vnez %v7309_v7  ;;  %v7338_v7 = vld [vmem:[#allocation78_spill] sm:$0xff] }
 0x1df   : > { %3581 = vmatpush.bf16.msk.msrb.mxu0 %vm7303_vm4, %v7141_v25  ;;  %vm7312_vm4 = vnez %v7311_v26 }
 0x1e0   : > { %v1799_v11 = vadd.f32 %v3353_v10, %v1798_v55  ;;  %v7329_v10 = vld [vmem:[#allocation54_spill] sm:$0xff] }
 0x1e1   : > { %3597 = vmatpush.bf16.msk.msrb.mxu1 %vm7305_vm6, %v7141_v25  ;;  %3551 = vmatpush.bf16.msk.msra.mxu2 %vm7307_vm5, %v7141_v25  ;;  %vm7314_vm6 = vnez %v7313_v46  ;;  %vm7315_vm5 = vcmp.eq.s32.totalorder %v4963_v47, %v5648_v17 }
 0x1e2   : > { %3567 = vmatpush.bf16.msk.msrb.mxu3 %vm7310_vm2, %v7141_v25  ;;  %v1800_v45 = vadd.f32 %v3354_v62, %v1799_v11  ;;  %v3355_v60 = vsel %vm7315_vm5, 1.0, %v7120_v48  ;;  %vm7318_vm2 = vcmp.eq.s32.totalorder %v4963_v47, %v5468_v35  ;;  %vm7324_vm5 = vnez %v7323_v12 }
 0x1e3   : > { %3583 = vmatpush.bf16.msk.msrb.mxu0 %vm7312_vm4, %v7141_v25  ;;  %v3356_v38 = vsel %vm7318_vm2, 1.0, %v7120_v48  ;;  %vm7320_vm4 = vnez %v7319_v18  ;;  %vm7327_vm2 = vnez %v7326_v49 }
 0x1e4   : > { %v1801_v24 = vadd.f32 %v3355_v60, %v1800_v45  ;;  %v7340_v45 = vld [vmem:[#allocation75_spill] sm:$0xff]  ;;  %v7342_v60 = vld [vmem:[#allocation68_spill] sm:$0xff] }
 0x1e5   : > { %3599 = vmatpush.bf16.msk.msrb.mxu1 %vm7314_vm6, %v7141_v25  ;;  %3553 = vmatpush.bf16.msk.msra.mxu2 %vm7317_vm8, %v7141_v25  ;;  %vm7322_vm6 = vnez %v7321_v41  ;;  %vm7325_vm8 = vcmp.eq.s32.totalorder %v4963_v47, %v5474_v39  ;;  %v7346_v41 = vld [vmem:[#allocation67_spill] sm:$0xff] }
 0x1e6   : > { %3569 = vmatpush.bf16.msk.msrb.mxu3 %vm7320_vm4, %v7141_v25  ;;  %v1802_v17 = vadd.f32 %v3356_v38, %v1801_v24  ;;  %v3357_v27 = vsel %vm7325_vm8, 1.0, %v7120_v48  ;;  %vm7328_vm4 = vcmp.eq.s32.totalorder %v4963_v47, %v7176_v33  ;;  %vm7334_vm8 = vnez %v7333_v59 }
 0x1e7   : > { %3585 = vmatpush.bf16.msk.msrb.mxu0 %vm7322_vm6, %v7141_v25  ;;  %v3358_v54 = vsel %vm7328_vm4, 1.0, %v7120_v48  ;;  %vm7330_vm6 = vnez %v7329_v10  ;;  %vm7336_vm4 = vcmp.eq.s32.totalorder %v4963_v47, %v7155_v2 }
 0x1e8   : > { %v1803_v35 = vadd.f32 %v3357_v27, %v1802_v17  ;;  %v3360_v63 = vsel %vm7336_vm4, 1.0, %v7120_v48  ;;  %vm7345_vm4 = vcmp.eq.s32.totalorder %v4963_v47, %v7344_v28  ;;  %v7348_v27 = vld [vmem:[#allocation66_spill] sm:$0xff] }
 0x1e9   : > { %3601 = vmatpush.bf16.msk.msrb.mxu1 %vm7324_vm5, %v7141_v25  ;;  %3555 = vmatpush.bf16.msk.msra.mxu2 %vm7327_vm2, %v7141_v25  ;;  %vm7332_vm5 = vnez %v7331_v9  ;;  %vm7335_vm2 = vcmp.eq.s32.totalorder %v4963_v47, %v7172_v58  ;;  %v3365_v38 = vsel %vm7345_vm4, 1.0, %v7120_v48  ;;  %v7350_v9 = vld [vmem:[#allocation84_spill] sm:$0xff] }
 0x1ea   : > { %3571 = vmatpush.bf16.msk.msrb.mxu3 %vm7330_vm6, %v7141_v25  ;;  %v1804_v39 = vadd.f32 %v3358_v54, %v1803_v35  ;;  %v3359_v55 = vsel %vm7335_vm2, 1.0, %v7120_v48  ;;  %vm7337_vm6 = vcmp.eq.s32.totalorder %v4963_v47, %v7154_v40  ;;  %vm7343_vm2 = vcmp.eq.s32.totalorder %v4963_v47, %v7342_v60 }
 0x1eb   : > { %3587 = vmatpush.bf16.msk.msrb.mxu0 %vm7332_vm5, %v7141_v25  ;;  %v3361_v56 = vsel %vm7337_vm6, 1.0, %v7120_v48  ;;  %vm7339_vm5 = vcmp.eq.s32.totalorder %v4963_v47, %v7338_v7  ;;  %v3364_v24 = vsel %vm7343_vm2, 1.0, %v7120_v48  ;;  %vm7347_vm6 = vcmp.eq.s32.totalorder %v4963_v47, %v7346_v41 }
 0x1ec   : > { %v1805_v33 = vadd.f32 %v3359_v55, %v1804_v39  ;;  %v3362_v26 = vsel %vm7339_vm5, 1.0, %v7120_v48  ;;  %v3366_v17 = vsel %vm7347_vm6, 1.0, %v7120_v48  ;;  %vm7349_vm5 = vcmp.eq.s32.totalorder %v4963_v47, %v7348_v27 }
 0x1ed   : > { %3603 = vmatpush.bf16.msk.msrb.mxu1 %vm7334_vm8, %v7141_v25  ;;  %vm7341_vm8 = vcmp.eq.s32.totalorder %v4963_v47, %v7340_v45  ;;  %v3367_v35 = vsel %vm7349_vm5, 1.0, %v7120_v48  ;;  %vm7359_vm5 = vcmask 64512  }
 0x1ee   : > { %v1806_v11 = vadd.f32 %v3360_v63, %v1805_v33  ;;  %v3363_v46 = vsel %vm7341_vm8, 1.0, %v7120_v48 }
 0x1f0   : > { %v1807_v62 = vadd.f32 %v3361_v56, %v1806_v11  ;;  %v7351_v11 = vld [vmem:[#allocation60_spill] sm:$0xff] }
 0x1f2   : > { %v1808_v58 = vadd.f32 %v3362_v26, %v1807_v62 }
 0x1f4   : > { %v1809_v2 = vadd.f32 %v3363_v46, %v1808_v58 }
 0x1f6   : > { %v1810_v40 = vadd.f32 %v3364_v24, %v1809_v2 }
 0x1f8   : > { %v1811_v18 = vadd.f32 %v3365_v38, %v1810_v40 }
 0x1fa   : > { %v1812_v12 = vadd.f32 %v3366_v17, %v1811_v18 }
 0x1fc   : > { %v6086_v49 = vadd.f32 %v3367_v35, %v1812_v12 }
 0x211   : > { %v2154_v35 = vpop.permute.xlu0 %2153 }
 0x22c   : > { %v2224_v54 = vpop.f32.mrf.mxu0 }
 0x22d   : > { %v2243_v10 = vpop.f32.mrf.mxu1  ;;  %v2225_v39 = vadd.f32 %v2224_v54, %v7350_v9 }
 0x22e   : > { %v2186_v59 = vpop.f32.mrf.mxu2  ;;  %v2244_v55 = vadd.f32 %v2243_v10, %v7350_v9 }
 0x22f   : > { %v2205_v33 = vpop.f32.mrf.mxu3  ;;  %3847 = vtanh.f32 %v2225_v39  ;;  %v2187_v7 = vadd.f32 %v2186_v59, %v7350_v9 }
 0x230   : > { %3849 = vtanh.f32 %v2244_v55  ;;  %v2206_v58 = vadd.f32 %v2205_v33, %v7350_v9 }
 0x234   : > { %v2226_v63 = vpop.f32.mrf.mxu0 }
 0x235   : > { %v2227_v56 = vadd.f32 %v2226_v63, %v7351_v11  ;;  %v2245_v62 = vpop.f32.mrf.mxu1  ;;  %v3848_v60 = vpop.eup %3847 }
 0x236   : > { %v2246_v26 = vadd.f32 %v2245_v62, %v7351_v11  ;;  %v2188_v45 = vpop.f32.mrf.mxu2  ;;  %v3850_v40 = vpop.eup %3849 }
 0x237   : > { %3851 = vtanh.f32 %v2227_v56  ;;  %v2189_v46 = vadd.f32 %v2188_v45, %v7351_v11  ;;  %v2207_v2 = vpop.f32.mrf.mxu3 }
 0x238   : > { %3853 = vtanh.f32 %v2246_v26  ;;  %v2208_v24 = vadd.f32 %v2207_v2, %v7351_v11  ;;  %v2159_v11 = vpop.permute.xlu1 %2158 }
 0x239   : > { %3855 = vtanh.f32 %v2187_v7 }
 0x23a   : > { %3857 = vtanh.f32 %v2206_v58 }
 0x23b   : > { %3859 = vtanh.f32 %v2189_v46  ;;  %v7352_v46 = vld [vmem:[#allocation58_spill] sm:$0xff] }
 0x23c   : > { %3861 = vtanh.f32 %v2208_v24 }
 0x23d   : > { %v2229_v28 = vpop.f32.mrf.mxu0  ;;  %v3852_v38 = vpop.eup %3851 }
 0x23e   : > { %v3854_v41 = vpop.eup %3853  ;;  %v2271_v17 = vpack.c.bf16 %v3852_v38, %v3848_v60  ;;  %v2230_v10 = vadd.f32 %v2229_v28, %v2154_v35  ;;  %v7353_v60 = vld [vmem:[#allocation57_spill] sm:$0xff] }
 0x23f   : > { %v2248_v18 = vpop.f32.mrf.mxu1  ;;  %v2272_v12 = vpack.c.bf16 %v3854_v41, %v3850_v40  ;;  %v3856_v27 = vpop.eup %3855 }
 0x240   : > { %2323 = vmatmul.bf16.vlgmr.msra.gmra.mxu0 %v2271_v17  ;;  %v3858_v54 = vpop.eup %3857  ;;  %v2249_v59 = vadd.f32 %v2248_v18, %v2154_v35  ;;  %3863 = vtanh.f32 %v2230_v10  ;;  %v2467_v3 = vpop.permute.xlu1 %2466 }
 0x241   : > { %2342 = vmatmul.bf16.vlgmr.msra.gmra.mxu1 %v2272_v12  ;;  %v2191_v9 = vpop.f32.mrf.mxu2  ;;  %v3860_v39 = vpop.eup %3859 }
 0x242   : > { %v2210_v55 = vpop.f32.mrf.mxu3  ;;  %v3862_v33 = vpop.eup %3861  ;;  %v2269_v63 = vpack.c.bf16 %v3860_v39, %v3856_v27  ;;  %3865 = vtanh.f32 %v2249_v59  ;;  %v2192_v58 = vadd.f32 %v2191_v9, %v2154_v35 }
 0x243   : > { %v2270_v62 = vpack.c.bf16 %v3862_v33, %v3858_v54  ;;  %v2211_v2 = vadd.f32 %v2210_v55, %v2154_v35  ;;  %v1814_v33 = vrot.slane %v6086_v49, 4 }
 0x244   : > { %2285 = vmatmul.bf16.vlgmr.msrb.gmra.mxu2 %v2269_v63 }
 0x245   : > { %v2231_v56 = vpop.f32.mrf.mxu0  ;;  %2304 = vmatmul.bf16.vlgmr.msra.gmra.mxu3 %v2270_v62  ;;  %2492 = vmatpush.bf16.msrb.mxu2 %v7352_v46  ;;  %v1815_v63 = vadd.f32 %v1814_v33, %v6086_v49 }
 0x246   : > { %v2232_v7 = vadd.f32 %v2231_v56, %v2159_v11  ;;  %2511 = vmatpush.bf16.msra.mxu3 %v7353_v60  ;;  %v3864_v38 = vpop.eup %3863 }
 0x247   : > { %v2250_v26 = vpop.f32.mrf.mxu1 }
 0x248   : > { %v2251_v45 = vadd.f32 %v2250_v26, %v2159_v11  ;;  %3867 = vtanh.f32 %v2232_v7  ;;  %v3866_v41 = vpop.eup %3865 }
 0x249   : > { %v2193_v24 = vpop.f32.mrf.mxu2 }
 0x24a   : > { %3869 = vtanh.f32 %v2251_v45  ;;  %v2194_v40 = vadd.f32 %v2193_v24, %v2159_v11  ;;  %v2212_v28 = vpop.f32.mrf.mxu3 }
 0x24b   : > { %3871 = vtanh.f32 %v2192_v58  ;;  %v2213_v18 = vadd.f32 %v2212_v28, %v2159_v11  ;;  %v1816_v11 = vrot.slane %v1815_v63, 2 }
 0x24c   : > { %3873 = vtanh.f32 %v2211_v2 }
 0x24d   : > { %3875 = vtanh.f32 %v2194_v40  ;;  %v1817_v56 = vadd.f32 %v1816_v11, %v1815_v63 }
 0x24e   : > { %v3868_v17 = vpop.eup %3867  ;;  %3877 = vtanh.f32 %v2213_v18 }
 0x24f   : > { %v2275_v27 = vpack.c.bf16 %v3868_v17, %v3864_v38  ;;  %v1818_v62 = vrot.slane %v1817_v56, 1 }
 0x250   : > { %v3870_v12 = vpop.eup %3869 }
 0x251   : > { %v2276_v54 = vpack.c.bf16 %v3870_v12, %v3866_v41  ;;  %v3872_v10 = vpop.eup %3871  ;;  %2328 = vmatmul.bf16.gmra.mxu0 %v2275_v27  ;;  %v1819_v7 = vadd.f32 %v1818_v62, %v1817_v56 }
 0x252   : > { %v3874_v35 = vpop.eup %3873 }
 0x253   : > { %2347 = vmatmul.bf16.gmra.mxu1 %v2276_v54  ;;  %v3876_v9 = vpop.eup %3875  ;;  %v1820_v26 = vadd.f32 1e-06, %v1819_v7 }
 0x254   : > { %v3878_v39 = vpop.eup %3877  ;;  %v2273_v59 = vpack.c.bf16 %v3876_v9, %v3872_v10 }
 0x255   : > { %v2274_v55 = vpack.c.bf16 %v3878_v39, %v3874_v35  ;;  %3879 = vrcp.f32 %v1820_v26  ;;  %v1832_v49 = vand.u32 2147483648, %v1820_v26  ;;  %vm1826_vm2 = vweird.f32 %v1820_v26 }
 0x256   : > { %2290 = vmatmul.bf16.gmra.mxu2 %v2273_v59  ;;  %v1830_v12 = vand.u32 2147483647, %v1820_v26 }
 0x257   : > { %2309 = vmatmul.bf16.gmra.mxu3 %v2274_v55  ;;  %v1833_v59 = vor.u32 1.1754944e-38, %v1832_v49 }
 0x258   : > { %vm1831_vm6 = vcmp.eq.f32.partialorder %v1830_v12, 8.507059e+37 }
 0x25b   : > { %v3880_v58 = vpop.eup %3879 }
 0x25c   : > { %v1822_v45 = vmul.f32 %v3880_v58, %v1820_v26  ;;  %vm1827_vm8 = vweird.f32 %v3880_v58 }
 0x25d   : > { %vm1828_vm4 = vmor %vm1826_vm2, %vm1827_vm8 }
 0x25e   : > { %v1823_v2 = vsub.f32 1.0, %v1822_v45  ;;  %v3945_v45 = vld [vmem:[%s4641_s30] sm:$0xff]  ;;  %vm7360_vm8 = vmmov %vm7359_vm5 }
 0x25f   : > { %vm7361_vm2 = vmmov %vm7359_vm5 }
 0x260   : > { %v1824_v28 = vmul.f32 %v3880_v58, %v1823_v2  ;;  %v3946_v2 = vld [vmem:[%s4641_s30 + $0x8] sm:$0xff] }
 0x262   : > { %v1825_v18 = vadd.f32 %v3880_v58, %v1824_v28 }
 0x264   : > { %v1829_v35 = vsel %vm1828_vm4, %v3880_v58, %v1825_v18  ;;  %vm7362_vm4 = vmmov %vm7361_vm2 }
 0x265   : > { %v6100_v33 = vsel %vm1831_vm6, %v1833_v59, %v1829_v35  ;;  %v3948_v59 = vld [vmem:[%s4641_s30 + $0x18] sm:$0xff]  ;;  %vm7363_vm6 = vcmask 261120  }
 0x266   : > { %7354 = vst [vmem:[#allocation62_spill] sm:$0xff] %v6100_v33 }
 0x2bd   : > { %v2324_v46 = vpop.f32.mrf.mxu0 }
 0x2be   : > { %v2343_v60 = vpop.f32.mrf.mxu1 }
 0x2c5   : > { %v2326_v17 = vpop.f32.mrf.mxu0 }
 0x2c6   : > { %v2345_v54 = vpop.f32.mrf.mxu1 }
 0x2c7   : > { %v2286_v24 = vpop.f32.mrf.mxu2 }
 0x2c8   : > { %v2305_v40 = vpop.f32.mrf.mxu3 }
 0x2c9   : > { %v2306_v38 = vadd.f32 %v2305_v40, %v2286_v24 }
 0x2cb   : > { %v2325_v41 = vadd.f32 %v2324_v46, %v2306_v38 }
 0x2cd   : > { %v2344_v9 = vadd.f32 %v2343_v60, %v2325_v41 }
 0x2ce   : > { %v2329_v7 = vpop.f32.mrf.mxu0 }
 0x2cf   : > { %v2288_v27 = vpop.f32.mrf.mxu2  ;;  %v2353_v63 = vmul.f32 %v2344_v9, %v6100_v33  ;;  %v3947_v9 = vld [vmem:[%s4641_s30 + $0x10] sm:$0xff]  ;;  %s3005_s30 = scalar_lea.sflag [#allocation4], %s4497_s0 }
 0x2d0   : > { %v2307_v10 = vpop.f32.mrf.mxu3  ;;  %v2348_v24 = vpop.f32.mrf.mxu1 }
 0x2d1   : > { %v2308_v39 = vadd.f32 %v2307_v10, %v2288_v27  ;;  %v6105_v46 = vadd.f32 %v3945_v45, %v2353_v63 }
 0x2d3   : > { %v2327_v55 = vadd.f32 %v2326_v17, %v2308_v39  ;;  %7355 = vst [vmem:[#allocation70_spill] sm:$0xff] %v6105_v46 }
 0x2d5   : > { %v2346_v11 = vadd.f32 %v2345_v54, %v2327_v55 }
 0x2d6   : > { %v2331_v49 = vpop.f32.mrf.mxu0 }
 0x2d7   : > { %v2354_v56 = vmul.f32 %v2346_v11, %v6100_v33  ;;  %v3745_v11 = vld [vmem:[%s6679_s5 + $0x10] sm:$0xff] }
 0x2d8   : > { %v2350_v27 = vpop.f32.mrf.mxu1 }
 0x2d9   : > { %v2291_v62 = vpop.f32.mrf.mxu2  ;;  %v6108_v58 = vadd.f32 %v3946_v2, %v2354_v56  ;;  %v3746_v56 = vld [vmem:[%s6679_s5 + $0x18] sm:$0xff] }
 0x2da   : > { %v2310_v26 = vpop.f32.mrf.mxu3 }
 0x2db   : > { %7356 = vst [vmem:[#allocation88_spill] sm:$0xff] %v6108_v58  ;;  %v2311_v60 = vadd.f32 %v2310_v26, %v2291_v62  ;;  %v2361_v40 = vpack.c.bf16 %v6108_v58, %v6105_v46  ;;  %v3610_v26 = vld [vmem:[%s6680_s6 + $0x30] sm:$0xff] }
 0x2dc   : > { %2461 = vperm.xlu2 %3814, %v3610_v26   ;;  %v3747_v26 = vld [vmem:[%s6678_s4 + $0x10] sm:$0xff] }
 0x2dd   : > { %v2330_v28 = vadd.f32 %v2329_v7, %v2311_v60  ;;  %2371 = vmatmul.bf16.vlgmr.msra.gmra.mxu2 %v2361_v40  ;;  %2390 = vmatmul.bf16.vlgmr.msrb.gmra.mxu3 %v2361_v40 }
 0x2de   : > { %2409 = vmatmul.bf16.vlgmr.msrb.gmra.mxu0 %v2361_v40  ;;  %2428 = vmatmul.bf16.vlgmr.msrb.gmra.mxu1 %v2361_v40  ;;  %v3608_v40 = vld [vmem:[%s6680_s6 + $0x20] sm:$0xff] }
 0x2df   : > { %v2349_v41 = vadd.f32 %v2348_v24, %v2330_v28 }
 0x2e1   : > { %v2293_v38 = vpop.f32.mrf.mxu2  ;;  %v2355_v54 = vmul.f32 %v2349_v41, %v6100_v33 }
 0x2e2   : > { %v2312_v18 = vpop.f32.mrf.mxu3 }
 0x2e3   : > { %v2313_v17 = vadd.f32 %v2312_v18, %v2293_v38  ;;  %v6115_v39 = vadd.f32 %v3947_v9, %v2355_v54 }
 0x2e4   : > { %2451 = vperm.xlu2 %3814, %v3608_v40   ;;  %v3649_v40 = vld [vmem:[%s6682_s8 + $0x28] sm:$0xff] }
 0x2e5   : > { %v2332_v12 = vadd.f32 %v2331_v49, %v2313_v17  ;;  %7357 = vst [vmem:[#allocation92_spill] sm:$0xff] %v6115_v39 }
 0x2e7   : > { %v2351_v10 = vadd.f32 %v2350_v27, %v2332_v12 }
 0x2e9   : > { %v2356_v35 = vmul.f32 %v2351_v10, %v6100_v33 }
 0x2eb   : > { %v6118_v55 = vadd.f32 %v3948_v59, %v2356_v35 }
 0x2ec   : > { %2669 = vperm.xlu2 %3814, %v3649_v40  }
 0x2ed   : > { %7358 = vst [vmem:[#allocation90_spill] sm:$0xff] %v6118_v55  ;;  %v2362_v63 = vpack.c.bf16 %v6118_v55, %v6115_v39 }
 0x2ef   : > { %2376 = vmatmul.bf16.gmra.mxu2 %v2362_v63  ;;  %2395 = vmatmul.bf16.gmra.mxu3 %v2362_v63 }
 0x2f0   : > { %2414 = vmatmul.bf16.gmra.mxu0 %v2362_v63  ;;  %2433 = vmatmul.bf16.gmra.mxu1 %v2362_v63 }
 0x2ff   : > { %3620 = vmatmul.msk.bf16.vlgmr.msrb.gmra.mxu2 %vm7359_vm5, %v3745_v11  ;;  %3622 = vmatmul.msk.bf16.vlgmr.msra.gmra.mxu3 %vm7360_vm8, %v3745_v11  ;;  %vm7364_vm5 = vmmov %vm7363_vm6 }
 0x300   : > { %vm7365_vm8 = vmmov %vm7364_vm5 }
 0x30f   : > { %3621 = vmatmul.msk.bf16.gmra.mxu2 %vm7361_vm2, %v3746_v56  ;;  %3623 = vmatmul.msk.bf16.gmra.mxu3 %vm7362_vm4, %v3746_v56  ;;  %vm7366_vm2 = vmmov %vm7364_vm5 }
 0x310   : > { %vm7367_vm4 = vmmov %vm7366_vm2 }
 0x311   : > { %vm7368_vm11 = vmmov %vm7366_vm2 }
 0x312   : > { %vm7369_vm15 = vmmov %vm7366_vm2 }
 0x313   : > { %vm7370_vm10 = vmmov %vm7366_vm2 }
 0x35b   : > { %v2410_v62 = vpop.f32.mrf.mxu0  ;;  %v2429_v7 = vpop.f32.mrf.mxu1 }
 0x360   : > { %v2372_v45 = vpop.f32.mrf.mxu2  ;;  %v2391_v2 = vpop.f32.mrf.mxu3 }
 0x363   : > { %v2412_v60 = vpop.f32.mrf.mxu0  ;;  %v2431_v24 = vpop.f32.mrf.mxu1 }
 0x364   : > { %v2530_v35 = vpack.c.bf16 %v2412_v60, %v2410_v62  ;;  %v2531_v9 = vpack.c.bf16 %v2431_v24, %v2429_v7  ;;  %v3748_v7 = vld [vmem:[%s6678_s4 + $0x18] sm:$0xff] }
 0x368   : > { %v2374_v28 = vpop.f32.mrf.mxu2  ;;  %v2393_v38 = vpop.f32.mrf.mxu3 }
 0x369   : > { %v2529_v62 = vpack.c.bf16 %v2393_v38, %v2391_v2 }
 0x36d   : > { %v2415_v18 = vpop.f32.mrf.mxu0  ;;  %v2434_v41 = vpop.f32.mrf.mxu1 }
 0x372   : > { %v2377_v17 = vpop.f32.mrf.mxu2  ;;  %v2396_v49 = vpop.f32.mrf.mxu3 }
 0x375   : > { %v2417_v12 = vpop.f32.mrf.mxu0  ;;  %v2436_v27 = vpop.f32.mrf.mxu1 }
 0x376   : > { %v2534_v54 = vpack.c.bf16 %v2417_v12, %v2415_v18  ;;  %v2535_v10 = vpack.c.bf16 %v2436_v27, %v2434_v41  ;;  %v2528_v18 = vpack.c.bf16 %v2374_v28, %v2372_v45 }
 0x378   : > { %2596 = vmatpush.bf16.msra.mxu2 %v2534_v54  ;;  %2615 = vmatpush.bf16.msrb.mxu3 %v2535_v10 }
 0x37a   : > { %v2379_v59 = vpop.f32.mrf.mxu2  ;;  %v2398_v63 = vpop.f32.mrf.mxu3 }
 0x37b   : > { %v2532_v11 = vpack.c.bf16 %v2379_v59, %v2377_v17  ;;  %v2533_v56 = vpack.c.bf16 %v2398_v63, %v2396_v49  ;;  %v2462_v49 = vpop.permute.xlu2 %2461 }
 0x37c   : > { %2597 = vmatpush.bf16.msra.mxu2 %v2530_v35  ;;  %2616 = vmatpush.bf16.msrb.mxu3 %v2531_v9 }
 0x37d   : > { %2558 = vmatpush.bf16.msra.mxu0 %v2532_v11  ;;  %2577 = vmatpush.bf16.msra.mxu1 %v2533_v56 }
 0x37f   : > { %3640 = vmatmul.msk.bf16.vlgmr.msra.gmra.mxu2 %vm7363_vm6, %v3747_v26  ;;  %3642 = vmatmul.msk.bf16.vlgmr.msrb.gmra.mxu3 %vm7364_vm5, %v3747_v26  ;;  %vm7374_vm6 = vmmov %vm7366_vm2 }
 0x380   : > { %vm7375_vm5 = vmmov %vm7366_vm2 }
 0x381   : > { %2559 = vmatpush.bf16.msra.mxu0 %v2528_v18  ;;  %2578 = vmatpush.bf16.msra.mxu1 %v2529_v62 }
 0x382   : > { %v2494_v45 = vpop.f32.mrf.mxu2  ;;  %v2513_v2 = vpop.f32.mrf.mxu3 }
 0x383   : > { %v2452_v11 = vpop.permute.xlu2 %2451 }
 0x384   : > { %3636 = vmatmul.msk.bf16.vlgmr.msra.gmra.mxu0 %vm7365_vm8, %v3747_v26  ;;  %3638 = vmatmul.msk.bf16.vlgmr.msra.gmra.mxu1 %vm7366_vm2, %v3747_v26  ;;  %v2495_v56 = vadd.f32 %v2494_v45, %v2452_v11  ;;  %v2457_v26 = vpop.permute.xlu0 %2456  ;;  %v2514_v40 = vadd.f32 %v2513_v2, %v2452_v11  ;;  %vm7383_vm8 = vnez %v7169_v36 }
 0x38a   : > { %v2496_v60 = vpop.f32.mrf.mxu2  ;;  %v2515_v24 = vpop.f32.mrf.mxu3 }
 0x38b   : > { %v2497_v18 = vadd.f32 %v2496_v60, %v2457_v26 }
 0x38f   : > { %3641 = vmatmul.msk.bf16.gmra.mxu2 %vm7367_vm4, %v3748_v7  ;;  %3643 = vmatmul.msk.bf16.gmra.mxu3 %vm7368_vm11, %v3748_v7  ;;  %vm7371_vm11 = vnez %v7076_v15  ;;  %vm7385_vm4 = vnez %v7186_v20  ;;  %v7405_v15 = vld [vmem:[#allocation59_spill] sm:$0xff] }
 0x392   : > { %v2499_v28 = vpop.f32.mrf.mxu2  ;;  %v2518_v38 = vpop.f32.mrf.mxu3 }
 0x393   : > { %v2500_v46 = vadd.f32 %v2499_v28, %v2462_v49  ;;  %v2519_v44 = vadd.f32 %v2518_v38, %v2462_v49 }
 0x394   : > { %3637 = vmatmul.msk.bf16.gmra.mxu0 %vm7369_vm15, %v3748_v7  ;;  %3639 = vmatmul.msk.bf16.gmra.mxu1 %vm7370_vm10, %v3748_v7  ;;  %v2516_v7 = vadd.f32 %v2515_v24, %v2457_v26  ;;  %vm7372_vm10 = vnez %v7084_v8  ;;  %vm7373_vm15 = vmmov %vm7366_vm2  ;;  %v7407_v8 = vld [vmem:[#allocation61_spill] sm:$0xff] }
 0x395   : > { %v6266_v50 = vadd.s32 1, %v7407_v8  ;;  %v6269_v22 = vmul.u32 32, %v7407_v8 }
 0x39a   : > { %v2501_v41 = vpop.f32.mrf.mxu2  ;;  %v2520_v17 = vpop.f32.mrf.mxu3 }
 0x39b   : > { %v2502_v60 = vadd.f32 %v2501_v41, %v2467_v3  ;;  %v2521_v24 = vadd.f32 %v2520_v17, %v2467_v3 }
 0x401   : > { %v2561_v12 = vpop.f32.mrf.mxu0  ;;  %v2580_v27 = vpop.f32.mrf.mxu1 }
 0x402   : > { %v2599_v54 = vpop.f32.mrf.mxu2  ;;  %v2618_v10 = vpop.f32.mrf.mxu3  ;;  %v2562_v62 = vadd.f32 %v2561_v12, %v2495_v56  ;;  %v2581_v55 = vadd.f32 %v2580_v27, %v2514_v40 }
 0x404   : > { %3881 = vtanh.f32 %v2562_v62 }
 0x405   : > { %3883 = vtanh.f32 %v2581_v55 }
 0x409   : > { %v2563_v35 = vpop.f32.mrf.mxu0  ;;  %v2582_v9 = vpop.f32.mrf.mxu1 }
 0x40a   : > { %v2601_v59 = vpop.f32.mrf.mxu2  ;;  %v2620_v63 = vpop.f32.mrf.mxu3  ;;  %v2564_v33 = vadd.f32 %v2563_v35, %v2497_v18  ;;  %v2583_v34 = vadd.f32 %v2582_v9, %v2516_v7 }
 0x40b   : > { %v3882_v27 = vpop.eup %3881 }
 0x40c   : > { %3885 = vtanh.f32 %v2564_v33 }
 0x40d   : > { %3887 = vtanh.f32 %v2583_v34  ;;  %v2621_v34 = vadd.f32 %v2620_v63, %v2516_v7 }
 0x411   : > { %v2566_v39 = vpop.f32.mrf.mxu0  ;;  %v2585_v58 = vpop.f32.mrf.mxu1 }
 0x412   : > { %v2604_v48 = vpop.f32.mrf.mxu2  ;;  %v2623_v47 = vpop.f32.mrf.mxu3  ;;  %v2567_v1 = vadd.f32 %v2566_v39, %v2500_v46  ;;  %v2586_v14 = vadd.f32 %v2585_v58, %v2519_v44 }
 0x413   : > { %v2605_v45 = vadd.f32 %v2604_v48, %v2500_v46  ;;  %v2624_v2 = vadd.f32 %v2623_v47, %v2519_v44  ;;  %v3884_v39 = vpop.eup %3883  ;;  %v2602_v46 = vadd.f32 %v2601_v59, %v2497_v18  ;;  %v2619_v44 = vadd.f32 %v2618_v10, %v2514_v40 }
 0x414   : > { %3889 = vtanh.f32 %v2567_v1  ;;  %v3886_v48 = vpop.eup %3885 }
 0x415   : > { %3891 = vtanh.f32 %v2586_v14  ;;  %v3888_v47 = vpop.eup %3887  ;;  %v2600_v14 = vadd.f32 %v2599_v54, %v2495_v56  ;;  %v2649_v10 = vpack.c.bf16 %v3886_v48, %v3882_v27 }
 0x416   : > { %3893 = vtanh.f32 %v2605_v45  ;;  %v2650_v45 = vpack.c.bf16 %v3888_v47, %v3884_v39  ;;  %v7416_v47 = vld [vmem:[#allocation22_spill] sm:$0xff] }
 0x417   : > { %3895 = vtanh.f32 %v2624_v2 }
 0x419   : > { %v2568_v12 = vpop.f32.mrf.mxu0  ;;  %v2587_v28 = vpop.f32.mrf.mxu1 }
 0x41a   : > { %v2569_v35 = vadd.f32 %v2568_v12, %v2502_v60  ;;  %v2588_v38 = vadd.f32 %v2587_v28, %v2521_v24  ;;  %v2606_v49 = vpop.f32.mrf.mxu2  ;;  %v2625_v9 = vpop.f32.mrf.mxu3  ;;  %v7415_v28 = vld [vmem:[#allocation17_spill] sm:$0xff] }
 0x41b   : > { %v2607_v58 = vadd.f32 %v2606_v49, %v2502_v60  ;;  %v2626_v33 = vadd.f32 %v2625_v9, %v2521_v24  ;;  %v3890_v3 = vpop.eup %3889  ;;  %v3749_v24 = vld [vmem:[%s6681_s7 + $0x10] sm:$0xff] }
 0x41c   : > { %3897 = vtanh.f32 %v2569_v35  ;;  %v3892_v1 = vpop.eup %3891 }
 0x41d   : > { %3899 = vtanh.f32 %v2588_v38  ;;  %v3894_v55 = vpop.eup %3893 }
 0x41e   : > { %3901 = vtanh.f32 %v2607_v58  ;;  %v3896_v41 = vpop.eup %3895 }
 0x41f   : > { %3903 = vtanh.f32 %v2626_v33 }
 0x420   : > { %3905 = vtanh.f32 %v2602_v46 }
 0x421   : > { %3907 = vtanh.f32 %v2621_v34  ;;  %v7417_v34 = vld [vmem:[#allocation23_spill] sm:$0xff] }
 0x422   : > { %v3898_v17 = vpop.eup %3897  ;;  %3909 = vtanh.f32 %v2600_v14 }
 0x423   : > { %v3900_v11 = vpop.eup %3899  ;;  %3911 = vtanh.f32 %v2619_v44  ;;  %v2653_v26 = vpack.c.bf16 %v3898_v17, %v3890_v3  ;;  %v2665_v17 = vpop.permute.xlu1 %2664 }
 0x424   : > { %v3902_v59 = vpop.eup %3901  ;;  %v2654_v18 = vpack.c.bf16 %v3900_v11, %v3892_v1 }
 0x425   : > { %v3904_v62 = vpop.eup %3903  ;;  %2704 = vmatpush.bf16.msrb.mxu0 %v2653_v26  ;;  %v2655_v63 = vpack.c.bf16 %v3902_v59, %v3894_v55 }
 0x426   : > { %v3906_v7 = vpop.eup %3905  ;;  %2723 = vmatpush.bf16.msrb.mxu1 %v2654_v18  ;;  %v2656_v54 = vpack.c.bf16 %v3904_v62, %v3896_v41 }
 0x427   : > { %v3908_v56 = vpop.eup %3907  ;;  %2742 = vmatpush.bf16.msrb.mxu2 %v2655_v63 }
 0x428   : > { %v3910_v40 = vpop.eup %3909  ;;  %2761 = vmatpush.bf16.msra.mxu3 %v2656_v54 }
 0x429   : > { %v3912_v2 = vpop.eup %3911  ;;  %2705 = vmatpush.bf16.msrb.mxu0 %v2649_v10  ;;  %v2651_v60 = vpack.c.bf16 %v3906_v7, %v3910_v40 }
 0x42a   : > { %2724 = vmatpush.bf16.msrb.mxu1 %v2650_v45  ;;  %v2652_v12 = vpack.c.bf16 %v3908_v56, %v3912_v2  ;;  %v7418_v2 = vld [vmem:[#allocation28_spill] sm:$0xff] }
 0x42b   : > { %2743 = vmatpush.bf16.msrb.mxu2 %v2651_v60 }
 0x42c   : > { %2762 = vmatpush.bf16.msra.mxu3 %v2652_v12  ;;  %3660 = vmatmul.msk.bf16.vlgmr.msrb.gmra.mxu0 %vm7373_vm15, %v3749_v24 }
 0x42d   : > { %3669 = vmatpush.bf16.msk.msra.mxu0 %vm5008_vm3, %v7141_v25  ;;  %3662 = vmatmul.msk.bf16.vlgmr.msrb.gmra.mxu1 %vm7374_vm6, %v3749_v24  ;;  %vm7376_vm3 = vmmov %vm7366_vm2  ;;  %vm7384_vm2 = vnez %v7179_v52  ;;  %v7412_v52 = vld [vmem:[#allocation13_spill] sm:$0xff] }
 0x42e   : > { %3685 = vmatpush.bf16.msk.msra.mxu1 %vm4985_vm1, %v7141_v25  ;;  %3664 = vmatmul.msk.bf16.vlgmr.msrb.gmra.mxu2 %vm7375_vm5, %v3749_v24  ;;  %vm7377_vm1 = vnez %v7153_v16  ;;  %vm7388_vm15 = vmmov %vm7376_vm3  ;;  %v7408_v16 = vld [vmem:[#allocation10_spill] sm:$0xff] }
 0x42f   : > { %3701 = vmatpush.bf16.msk.msra.mxu2 %vm7371_vm11, %v7141_v25  ;;  %3666 = vmatmul.msk.bf16.vlgmr.msra.gmra.mxu3 %vm7376_vm3, %v3749_v24  ;;  %vm7386_vm11 = vnez %v7178_v0  ;;  %vm7389_vm6 = vmmov %vm7376_vm3  ;;  %v7411_v0 = vld [vmem:[#allocation12_spill] sm:$0xff]  ;;  %v7419_v24 = vld [vmem:[#allocation29_spill] sm:$0xff] }
 0x430   : > { %3717 = vmatpush.bf16.msk.msrb.mxu3 %vm7372_vm10, %v7141_v25  ;;  %vm7387_vm10 = vnez %v7184_v43  ;;  %vm7390_vm5 = vmmov %vm7376_vm3  ;;  %v7413_v43 = vld [vmem:[#allocation9_spill] sm:$0xff] }
 0x431   : > { %3671 = vmatpush.bf16.msk.msra.mxu0 %vm5046_vm7, %v7141_v25  ;;  %vm7378_vm7 = vnez %v7151_v61  ;;  %v6272_v61 = vmul.u32 32, %v6266_v50  ;;  %v656_v20 = vadd.s32 240, %v7413_v43  ;;  %v654_v27 = vadd.s32 224, %v7413_v43 }
 0x432   : > { %3687 = vmatpush.bf16.msk.msra.mxu1 %vm5024_vm0, %v7141_v25  ;;  %vm7379_vm0 = vnez %v7156_v4  ;;  %v7409_v4 = vld [vmem:[#allocation11_spill] sm:$0xff]  ;;  %v655_v49 = vadd.s32 232, %v7413_v43  ;;  %v652_v41 = vadd.s32 208, %v7413_v43  ;;  %v653_v62 = vadd.s32 216, %v7413_v43 }
 0x433   : > { %3703 = vmatpush.bf16.msk.msra.mxu2 %vm5188_vm13, %v7141_v25  ;;  %vm7380_vm13 = vnez %v7164_v29 }
 0x434   : > { %3719 = vmatpush.bf16.msk.msrb.mxu3 %vm5224_vm9, %v7141_v25  ;;  %vm7381_vm9 = vnez %v7174_v42 }
 0x435   : > { %3673 = vmatpush.bf16.msk.msra.mxu0 %vm5071_vm14, %v7141_v25  ;;  %vm7382_vm14 = vnez %v7163_v53 }
 0x436   : > { %3689 = vmatpush.bf16.msk.msra.mxu1 %vm7377_vm1, %v7141_v25  ;;  %vm7391_vm1 = vnez %v7194_v51  ;;  %v657_v51 = vadd.s32 248, %v7413_v43 }
 0x437   : > { %3705 = vmatpush.bf16.msk.msra.mxu2 %vm7378_vm7, %v7141_v25  ;;  %vm7392_vm7 = vnez %v7206_v37 }
 0x438   : > { %3721 = vmatpush.bf16.msk.msrb.mxu3 %vm7379_vm0, %v7141_v25  ;;  %vm7393_vm0 = vnez %v7200_v13 }
 0x439   : > { %3675 = vmatpush.bf16.msk.msra.mxu0 %vm7380_vm13, %v7141_v25  ;;  %vm7394_vm13 = vnez %v7205_v32 }
 0x43a   : > { %3691 = vmatpush.bf16.msk.msra.mxu1 %vm7381_vm9, %v7141_v25  ;;  %vm7395_vm9 = vnez %v7212_v19 }
 0x43b   : > { %3707 = vmatpush.bf16.msk.msra.mxu2 %vm7382_vm14, %v7141_v25  ;;  %vm7396_vm14 = vnez %v7216_v57 }
 0x43c   : > { %3723 = vmatpush.bf16.msk.msrb.mxu3 %vm7383_vm8, %v7141_v25  ;;  %3661 = vmatmul.msk.bf16.gmra.mxu0 %vm7388_vm15, %v3750_v30  ;;  %vm7397_vm8 = vnez %v7221_v31  ;;  %vm674_vm15 = vcmp.ge.s32.totalorder %v7409_v4, %v6269_v22  ;;  %v7414_v31 = vld [vmem:[#allocation16_spill] sm:$0xff] }
 0x43d   : > { %3677 = vmatpush.bf16.msk.msra.mxu0 %vm7384_vm2, %v7141_v25  ;;  %3663 = vmatmul.msk.bf16.gmra.mxu1 %vm7389_vm6, %v3750_v30  ;;  %vm7399_vm2 = vnez %v7398_v5  ;;  %vm706_vm6 = vcmp.lt.s32.totalorder %v7408_v16, %v6272_v61  ;;  %v651_v5 = vadd.s32 200, %v7413_v43 }
 0x43e   : > { %3693 = vmatpush.bf16.msk.msra.mxu1 %vm7385_vm4, %v7141_v25  ;;  %3665 = vmatmul.msk.bf16.gmra.mxu2 %vm7390_vm5, %v3750_v30  ;;  %vm7402_vm4 = vnez %v7401_v23  ;;  %vm707_vm5 = vcmp.lt.s32.totalorder %v7409_v4, %v6272_v61 }
 0x43f   : > { %3709 = vmatpush.bf16.msk.msra.mxu2 %vm7386_vm11, %v7141_v25  ;;  %3667 = vmatmul.msk.bf16.gmra.mxu3 %vm7376_vm3, %v3750_v30  ;;  %vm7404_vm11 = vnez %v7403_v6  ;;  %v650_v30 = vadd.s32 192, %v7413_v43  ;;  %v7420_v6 = vld [vmem:[#allocation34_spill] sm:$0xff] }
 0x440   : > { %3725 = vmatpush.bf16.msk.msrb.mxu3 %vm7387_vm10, %v7141_v25  ;;  %vm7406_vm10 = vnez %v7405_v15  ;;  %v7421_v15 = vld [vmem:[#allocation35_spill] sm:$0xff] }
 0x441   : > { %3679 = vmatpush.bf16.msk.msra.mxu0 %vm7391_vm1, %v7141_v25  ;;  %vm739_vm1 = vmand %vm674_vm15, %vm707_vm5  ;;  %vm702_vm5 = vcmp.lt.s32.totalorder %v7414_v31, %v6272_v61 }
 0x442   : > { %3695 = vmatpush.bf16.msk.msra.mxu1 %vm7392_vm7, %v7141_v25  ;;  %vm671_vm7 = vcmp.ge.s32.totalorder %v7411_v0, %v6269_v22 }
 0x443   : > { %3711 = vmatpush.bf16.msk.msra.mxu2 %vm7393_vm0, %v7141_v25  ;;  %vm672_vm0 = vcmp.ge.s32.totalorder %v7412_v52, %v6269_v22 }
 0x444   : > { %3727 = vmatpush.bf16.msk.msrb.mxu3 %vm7394_vm13, %v7141_v25  ;;  %vm704_vm13 = vcmp.lt.s32.totalorder %v7411_v0, %v6272_v61 }
 0x445   : > { %3681 = vmatpush.bf16.msk.msra.mxu0 %vm7395_vm9, %v7141_v25  ;;  %vm705_vm9 = vcmp.lt.s32.totalorder %v7412_v52, %v6272_v61 }
 0x446   : > { %3697 = vmatpush.bf16.msk.msra.mxu1 %vm7396_vm14, %v7141_v25  ;;  %vm736_vm14 = vmand %vm671_vm7, %vm704_vm13  ;;  %vm720_vm13 = vcmp.lt.s32.totalorder %v654_v27, %v6272_v61 }
 0x447   : > { %3713 = vmatpush.bf16.msk.msra.mxu2 %vm7397_vm8, %v7141_v25  ;;  %vm737_vm8 = vmand %vm672_vm0, %vm705_vm9  ;;  %vm687_vm0 = vcmp.ge.s32.totalorder %v654_v27, %v6269_v22 }
 0x448   : > { %3729 = vmatpush.bf16.msk.msrb.mxu3 %vm7399_vm2, %v7141_v25  ;;  %vm689_vm2 = vcmp.ge.s32.totalorder %v656_v20, %v6269_v22 }
 0x449   : > { %3683 = vmatpush.bf16.msk.msra.mxu0 %vm5839_vm12, %v7141_v25  ;;  %vm673_vm12 = vcmp.ge.s32.totalorder %v7408_v16, %v6269_v22 }
 0x44a   : > { %3699 = vmatpush.bf16.msk.msra.mxu1 %vm7402_vm4, %v7141_v25  ;;  %vm738_vm3 = vmand %vm673_vm12, %vm706_vm6  ;;  %vm690_vm4 = vcmp.ge.s32.totalorder %v657_v51, %v6269_v22  ;;  %vm669_vm12 = vcmp.ge.s32.totalorder %v7414_v31, %v6269_v22  ;;  %vm670_vm6 = vcmp.ge.s32.totalorder %v7415_v28, %v6269_v22 }
 0x44b   : > { %3715 = vmatpush.bf16.msk.msra.mxu2 %vm7404_vm11, %v7141_v25  ;;  %vm722_vm11 = vcmp.lt.s32.totalorder %v656_v20, %v6272_v61  ;;  %vm734_vm7 = vmand %vm669_vm12, %vm702_vm5  ;;  %vm700_vm12 = vcmp.lt.s32.totalorder %v7416_v47, %v6272_v61 }
 0x44c   : > { %3731 = vmatpush.bf16.msk.msrb.mxu3 %vm7406_vm10, %v7141_v25  ;;  %v7410_v25 = vmov 0.0   ;;  %vm723_vm10 = vcmp.lt.s32.totalorder %v657_v51, %v6272_v61  ;;  %vm754_vm15 = vmand %vm689_vm2, %vm722_vm11  ;;  %vm668_vm11 = vcmp.ge.s32.totalorder %v7417_v34, %v6269_v22 }
 0x44d   : > { %v3221_v53 = vsel %vm738_vm3, 1.0, %v7410_v25  ;;  %v3222_v29 = vsel %vm739_vm1, 1.0, %v7410_v25  ;;  %v3219_v32 = vsel %vm736_vm14, 1.0, %v7410_v25  ;;  %v3220_v37 = vsel %vm737_vm8, 1.0, %v7410_v25  ;;  %vm755_vm1 = vmand %vm690_vm4, %vm723_vm10 }
 0x44e   : > { %v898_v36 = vmul.f32 0.03125, %v3221_v53  ;;  %v899_v42 = vmul.f32 0.03125, %v3222_v29  ;;  %v896_v19 = vmul.f32 0.03125, %v3219_v32  ;;  %v897_v57 = vmul.f32 0.03125, %v3220_v37  ;;  %vm752_vm2 = vmand %vm687_vm0, %vm720_vm13  ;;  %v6361_v53 = vpop.permute.xlu2 %2669 }
 0x44f   : > { %vm703_vm3 = vcmp.lt.s32.totalorder %v7415_v28, %v6272_v61  ;;  %v3237_v38 = vsel %vm754_vm15, 1.0, %v7410_v25  ;;  %v3238_v9 = vsel %vm755_vm1, 1.0, %v7410_v25  ;;  %v3217_v33 = vsel %vm734_vm7, 1.0, %v7410_v25 }
 0x450   : > { %v923_v13 = vpack.c.bf16 %v899_v42, %v898_v36  ;;  %v922_v35 = vpack.c.bf16 %v897_v57, %v896_v19  ;;  %v914_v39 = vmul.f32 0.03125, %v3237_v38  ;;  %v915_v58 = vmul.f32 0.03125, %v3238_v9  ;;  %vm735_vm9 = vmand %vm670_vm6, %vm703_vm3 }
 0x451   : > { %vm688_vm14 = vcmp.ge.s32.totalorder %v655_v49, %v6269_v22  ;;  %vm721_vm8 = vcmp.lt.s32.totalorder %v655_v49, %v6272_v61  ;;  %v3218_v48 = vsel %vm735_vm9, 1.0, %v7410_v25  ;;  %v894_v46 = vmul.f32 0.03125, %v3217_v33 }
 0x452   : > { %2931 = vmatpush.bf16.msrb.mxu1 %v923_v13  ;;  %vm667_vm4 = vcmp.ge.s32.totalorder %v7416_v47, %v6269_v22  ;;  %v931_v3 = vpack.c.bf16 %v915_v58, %v914_v39  ;;  %v895_v14 = vmul.f32 0.03125, %v3218_v48  ;;  %vm753_vm10 = vmand %vm688_vm14, %vm721_vm8  ;;  %v3235_v1 = vsel %vm752_vm2, 1.0, %v7410_v25 }
 0x453   : > { %v3236_v44 = vsel %vm753_vm10, 1.0, %v7410_v25  ;;  %v912_v55 = vmul.f32 0.03125, %v3235_v1  ;;  %vm701_vm15 = vcmp.lt.s32.totalorder %v7417_v34, %v6272_v61  ;;  %vm732_vm6 = vmand %vm667_vm4, %vm700_vm12  ;;  %vm685_vm3 = vcmp.ge.s32.totalorder %v652_v41, %v6269_v22 }
 0x454   : > { %2950 = vmatpush.bf16.msrb.mxu2 %v931_v3  ;;  %v921_v26 = vpack.c.bf16 %v895_v14, %v894_v46  ;;  %v913_v59 = vmul.f32 0.03125, %v3236_v44  ;;  %vm733_vm5 = vmand %vm668_vm11, %vm701_vm15  ;;  %v3215_v18 = vsel %vm732_vm6, 1.0, %v7410_v25  ;;  %vm686_vm1 = vcmp.ge.s32.totalorder %v653_v62, %v6269_v22 }
 0x455   : > { %v3216_v54 = vsel %vm733_vm5, 1.0, %v7410_v25  ;;  %v892_v56 = vmul.f32 0.03125, %v3215_v18  ;;  %vm718_vm7 = vcmp.lt.s32.totalorder %v652_v41, %v6272_v61  ;;  %vm719_vm0 = vcmp.lt.s32.totalorder %v653_v62, %v6272_v61 }
 0x456   : > { %2932 = vmatpush.bf16.msrb.mxu1 %v922_v35  ;;  %v930_v40 = vpack.c.bf16 %v913_v59, %v912_v55  ;;  %v893_v45 = vmul.f32 0.03125, %v3216_v54  ;;  %vm665_vm13 = vcmp.ge.s32.totalorder %v7418_v2, %v6269_v22  ;;  %vm750_vm9 = vmand %vm685_vm3, %vm718_vm7  ;;  %vm666_vm14 = vcmp.ge.s32.totalorder %v7419_v24, %v6269_v22 }
 0x457   : > { %vm698_vm8 = vcmp.lt.s32.totalorder %v7418_v2, %v6272_v61  ;;  %vm751_vm2 = vmand %vm686_vm1, %vm719_vm0  ;;  %v3233_v12 = vsel %vm750_vm9, 1.0, %v7410_v25  ;;  %vm699_vm4 = vcmp.lt.s32.totalorder %v7419_v24, %v6272_v61  ;;  %vm663_vm10 = vcmp.ge.s32.totalorder %v7420_v6, %v6269_v22 }
 0x458   : > { %2951 = vmatpush.bf16.msrb.mxu2 %v930_v40  ;;  %v920_v60 = vpack.c.bf16 %v893_v45, %v892_v56  ;;  %v3234_v21 = vsel %vm751_vm2, 1.0, %v7410_v25  ;;  %v910_v23 = vmul.f32 0.03125, %v3233_v12  ;;  %vm730_vm11 = vmand %vm665_vm13, %vm698_vm8  ;;  %vm664_vm12 = vcmp.ge.s32.totalorder %v7421_v15, %v6269_v22  ;;  %v7422_v56 = vld [vmem:[#allocation40_spill] sm:$0xff] }
 0x459   : > { %v911_v36 = vmul.f32 0.03125, %v3234_v21  ;;  %vm731_vm15 = vmand %vm666_vm14, %vm699_vm4  ;;  %v3213_v42 = vsel %vm730_vm11, 1.0, %v7410_v25  ;;  %vm683_vm6 = vcmp.ge.s32.totalorder %v650_v30, %v6269_v22  ;;  %vm684_vm5 = vcmp.ge.s32.totalorder %v651_v5, %v6269_v22 }
 0x45a   : > { %2933 = vmatpush.bf16.msrb.mxu1 %v921_v26  ;;  %v3214_v32 = vsel %vm731_vm15, 1.0, %v7410_v25  ;;  %v890_v37 = vmul.f32 0.03125, %v3213_v42  ;;  %vm716_vm3 = vcmp.lt.s32.totalorder %v650_v30, %v6272_v61  ;;  %vm717_vm7 = vcmp.lt.s32.totalorder %v651_v5, %v6272_v61 }
 0x45b   : > { %v929_v38 = vpack.c.bf16 %v911_v36, %v910_v23  ;;  %v891_v49 = vmul.f32 0.03125, %v3214_v32  ;;  %vm748_vm1 = vmand %vm683_vm6, %vm716_vm3  ;;  %vm696_vm13 = vcmp.lt.s32.totalorder %v7420_v6, %v6272_v61  ;;  %vm697_vm9 = vcmp.lt.s32.totalorder %v7421_v15, %v6272_v61 }
 0x45c   : > { %v3231_v58 = vsel %vm748_vm1, 1.0, %v7410_v25  ;;  %vm749_vm0 = vmand %vm684_vm5, %vm717_vm7  ;;  %v648_v3 = vadd.s32 176, %v7413_v43  ;;  %v649_v44 = vadd.s32 184, %v7413_v43  ;;  %vm661_vm6 = vcmp.ge.s32.totalorder %v7422_v56, %v6269_v22 }
 0x45d   : > { %2952 = vmatpush.bf16.msrb.mxu2 %v929_v38  ;;  %v919_v33 = vpack.c.bf16 %v891_v49, %v890_v37  ;;  %v908_v48 = vmul.f32 0.03125, %v3231_v58  ;;  %v3232_v46 = vsel %vm749_vm0, 1.0, %v7410_v25  ;;  %vm728_vm14 = vmand %vm663_vm10, %vm696_vm13  ;;  %vm694_vm3 = vcmp.lt.s32.totalorder %v7422_v56, %v6272_v61  ;;  %v2680_v38 = vpop.permute.xlu1 %2679 }
 0x45e   : > { %2934 = vmatpush.bf16.msrb.mxu1 %v920_v60  ;;  %v909_v14 = vmul.f32 0.03125, %v3232_v46  ;;  %vm729_vm8 = vmand %vm664_vm12, %vm697_vm9  ;;  %v3211_v1 = vsel %vm728_vm14, 1.0, %v7410_v25  ;;  %vm681_vm2 = vcmp.ge.s32.totalorder %v648_v3, %v6269_v22  ;;  %vm714_vm4 = vcmp.lt.s32.totalorder %v648_v3, %v6272_v61 }
 0x45f   : > { %v3212_v55 = vsel %vm729_vm8, 1.0, %v7410_v25  ;;  %v888_v41 = vmul.f32 0.03125, %v3211_v1  ;;  %vm682_vm11 = vcmp.ge.s32.totalorder %v649_v44, %v6269_v22  ;;  %vm715_vm10 = vcmp.lt.s32.totalorder %v649_v44, %v6272_v61  ;;  %vm746_vm12 = vmand %vm681_vm2, %vm714_vm4 }
 0x460   : > { %v928_v26 = vpack.c.bf16 %v909_v14, %v908_v48  ;;  %v889_v59 = vmul.f32 0.03125, %v3212_v55  ;;  %vm747_vm15 = vmand %vm682_vm11, %vm715_vm10  ;;  %v3229_v54 = vsel %vm746_vm12, 1.0, %v7410_v25  ;;  %vm659_vm0 = vcmp.ge.s32.totalorder %v7413_v43, %v6269_v22 }
 0x461   : > { %v3230_v36 = vsel %vm747_vm15, 1.0, %v7410_v25  ;;  %vm726_vm7 = vmand %vm661_vm6, %vm694_vm3  ;;  %vm692_vm2 = vcmp.lt.s32.totalorder %v7413_v43, %v6272_v61 }
 0x462   : > { %2935 = vmatpush.bf16.msrb.mxu1 %v919_v33  ;;  %2953 = vmatpush.bf16.msrb.mxu2 %v928_v26  ;;  %v918_v5 = vpack.c.bf16 %v889_v59, %v888_v41  ;;  %v907_v37 = vmul.f32 0.03125, %v3230_v36  ;;  %vm724_vm12 = vmand %vm659_vm0, %vm692_vm2 }
 0x466   : > { %2936 = vmatpush.bf16.msrb.mxu1 %v918_v5 }
 0x4a9   : > { %v2707_v11 = vpop.f32.mrf.mxu0 }
 0x4aa   : > { %v2708_v63 = vadd.f32 %v2707_v11, %v2665_v17  ;;  %v2726_v7 = vpop.f32.mrf.mxu1 }
 0x4ab   : > { %v2727_v10 = vadd.f32 %v2726_v7, %v2665_v17 }
 0x4ac   : > { %3913 = vtanh.f32 %v2708_v63 }
 0x4ad   : > { %3915 = vtanh.f32 %v2727_v10  ;;  %v7423_v10 = vld [vmem:[#allocation41_spill] sm:$0xff] }
 0x4ae   : > { %vm662_vm5 = vcmp.ge.s32.totalorder %v7423_v10, %v6269_v22  ;;  %vm695_vm1 = vcmp.lt.s32.totalorder %v7423_v10, %v6272_v61 }
 0x4af   : > { %vm727_vm9 = vmand %vm662_vm5, %vm695_vm1 }
 0x4b0   : > { %v3210_v46 = vsel %vm727_vm9, 1.0, %v7410_v25 }
 0x4b1   : > { %v2745_v29 = vpop.f32.mrf.mxu2  ;;  %v2709_v13 = vpop.f32.mrf.mxu0 }
 0x4b2   : > { %v2746_v20 = vadd.f32 %v2745_v29, %v2665_v17  ;;  %v2764_v51 = vpop.f32.mrf.mxu3  ;;  %v6371_v19 = vpop.eup %3913  ;;  %v2710_v27 = vadd.f32 %v2709_v13, %v6361_v53 }
 0x4b3   : > { %v2765_v57 = vadd.f32 %v2764_v51, %v2665_v17  ;;  %v2728_v35 = vpop.f32.mrf.mxu1  ;;  %v6374_v9 = vpop.eup %3915  ;;  %v906_v51 = vmul.f32 0.03125, %v3229_v54  ;;  %v887_v54 = vmul.f32 0.03125, %v3210_v46 }
 0x4b4   : > { %3917 = vtanh.f32 %v2746_v20  ;;  %v2729_v39 = vadd.f32 %v2728_v35, %v6361_v53  ;;  %v6399_v17 = vpop.permute.xlu0 %2674  ;;  %v7424_v35 = vld [vmem:[#allocation46_spill] sm:$0xff] }
 0x4b5   : > { %3919 = vtanh.f32 %v2765_v57  ;;  %v927_v57 = vpack.c.bf16 %v907_v37, %v906_v51  ;;  %vm660_vm13 = vcmp.ge.s32.totalorder %v7424_v35, %v6269_v22  ;;  %vm693_vm6 = vcmp.lt.s32.totalorder %v7424_v35, %v6272_v61 }
 0x4b6   : > { %3921 = vtanh.f32 %v2710_v27  ;;  %v647_v27 = vadd.s32 168, %v7413_v43  ;;  %vm725_vm5 = vmand %vm660_vm13, %vm693_vm6 }
 0x4b7   : > { %3923 = vtanh.f32 %v2729_v39  ;;  %2954 = vmatpush.bf16.msrb.mxu2 %v927_v57 }
 0x4b8   : > { %vm680_vm4 = vcmp.ge.s32.totalorder %v647_v27, %v6269_v22  ;;  %vm713_vm10 = vcmp.lt.s32.totalorder %v647_v27, %v6272_v61  ;;  %v642_v27 = vadd.s32 128, %v7413_v43 }
 0x4b9   : > { %v2747_v11 = vpop.f32.mrf.mxu2  ;;  %v2712_v7 = vpop.f32.mrf.mxu0  ;;  %vm745_vm15 = vmand %vm680_vm4, %vm713_vm10 }
 0x4ba   : > { %v6403_v18 = vpop.eup %3917  ;;  %v2748_v62 = vadd.f32 %v2747_v11, %v6361_v53  ;;  %v2766_v63 = vpop.f32.mrf.mxu3  ;;  %v2713_v12 = vadd.f32 %v2712_v7, %v6399_v17  ;;  %vm708_vm2 = vcmp.lt.s32.totalorder %v642_v27, %v6272_v61 }
 0x4bb   : > { %v6411_v40 = vpop.eup %3919  ;;  %v2790_v45 = vadd.f32 %v6403_v18, %v6371_v19  ;;  %v2767_v60 = vadd.f32 %v2766_v63, %v6361_v53  ;;  %v2731_v30 = vpop.f32.mrf.mxu1 }
 0x4bc   : > { %v3922_v21 = vpop.eup %3921  ;;  %v2791_v23 = vadd.f32 %v6411_v40, %v6374_v9  ;;  %3925 = vtanh.f32 %v2748_v62  ;;  %v2732_v29 = vadd.f32 %v2731_v30, %v6399_v17 }
 0x4bd   : > { %v3924_v42 = vpop.eup %3923  ;;  %v6421_v20 = vmul.f32 0.5, %v2790_v45  ;;  %v2806_v53 = vpack.c.bf16 %v3922_v21, %v6371_v19  ;;  %3927 = vtanh.f32 %v2767_v60  ;;  %v646_v19 = vadd.s32 160, %v7413_v43 }
 0x4be   : > { %v6424_v13 = vmul.f32 0.5, %v2791_v23  ;;  %v2807_v32 = vpack.c.bf16 %v3924_v42, %v6374_v9  ;;  %3929 = vtanh.f32 %v2713_v12  ;;  %v3209_v9 = vsel %vm726_vm7, 1.0, %v7410_v25 }
 0x4bf   : > { %2898 = vst [vmem:[%s6429_s26] sm:$0xff] %v6421_v20  ;;  %3931 = vtanh.f32 %v2732_v29  ;;  %2822 = vmatmul.bf16.vlgmr.msra.gmra.mxu0 %v2806_v53  ;;  %vm679_vm14 = vcmp.ge.s32.totalorder %v646_v19, %v6269_v22  ;;  %vm712_vm8 = vcmp.lt.s32.totalorder %v646_v19, %v6272_v61  ;;  %v886_v3 = vmul.f32 0.03125, %v3209_v9 }
 0x4c0   : > { %2899 = vst [vmem:[%s6429_s26 + $0x8] sm:$0xff] %v6424_v13  ;;  %2841 = vmatmul.bf16.vlgmr.msra.gmra.mxu1 %v2807_v32  ;;  %vm6465_vm11 = vmand %vm679_vm14, %vm712_vm8  ;;  %v3228_v12 = vsel %vm745_vm15, 1.0, %v7410_v25  ;;  %v3208_v29 = vsel %vm725_vm5, 1.0, %v7410_v25  ;;  %v645_v53 = vadd.s32 152, %v7413_v43  ;;  %vm675_vm14 = vcmp.ge.s32.totalorder %v642_v27, %v6269_v22 }
 0x4c1   : > { %v2750_v49 = vpop.f32.mrf.mxu2  ;;  %v2714_v48 = vpop.f32.mrf.mxu0  ;;  %v3227_v45 = vsel %vm6465_vm11, 1.0, %v7410_v25  ;;  %v917_v60 = vpack.c.bf16 %v887_v54, %v886_v3  ;;  %v905_v5 = vmul.f32 0.03125, %v3228_v12  ;;  %v885_v57 = vmul.f32 0.03125, %v3208_v29  ;;  %vm740_vm11 = vmand %vm675_vm14, %vm708_vm2 }
 0x4c2   : > { %v3926_v39 = vpop.eup %3925  ;;  %v2751_v58 = vadd.f32 %v2750_v49, %v6399_v17  ;;  %v2769_v33 = vpop.f32.mrf.mxu3  ;;  %v2715_v41 = vadd.f32 %v2714_v48, %v2680_v38  ;;  %v904_v30 = vmul.f32 0.03125, %v3227_v45  ;;  %vm678_vm1 = vcmp.ge.s32.totalorder %v645_v53, %v6269_v22 }
 0x4c3   : > { %v3928_v14 = vpop.eup %3927  ;;  %v2792_v1 = vadd.f32 %v3926_v39, %v3922_v21  ;;  %v2808_v44 = vpack.c.bf16 %v3926_v39, %v6403_v18  ;;  %v2770_v55 = vadd.f32 %v2769_v33, %v6399_v17  ;;  %v2733_v11 = vpop.f32.mrf.mxu1  ;;  %v3207_v21 = vsel %vm724_vm12, 1.0, %v7410_v25  ;;  %2937 = vmatpush.bf16.msrb.mxu1 %v917_v60 }
 0x4c4   : > { %v6469_v59 = vpop.eup %3929  ;;  %v2793_v62 = vadd.f32 %v3928_v14, %v3924_v42  ;;  %v2809_v63 = vpack.c.bf16 %v3928_v14, %v6411_v40  ;;  %3933 = vtanh.f32 %v2751_v58  ;;  %v2734_v18 = vadd.f32 %v2733_v11, %v2680_v38 }
 0x4c5   : > { %v6472_v7 = vpop.eup %3931  ;;  %v6474_v17 = vmul.f32 0.5, %v2792_v1  ;;  %3935 = vtanh.f32 %v2770_v55  ;;  %2860 = vmatmul.bf16.vlgmr.msra.gmra.mxu2 %v2808_v44  ;;  %v884_v36 = vmul.f32 0.03125, %v3207_v21  ;;  %v644_v42 = vadd.s32 144, %v7413_v43 }
 0x4c6   : > { %v6483_v40 = vmul.f32 0.5, %v2793_v62  ;;  %3937 = vtanh.f32 %v2715_v41  ;;  %2879 = vmatmul.bf16.vlgmr.msrb.gmra.mxu3 %v2809_v63  ;;  %v926_v19 = vpack.c.bf16 %v905_v5, %v904_v30  ;;  %vm711_vm0 = vcmp.lt.s32.totalorder %v645_v53, %v6272_v61 }
 0x4c7   : > { %2900 = vst [vmem:[%s6429_s26 + $0x10] sm:$0xff] %v6474_v17  ;;  %3939 = vtanh.f32 %v2734_v18  ;;  %vm677_vm3 = vcmp.ge.s32.totalorder %v644_v42, %v6269_v22  ;;  %vm710_vm7 = vcmp.lt.s32.totalorder %v644_v42, %v6272_v61  ;;  %v916_v58 = vpack.c.bf16 %v885_v57, %v884_v36  ;;  %vm743_vm9 = vmand %vm678_vm1, %vm711_vm0 }
 0x4c8   : > { %2901 = vst [vmem:[%s6429_s26 + $0x18] sm:$0xff] %v6483_v40  ;;  %2955 = vmatpush.bf16.msrb.mxu2 %v926_v19  ;;  %vm742_vm13 = vmand %vm677_vm3, %vm710_vm7  ;;  %v643_v33 = vadd.s32 136, %v7413_v43  ;;  %v3226_v14 = vsel %vm743_vm9, 1.0, %v7410_v25  ;;  %v3223_v26 = vsel %vm740_vm11, 1.0, %v7410_v25  ;;  %v2928_v29 = vpack.c.bf16 %v6483_v40, %v6424_v13 }
 0x4c9   : > { %v2752_v23 = vpop.f32.mrf.mxu2  ;;  %2938 = vmatpush.bf16.msrb.mxu1 %v916_v58  ;;  %v903_v44 = vmul.f32 0.03125, %v3226_v14  ;;  %v900_v18 = vmul.f32 0.03125, %v3223_v26  ;;  %v6531_v53 = vmul.u32 16, %v7407_v8 }
 0x4ca   : > { %v3934_v51 = vpop.eup %3933  ;;  %v2753_v32 = vadd.f32 %v2752_v23, %v2680_v38  ;;  %v2771_v37 = vpop.f32.mrf.mxu3  ;;  %vm676_vm8 = vcmp.ge.s32.totalorder %v643_v33, %v6269_v22  ;;  %vm709_vm4 = vcmp.lt.s32.totalorder %v643_v33, %v6272_v61  ;;  %v2927_v23 = vpack.c.bf16 %v6474_v17, %v6421_v20 }
 0x4cb   : > { %v3936_v49 = vpop.eup %3935  ;;  %v2772_v9 = vadd.f32 %v2771_v37, %v2680_v38  ;;  %v3225_v38 = vsel %vm742_vm13, 1.0, %v7410_v25  ;;  %v2794_v55 = vadd.f32 %v3934_v51, %v6469_v59  ;;  %vm741_vm10 = vmand %vm676_vm8, %vm709_vm4  ;;  %vm518_vm12 = vcmp.ge.s32.totalorder %v7408_v16, %v6531_v53 }
 0x4cc   : > { %v3938_v39 = vpop.eup %3937  ;;  %3941 = vtanh.f32 %v2753_v32  ;;  %v902_v1 = vmul.f32 0.03125, %v3225_v38  ;;  %v2795_v41 = vadd.f32 %v3936_v49, %v6472_v7  ;;  %v3224_v63 = vsel %vm741_vm10, 1.0, %v7410_v25 }
 0x4cd   : > { %v3940_v48 = vpop.eup %3939  ;;  %3943 = vtanh.f32 %v2772_v9  ;;  %v2810_v46 = vpack.c.bf16 %v3938_v39, %v6469_v59  ;;  %v2802_v62 = vmul.f32 0.5, %v2794_v55  ;;  %v901_v45 = vmul.f32 0.03125, %v3224_v63 }
 0x4ce   : > { %v2811_v3 = vpack.c.bf16 %v3940_v48, %v6472_v7  ;;  %v925_v11 = vpack.c.bf16 %v903_v44, %v902_v1  ;;  %v2803_v54 = vmul.f32 0.5, %v2795_v41  ;;  %vm519_vm15 = vcmp.ge.s32.totalorder %v7409_v4, %v6531_v53 }
 0x4cf   : > { %2827 = vmatmul.bf16.gmra.mxu0 %v2810_v46  ;;  %2902 = vst [vmem:[%s6429_s26 + $0x20] sm:$0xff] %v2802_v62  ;;  %v924_v30 = vpack.c.bf16 %v901_v45, %v900_v18  ;;  %vm516_vm7 = vcmp.ge.s32.totalorder %v7411_v0, %v6531_v53  ;;  %vm517_vm0 = vcmp.ge.s32.totalorder %v7412_v52, %v6531_v53 }
 0x4d0   : > { %2846 = vmatmul.bf16.gmra.mxu1 %v2811_v3  ;;  %2956 = vmatpush.bf16.msrb.mxu2 %v925_v11  ;;  %2903 = vst [vmem:[%s6429_s26 + $0x28] sm:$0xff] %v2803_v54  ;;  %vm514_vm2 = vcmp.ge.s32.totalorder %v7414_v31, %v6531_v53  ;;  %vm515_vm4 = vcmp.ge.s32.totalorder %v7415_v28, %v6531_v53 }
 0x4d2   : > { %v3942_v22 = vpop.eup %3941 }
 0x4d3   : > { %v3944_v61 = vpop.eup %3943  ;;  %v2812_v59 = vpack.c.bf16 %v3942_v22, %v3934_v51  ;;  %v2796_v60 = vadd.f32 %v3942_v22, %v3938_v39  ;;  %v6534_v51 = vmul.u32 16, %v6266_v50 }
 0x4d4   : > { %v2813_v7 = vpack.c.bf16 %v3944_v61, %v3936_v49  ;;  %v2797_v12 = vadd.f32 %v3944_v61, %v3940_v48  ;;  %2957 = vmatpush.bf16.msrb.mxu2 %v924_v30  ;;  %v7427_v30 = vld [vmem:[#allocation62_spill] sm:$0xff] }
 0x4d5   : > { %2865 = vmatmul.bf16.gmra.mxu2 %v2812_v59  ;;  %v2804_v5 = vmul.f32 0.5, %v2796_v60  ;;  %vm536_vm6 = vcmp.lt.s32.totalorder %v7408_v16, %v6534_v51  ;;  %vm537_vm5 = vcmp.lt.s32.totalorder %v7409_v4, %v6534_v51  ;;  %vm534_vm13 = vcmp.lt.s32.totalorder %v7411_v0, %v6534_v51 }
 0x4d6   : > { %2884 = vmatmul.bf16.gmra.mxu3 %v2813_v7  ;;  %v2805_v21 = vmul.f32 0.5, %v2797_v12  ;;  %vm552_vm3 = vmand %vm518_vm12, %vm536_vm6  ;;  %vm535_vm9 = vcmp.lt.s32.totalorder %v7412_v52, %v6534_v51  ;;  %vm532_vm11 = vcmp.lt.s32.totalorder %v7414_v31, %v6534_v51  ;;  %vm533_vm10 = vcmp.lt.s32.totalorder %v7415_v28, %v6534_v51 }
 0x4d7   : > { %2904 = vst [vmem:[%s6429_s26 + $0x30] sm:$0xff] %v2804_v5  ;;  %v2929_v36 = vpack.c.bf16 %v2804_v5, %v2802_v62  ;;  %vm553_vm1 = vmand %vm519_vm15, %vm537_vm5  ;;  %v3205_v8 = vsel %vm552_vm3, 1.0, %v7410_v25  ;;  %vm512_vm6 = vcmp.ge.s32.totalorder %v7416_v47, %v6531_v53  ;;  %vm513_vm5 = vcmp.ge.s32.totalorder %v7417_v34, %v6531_v53 }
 0x4d8   : > { %2905 = vst [vmem:[%s6429_s26 + $0x38] sm:$0xff] %v2805_v21  ;;  %v2930_v42 = vpack.c.bf16 %v2805_v21, %v2803_v54  ;;  %v3206_v20 = vsel %vm553_vm1, 1.0, %v7410_v25  ;;  %v632_v50 = vmul.f32 0.0625, %v3205_v8  ;;  %vm550_vm14 = vmand %vm516_vm7, %vm534_vm13  ;;  %vm530_vm3 = vcmp.lt.s32.totalorder %v7416_v47, %v6534_v51 }
 0x4d9   : > { %v633_v13 = vmul.f32 0.0625, %v3206_v20  ;;  %vm551_vm8 = vmand %vm517_vm0, %vm535_vm9  ;;  %v3203_v4 = vsel %vm550_vm14, 1.0, %v7410_v25  ;;  %vm531_vm1 = vcmp.lt.s32.totalorder %v7417_v34, %v6534_v51  ;;  %vm510_vm13 = vcmp.ge.s32.totalorder %v7418_v2, %v6531_v53 }
 0x4da   : > { %v3204_v17 = vsel %vm551_vm8, 1.0, %v7410_v25  ;;  %v630_v40 = vmul.f32 0.0625, %v3203_v4  ;;  %vm548_vm12 = vmand %vm514_vm2, %vm532_vm11  ;;  %vm511_vm9 = vcmp.ge.s32.totalorder %v7419_v24, %v6531_v53  ;;  %vm528_vm14 = vcmp.lt.s32.totalorder %v7418_v2, %v6534_v51 }
 0x4db   : > { %v641_v16 = vpack.c.bf16 %v633_v13, %v632_v50  ;;  %v631_v32 = vmul.f32 0.0625, %v3204_v17  ;;  %vm549_vm15 = vmand %vm515_vm4, %vm533_vm10  ;;  %v3201_v52 = vsel %vm548_vm12, 1.0, %v7410_v25  ;;  %vm529_vm8 = vcmp.lt.s32.totalorder %v7419_v24, %v6534_v51 }
 0x4dc   : > { %v3202_v37 = vsel %vm549_vm15, 1.0, %v7410_v25  ;;  %v628_v19 = vmul.f32 0.0625, %v3201_v52  ;;  %vm546_vm7 = vmand %vm512_vm6, %vm530_vm3  ;;  %vm508_vm11 = vcmp.ge.s32.totalorder %v7420_v6, %v6531_v53  ;;  %vm509_vm10 = vcmp.ge.s32.totalorder %v7421_v15, %v6531_v53 }
 0x4dd   : > { %2908 = vmatpush.bf16.msrb.mxu0 %v641_v16  ;;  %v640_v0 = vpack.c.bf16 %v631_v32, %v630_v40  ;;  %v629_v57 = vmul.f32 0.0625, %v3202_v37  ;;  %vm547_vm0 = vmand %vm513_vm5, %vm531_vm1  ;;  %v3199_v28 = vsel %vm546_vm7, 1.0, %v7410_v25  ;;  %vm526_vm12 = vcmp.lt.s32.totalorder %v7420_v6, %v6534_v51 }
 0x4de   : > { %v3200_v27 = vsel %vm547_vm0, 1.0, %v7410_v25  ;;  %v626_v49 = vmul.f32 0.0625, %v3199_v28  ;;  %vm544_vm2 = vmand %vm510_vm13, %vm528_vm14  ;;  %vm527_vm15 = vcmp.lt.s32.totalorder %v7421_v15, %v6534_v51  ;;  %vm506_vm3 = vcmp.ge.s32.totalorder %v7422_v56, %v6531_v53 }
 0x4df   : > { %v639_v31 = vpack.c.bf16 %v629_v57, %v628_v19  ;;  %v627_v9 = vmul.f32 0.0625, %v3200_v27  ;;  %vm545_vm4 = vmand %vm511_vm9, %vm529_vm8  ;;  %v3197_v34 = vsel %vm544_vm2, 1.0, %v7410_v25  ;;  %vm507_vm1 = vcmp.ge.s32.totalorder %v7423_v10, %v6531_v53  ;;  %v7431_v27 = vld [vmem:[#allocation90_spill] sm:$0xff] }
 0x4e0   : > { %2939 = vmatmul.bf16.vlgmr.msrb.gmra.mxu1 %v2927_v23  ;;  %v3198_v39 = vsel %vm545_vm4, 1.0, %v7410_v25  ;;  %v624_v58 = vmul.f32 0.0625, %v3197_v34  ;;  %vm542_vm6 = vmand %vm508_vm11, %vm526_vm12  ;;  %vm524_vm7 = vcmp.lt.s32.totalorder %v7422_v56, %v6534_v51  ;;  %vm525_vm0 = vcmp.lt.s32.totalorder %v7423_v10, %v6534_v51 }
 0x4e1   : > { %2909 = vmatpush.bf16.msrb.mxu0 %v640_v0  ;;  %v638_v47 = vpack.c.bf16 %v627_v9, %v626_v49  ;;  %v625_v33 = vmul.f32 0.0625, %v3198_v39  ;;  %vm543_vm5 = vmand %vm509_vm10, %vm527_vm15  ;;  %v3195_v24 = vsel %vm542_vm6, 1.0, %v7410_v25  ;;  %vm504_vm14 = vcmp.ge.s32.totalorder %v7413_v43, %v6531_v53 }
 0x4e2   : > { %v3196_v48 = vsel %vm543_vm5, 1.0, %v7410_v25  ;;  %v622_v46 = vmul.f32 0.0625, %v3195_v24  ;;  %vm540_vm13 = vmand %vm506_vm3, %vm524_vm7  ;;  %vm505_vm8 = vcmp.ge.s32.totalorder %v7424_v35, %v6531_v53  ;;  %vm522_vm2 = vcmp.lt.s32.totalorder %v7413_v43, %v6534_v51 }
 0x4e3   : > { %v637_v2 = vpack.c.bf16 %v625_v33, %v624_v58  ;;  %v623_v38 = vmul.f32 0.0625, %v3196_v48  ;;  %vm541_vm9 = vmand %vm507_vm1, %vm525_vm0  ;;  %v3193_v15 = vsel %vm540_vm13, 1.0, %v7410_v25  ;;  %vm523_vm4 = vcmp.lt.s32.totalorder %v7424_v35, %v6534_v51 }
 0x4e4   : > { %v3194_v3 = vsel %vm541_vm9, 1.0, %v7410_v25  ;;  %v620_v14 = vmul.f32 0.0625, %v3193_v15  ;;  %vm538_vm11 = vmand %vm504_vm14, %vm522_vm2 }
 0x4e5   : > { %2958 = vmatmul.bf16.vlgmr.msrb.gmra.mxu2 %v2928_v29  ;;  %2910 = vmatpush.bf16.msrb.mxu0 %v639_v31  ;;  %v636_v6 = vpack.c.bf16 %v623_v38, %v622_v46  ;;  %v621_v1 = vmul.f32 0.0625, %v3194_v3  ;;  %vm539_vm10 = vmand %vm505_vm8, %vm523_vm4  ;;  %v3191_v10 = vsel %vm538_vm11, 1.0, %v7410_v25  ;;  %v7428_v29 = vld [vmem:[#allocation70_spill] sm:$0xff]  ;;  %v7430_v31 = vld [vmem:[#allocation92_spill] sm:$0xff] }
 0x4e6   : > { %v3192_v44 = vsel %vm539_vm10, 1.0, %v7410_v25  ;;  %v618_v55 = vmul.f32 0.0625, %v3191_v10 }
 0x4e7   : > { %v635_v56 = vpack.c.bf16 %v621_v1, %v620_v14  ;;  %v619_v41 = vmul.f32 0.0625, %v3192_v44 }
 0x4e9   : > { %2911 = vmatpush.bf16.msrb.mxu0 %v638_v47  ;;  %v634_v11 = vpack.c.bf16 %v619_v41, %v618_v55 }
 0x4ed   : > { %2912 = vmatpush.bf16.msrb.mxu0 %v637_v2 }
 0x4f0   : > { %2944 = vmatmul.bf16.gmra.mxu1 %v2929_v36 }
 0x4f1   : > { %2913 = vmatpush.bf16.msrb.mxu0 %v636_v6 }
 0x4f5   : > { %2963 = vmatmul.bf16.gmra.mxu2 %v2930_v42  ;;  %2914 = vmatpush.bf16.msrb.mxu0 %v635_v56  ;;  %v7429_v42 = vld [vmem:[#allocation88_spill] sm:$0xff] }
 0x4f9   : > { %2915 = vmatpush.bf16.msrb.mxu0 %v634_v11 }
 0x53c   : > { %v2823_v26 = vpop.f32.mrf.mxu0 }
 0x53d   : > { %v2842_v62 = vpop.f32.mrf.mxu1 }
 0x53e   : > { %v2843_v18 = vadd.f32 %v2842_v62, %v2823_v26 }
 0x544   : > { %v2825_v22 = vpop.f32.mrf.mxu0 }
 0x545   : > { %v2844_v63 = vpop.f32.mrf.mxu1 }
 0x546   : > { %v2845_v61 = vadd.f32 %v2844_v63, %v2825_v22 }
 0x548   : > { %v2861_v43 = vpop.f32.mrf.mxu2 }
 0x549   : > { %v2880_v54 = vpop.f32.mrf.mxu3  ;;  %v2862_v35 = vadd.f32 %v2861_v43, %v2843_v18 }
 0x54b   : > { %v2881_v59 = vadd.f32 %v2880_v54, %v2862_v35 }
 0x54c   : > { %v2828_v12 = vpop.f32.mrf.mxu0 }
 0x54d   : > { %v2847_v25 = vpop.f32.mrf.mxu1  ;;  %v2890_v5 = vmul.f32 %v2881_v59, %v7427_v30 }
 0x54e   : > { %v2848_v8 = vadd.f32 %v2847_v25, %v2828_v12 }
 0x54f   : > { %v2894_v36 = vadd.f32 %v2890_v5, %v7428_v29 }
 0x550   : > { %v2863_v45 = vpop.f32.mrf.mxu2 }
 0x551   : > { %v2864_v60 = vadd.f32 %v2863_v45, %v2845_v61  ;;  %v2882_v7 = vpop.f32.mrf.mxu3 }
 0x553   : > { %v2883_v21 = vadd.f32 %v2882_v7, %v2864_v60 }
 0x554   : > { %v2830_v16 = vpop.f32.mrf.mxu0 }
 0x555   : > { %v2891_v23 = vmul.f32 %v2883_v21, %v7427_v30  ;;  %v2849_v4 = vpop.f32.mrf.mxu1 }
 0x556   : > { %v2850_v17 = vadd.f32 %v2849_v4, %v2830_v16 }
 0x557   : > { %v2895_v53 = vadd.f32 %v2891_v23, %v7429_v42 }
 0x558   : > { %v2866_v51 = vpop.f32.mrf.mxu2 }
 0x559   : > { %v2906_v20 = vpack.c.bf16 %v2895_v53, %v2894_v36  ;;  %v2885_v50 = vpop.f32.mrf.mxu3  ;;  %v2867_v13 = vadd.f32 %v2866_v51, %v2848_v8 }
 0x55b   : > { %2916 = vmatmul.bf16.vlgmr.msrb.gmra.mxu0 %v2906_v20  ;;  %v2886_v40 = vadd.f32 %v2885_v50, %v2867_v13 }
 0x55d   : > { %v2892_v37 = vmul.f32 %v2886_v40, %v7427_v30  ;;  %v2940_v33 = vpop.f32.mrf.mxu1 }
 0x55f   : > { %v2896_v28 = vadd.f32 %v2892_v37, %v7430_v31 }
 0x560   : > { %v2868_v32 = vpop.f32.mrf.mxu2 }
 0x561   : > { %v2869_v0 = vadd.f32 %v2868_v32, %v2850_v17  ;;  %v2887_v52 = vpop.f32.mrf.mxu3 }
 0x563   : > { %v2888_v19 = vadd.f32 %v2887_v52, %v2869_v0 }
 0x565   : > { %v2893_v57 = vmul.f32 %v2888_v19, %v7427_v30 }
 0x567   : > { %v2897_v49 = vadd.f32 %v2893_v57, %v7431_v27 }
 0x568   : > { %v2959_v58 = vpop.f32.mrf.mxu2 }
 0x569   : > { %v2907_v9 = vpack.c.bf16 %v2897_v49, %v2896_v28  ;;  %v2960_v24 = vadd.f32 %v2959_v58, %v2940_v33 }
 0x56b   : > { %2921 = vmatmul.bf16.gmra.mxu0 %v2907_v9 }
 0x570   : > { %v2961_v48 = vpop.f32.mrf.mxu2 }
 0x5d8   : > { %v2917_v47 = vpop.f32.mrf.mxu0 }
 0x5d9   : > { %2969 = vxpose.xlu2.b32.start [1/8] (short) (narrow) %v2917_v47, 8 }
 0x5e0   : > { %v2919_v34 = vpop.f32.mrf.mxu0 }
 0x5e1   : > { %2970 = vxpose.xlu2.b32.cont [2/8] (short) (narrow) %v2919_v34, 8 }
 0x5e8   : > { %v2922_v39 = vpop.f32.mrf.mxu0 }
 0x5e9   : > { %2971 = vxpose.xlu2.b32.cont [3/8] (short) (narrow) %v2922_v39, 8 }
 0x5f0   : > { %v2924_v2 = vpop.f32.mrf.mxu0 }
 0x5f1   : > { %2972 = vxpose.xlu2.b32.cont [4/8] (short) (narrow) %v2924_v2, 8 }
 0x5f2   : > { %3976 = shalt.err (!%p3973_p10)
}
 0x5f3   : > { %s4050_s21 = smov 256   ;;  %s4051_s20 = smov 512   ;;  %v2942_v46 = vpop.f32.mrf.mxu1  ;;  %v2964_v6 = vpop.f32.mrf.mxu2  ;;  %vm3001_vm12 = vcmask 523264  }
 0x5f4   : > { %s4052_s25 = smov 16   ;;  %v2962_v38 = vadd.f32 %v2961_v48, %v2942_v46  ;;  %s3184_s1 = sshll.u32 %s4497_s0, 3 }
 0x5f5   : > { %3753 = dma.vmem_to_hbm [thread:$0]  (%p4147_p6), %s3023_s18, 1024, %s3025_s27, %s3005_s30, %s4050_s21, %s4051_s20, %s4052_s25  }
 0x5f6   : > { %s3736_s2 = sshll.u32 %s4129_s17, 3  ;;  %s463_s27 = scalar_lea.vmem [#allocation5], %s3184_s1 }
 0x5f7   : > { %s3037_s18 = scalar_lea.hbm %s6684_s10, %s3736_s2  ;;  %s3039_s30 = sshll.u32 %s463_s27, 4  ;;  %s3040_s30 = int_to_ptr.vmem [resolvable:$true] %s3039_s30 }
 0x5f8   : > { %s3041_s11 = sshll.u32 %s3037_s18, 4  ;;  %s3010_s12 = scalar_lea.sflag [#allocation6], %s4497_s0  ;;  %s3042_s11 = int_to_ptr.hbm [resolvable:$true] %s3041_s11 }
 0x5f9   : > { %2973 = vxpose.xlu2.b32.cont [5/8] (short) (narrow) %v2960_v24, 8  ;;  %s3991_s29 = sshra.s32 %s3042_s11, 4  ;;  %s3997_s20 = scalar_lea.hbm %s6684_s10, 16  ;;  %s3992_s29 = int_to_ptr.hbm [resolvable:$true] %s3991_s29 }
 0x5fa   : > { %s3993_s26 = scalar_lea.hbm %s3992_s29, 8  ;;  %p3998_p0 = scmp.lt.s32.totalorder %s3992_s29, %s6684_s10 }
 0x5fb   : > { %v2945_v15 = vpop.f32.mrf.mxu1  ;;  %v2966_v14 = vpop.f32.mrf.mxu2  ;;  %p3994_p11 = scmp.ne.s32.totalorder %s3992_s29, %s3993_s26  ;;  %p3999_p1 = scmp.lt.s32.totalorder %s3997_s20, %s3993_s26 }
 0x5fc   : > { %v2965_v3 = vadd.f32 %v2964_v6, %v2945_v15 }
 0x5fd   : > { %p3995_p12 = pnand %p3994_p11, %p4147_p6  ;;  %p4000_p2 = por %p3999_p1, %p3998_p0 }
 0x5ff   : > { %p3996_p13 = pneg %p3995_p12 }
 0x601   : > { %2974 = vxpose.xlu2.b32.cont [6/8] (short) (narrow) %v2962_v38, 8  ;;  %p4001_p3 = pnand %p4000_p2, %p3996_p13 }
 0x603   : > { %v2947_v1 = vpop.f32.mrf.mxu1 }
 0x604   : > { %v2967_v56 = vadd.f32 %v2966_v14, %v2947_v1 }
 0x609   : > { %2975 = vxpose.xlu2.b32.cont [7/8] (short) (narrow) %v2965_v3, 8 }
 0x611   : > { %2976 = vxpose.xlu2.b32.end [8/8] (short) (narrow) %v2967_v56, 8 }
 0x672   : > { %v2985_v10 = vpop.trf.xlu2 }
 0x673   : > { %v3002_v44 = vsel %vm3001_vm12, %v2985_v10, 0.0 }
 0x674   : > { %3003 = vst [vmem:[%s463_s27] sm:$0xff] %v3002_v44 }
 0x675   : > { %4004 = shalt.err (!%p4001_p3)
}
 0x676   : > { %3754 = dma.vmem_to_hbm [thread:$0]  (%p4147_p6), %s3040_s30, 128, %s3042_s11, %s3010_s12  }
 0x677 PF: > { %s3053_s0 = sand.u32 1, %s4031_s13   ;;  %p3758_p4 = pnand %p3178_p9, %p4151_p8 }
 0x678   : > { %s3054_s2 = scalar_lea.sflag [#allocation4], %s3053_s0 }
 0x679   : > { %p3759_p5 = pneg %p3758_p4 }
 0x67b   : > { %4022 = dma.done.wait (%p3759_p5), %s3054_s2, 1024  }
 0x67c   : > { %4024 = vsyncadd (%p3759_p5), %s3054_s2, 4294966272  ;;  %s3064_s3 = scalar_lea.sflag [#allocation6], %s3053_s0 }
 0x67d   : > { %4026 = dma.done.wait (%p3759_p5), %s3064_s3, 128  }
 0x67e   : > { %4028 = vsyncadd (%p3759_p5), %s3064_s3, 4294967168  ;;  %p24_p6 = scmp.ge.s32.totalorder %s4133_s19, 4   ;;  %s7432_s13 = smov %s4035_s14 }
 0x67f   : > { %s7433_s14 = smov %s4039_s15  ;;  %s7434_s15 = smov %s4145_s22 }
 0x680   : > { %s7435_s16 = smov %s4133_s19  ;;  %26 = sbr.rel (!%p24_p6) target bundleno = 10 (0xa), region = 166 }
 0x685   :  { %3070 = vsyncpa [#allocation4], 1 }
 0x686   :  { %3072 = vsyncpa [#allocation4 + $0x1], 1 }
 0x687   :  { %3073 = vsyncpa [#allocation6], 1 }
 0x688   :  { %3075 = vsyncpa [#allocation6 + $0x1], 1 }

</bundles_post_ra>
